<compile_context>
chip_gen: v6e
topology: v6e:2x2x1
jax: 0.10.0
libtpu: 0.0.40
codegen_flags: <defaults>
</compile_context>

<pallas_src>
import jax
import jax.numpy as jnp
from jax.experimental import pallas as pl
from jax.experimental.pallas import tpu as pltpu

# Padded, lane-aligned sizes (static for this architecture).
K1 = 1024      # layer-1 contraction: 1000 -> 1024
H3P = 128      # layer-3 output:      64   -> 128
OUTP = 128     # logits lanes:        num_classes -> 128


def mlp3_kernel(x_ref, w1_ref, b1_ref, w2_ref, b2_ref,
                w3_ref, b3_ref, w4_ref, b4_ref, o_ref):
    # x / weights are bf16; every dot accumulates in f32 on the MXU, biases are
    # added in f32, ReLU on the VPU, then re-cast to bf16 for the next stage.
    x = x_ref[...]                                                   # (TB, 1024) bf16

    h1 = jnp.dot(x, w1_ref[...], preferred_element_type=jnp.float32) + b1_ref[...]
    h1 = jnp.maximum(h1, 0.0).astype(jnp.bfloat16)                   # (TB, 1024)

    h2 = jnp.dot(h1, w2_ref[...], preferred_element_type=jnp.float32) + b2_ref[...]
    h2 = jnp.maximum(h2, 0.0).astype(jnp.bfloat16)                   # (TB, 256)

    h3 = jnp.dot(h2, w3_ref[...], preferred_element_type=jnp.float32) + b3_ref[...]
    h3 = jnp.maximum(h3, 0.0).astype(jnp.bfloat16)                   # (TB, 128) padded

    logits = jnp.dot(h3, w4_ref[...], preferred_element_type=jnp.float32) + b4_ref[...]
    o_ref[...] = logits.astype(o_ref.dtype)                          # (TB, 128) bf16, padded


def prepare_params(params):
    """One-time cast/pad of the (in, out)-layout f32 params into the kernel's
    bf16 lane-aligned layout. Call once, reuse the result for every forward."""
    (w1, b1), (w2, b2), (w3, b3), (w4, b4) = params
    num_classes = w4.shape[1]
    bf16 = jnp.bfloat16

    w1p = jnp.pad(w1.astype(bf16), ((0, K1 - 1000), (0, 0)))                 # (1024, 1024)
    w2p = w2.astype(bf16)                                                     # (1024, 256)
    w3p = jnp.pad(w3.astype(bf16), ((0, 0), (0, H3P - 64)))                   # (256, 128)
    w4p = jnp.pad(w4.astype(bf16), ((0, H3P - 64), (0, OUTP - num_classes)))  # (128, 128)

    b1p = b1.astype(jnp.float32)                                              # (1, 1024)
    b2p = b2.astype(jnp.float32)                                              # (1, 256)
    b3p = jnp.pad(b3.astype(jnp.float32), ((0, 0), (0, H3P - 64)))            # (1, 128)
    b4p = jnp.pad(b4.astype(jnp.float32), ((0, 0), (0, OUTP - num_classes)))  # (1, 128)

    prepared = (w1p, b1p, w2p, b2p, w3p, b3p, w4p, b4p)
    return prepared, num_classes


def neural_network_3layer(x, prepared, num_classes, *, max_batch_tile=512):
    """Forward pass. x: (B, *) flattened to (B, 1000). Returns (B, num_classes) f32.
    `prepared` comes from prepare_params() (done once, outside the hot path)."""
    B = x.shape[0]
    x2d = x.reshape(B, -1)                                            # nn.Flatten()
    assert x2d.shape[1] == 1000, f"expected 1000 flattened features, got {x2d.shape[1]}"

    # Batch tile: multiple of 16 sublanes (bf16 packing), capped; pad B up to it.
    TB = min(max_batch_tile, max(16, -(-B // 16) * 16))
    B_pad = -(-B // TB) * TB
    nb = B_pad // TB

    # Single fused pad: rows B -> B_pad, cols 1000 -> 1024 (zero K-padding is
    # matched by zero rows in W1, so the contraction is exact).
    xp = jnp.pad(x2d.astype(jnp.bfloat16), ((0, B_pad - B), (0, K1 - 1000)))

    grid_spec = pltpu.PrefetchScalarGridSpec(
        num_scalar_prefetch=0,
        grid=(nb,),
        in_specs=[
            pl.BlockSpec((TB, K1),     lambda i: (i, 0)),   # x tile (pipelined)
            pl.BlockSpec((K1, 1024),   lambda i: (0, 0)),   # W1 (VMEM-resident)
            pl.BlockSpec((1, 1024),    lambda i: (0, 0)),   # b1
            pl.BlockSpec((1024, 256),  lambda i: (0, 0)),   # W2
            pl.BlockSpec((1, 256),     lambda i: (0, 0)),   # b2
            pl.BlockSpec((256, H3P),   lambda i: (0, 0)),   # W3 (padded)
            pl.BlockSpec((1, H3P),     lambda i: (0, 0)),   # b3
            pl.BlockSpec((H3P, OUTP),  lambda i: (0, 0)),   # W4 (padded)
            pl.BlockSpec((1, OUTP),    lambda i: (0, 0)),   # b4
        ],
        out_specs=pl.BlockSpec((TB, OUTP), lambda i: (i, 0)),
    )

    out = pl.pallas_call(
        mlp3_kernel,
        out_shape=jax.ShapeDtypeStruct((B_pad, OUTP), jnp.bfloat16),  # bf16 writeback
        grid_spec=grid_spec,
        compiler_params=pltpu.CompilerParams(
            dimension_semantics=("parallel",),   # shards batch tiles across TCs (v7x, nb>=2)
            vmem_limit_bytes=32 << 20,           # fits all generations, incl. v7x
        ),
    )(xp, *prepared)

    return out[:B, :num_classes].astype(jnp.float32)


def init_params(key, num_classes):
    """Matches PyTorch nn.Linear's U(-1/sqrt(fan_in), 1/sqrt(fan_in)) init scale.
    Weights stored as (in, out) — i.e. already transposed vs. PyTorch."""
    dims = [(1000, 1024), (1024, 256), (256, 64), (64, num_classes)]
    params = []
    for fan_in, fan_out in dims:
        key, kw, kb = jax.random.split(key, 3)
        bound = 1.0 / jnp.sqrt(float(fan_in))
        w = jax.random.uniform(kw, (fan_in, fan_out), jnp.float32, -bound, bound)
        b = jax.random.uniform(kb, (1, fan_out), jnp.float32, -bound, bound)
        params.append((w, b))
    return params


def _reference_bf16(x2d, params):
    """Same bf16-input / f32-accumulate math as the kernel."""
    h = x2d
    for i, (w, b) in enumerate(params):
        h = jnp.dot(h.astype(jnp.bfloat16), w.astype(jnp.bfloat16),
                    preferred_element_type=jnp.float32) + b
        if i < 3:
            h = jnp.maximum(h, 0.0)
    return h


def _reference_f32(x2d, params):
    h = x2d
    for i, (w, b) in enumerate(params):
        h = h @ w + b
        if i < 3:
            h = jnp.maximum(h, 0.0)
    return h


if __name__ == "__main__":
    num_classes = 10
    batch = 8

    key = jax.random.PRNGKey(0)
    key, kx = jax.random.split(key)
    # Input flattens to 1000 features (e.g. (B, 10, 100) -> (B, 1000)).
    x = jax.random.normal(kx, (batch, 10, 100), jnp.float32)

    params = init_params(key, num_classes)
    prepared, nc = prepare_params(params)          # one-time cast/pad (out of hot path)

    logits = neural_network_3layer(x, prepared, nc)
    jax.block_until_ready(logits)
    assert logits.shape == (batch, num_classes)

    # Reference checks (bf16-matched math, then loose full-f32 sanity).
    x2d = x.reshape(batch, -1)
    ref_bf16 = _reference_bf16(x2d, params)
    assert jnp.allclose(logits, ref_bf16, atol=2e-2, rtol=2e-2), \
        f"max abs err {jnp.max(jnp.abs(logits - ref_bf16))}"
    ref32 = _reference_f32(x2d, params)
    assert jnp.allclose(logits, ref32, atol=1e-1, rtol=1e-1)

    # Exercise multi-tile grid + row padding: B=40 with a 16-row tile -> 3 grid steps.
    key, kx2 = jax.random.split(key)
    x2 = jax.random.normal(kx2, (40, 10, 100), jnp.float32)
    logits2 = neural_network_3layer(x2, prepared, nc, max_batch_tile=16)
    jax.block_until_ready(logits2)
    assert logits2.shape == (40, num_classes)
    ref2 = _reference_bf16(x2.reshape(40, -1), params)
    assert jnp.allclose(logits2, ref2, atol=2e-2, rtol=2e-2), \
        f"max abs err {jnp.max(jnp.abs(logits2 - ref2))}"

    print("KERNEL_OK")
</pallas_src>

<mosaic_0001>
module attributes {stable_mosaic.version = 11 : i64} {
  func.func @mlp3_kernel(%arg0: i32, %arg1: memref<16x1024xbf16, #tpu.memory_space<vmem>>, %arg2: memref<1024x1024xbf16, #tpu.memory_space<vmem>>, %arg3: memref<1x1024xf32, #tpu.memory_space<vmem>>, %arg4: memref<1024x256xbf16, #tpu.memory_space<vmem>>, %arg5: memref<1x256xf32, #tpu.memory_space<vmem>>, %arg6: memref<256x128xbf16, #tpu.memory_space<vmem>>, %arg7: memref<1x128xf32, #tpu.memory_space<vmem>>, %arg8: memref<128x128xbf16, #tpu.memory_space<vmem>>, %arg9: memref<1x128xf32, #tpu.memory_space<vmem>>, %arg10: memref<16x128xbf16, #tpu.memory_space<vmem>>) attributes {dimension_semantics = [#tpu.dimension_semantics<parallel>], iteration_bounds = array<i64: 1>, scalar_prefetch = 0 : i64, scratch_operands = 0 : i64, tpu.core_type = #tpu.core_type<tc>, window_params = [{transform_indices = @transform_0, window_bounds = array<i64: 16, 1024>}, {pipeline_mode = #tpu.pipeline_mode<synchronous>, transform_indices = @transform_1, window_bounds = array<i64: 1024, 1024>}, {pipeline_mode = #tpu.pipeline_mode<synchronous>, transform_indices = @transform_2, window_bounds = array<i64: 1, 1024>}, {pipeline_mode = #tpu.pipeline_mode<synchronous>, transform_indices = @transform_3, window_bounds = array<i64: 1024, 256>}, {pipeline_mode = #tpu.pipeline_mode<synchronous>, transform_indices = @transform_4, window_bounds = array<i64: 1, 256>}, {pipeline_mode = #tpu.pipeline_mode<synchronous>, transform_indices = @transform_5, window_bounds = array<i64: 256, 128>}, {pipeline_mode = #tpu.pipeline_mode<synchronous>, transform_indices = @transform_6, window_bounds = array<i64: 1, 128>}, {pipeline_mode = #tpu.pipeline_mode<synchronous>, transform_indices = @transform_7, window_bounds = array<i64: 128, 128>}, {pipeline_mode = #tpu.pipeline_mode<synchronous>, transform_indices = @transform_8, window_bounds = array<i64: 1, 128>}, {transform_indices = @transform_9, window_bounds = array<i64: 16, 128>}]} {
    %c0 = arith.constant 0 : index
    %c0_0 = arith.constant 0 : index
    %0 = vector.load %arg1[%c0, %c0_0] : memref<16x1024xbf16, #tpu.memory_space<vmem>>, vector<16x1024xbf16>
    %c0_1 = arith.constant 0 : index
    %c0_2 = arith.constant 0 : index
    %1 = vector.load %arg2[%c0_1, %c0_2] : memref<1024x1024xbf16, #tpu.memory_space<vmem>>, vector<1024x1024xbf16>
    %cst = arith.constant dense<0.000000e+00> : vector<16x1024xf32>
    %2 = tpu.matmul %0, %1, %cst {dimension_numbers = #tpu.dot_dimension_numbers<[1], [0], [0], [1], [0, 0, 1, 1], [], []>} : vector<16x1024xbf16>, vector<1024x1024xbf16>, vector<16x1024xf32> -> vector<16x1024xf32>
    %c0_3 = arith.constant 0 : index
    %c0_4 = arith.constant 0 : index
    %3 = vector.load %arg3[%c0_3, %c0_4] : memref<1x1024xf32, #tpu.memory_space<vmem>>, vector<1x1024xf32>
    %4 = vector.broadcast %3 : vector<1x1024xf32> to vector<16x1024xf32>
    %5 = arith.addf %2, %4 : vector<16x1024xf32>
    %cst_5 = arith.constant 0.000000e+00 : f32
    %6 = vector.broadcast %cst_5 : f32 to vector<16x1024xf32>
    %7 = arith.maximumf %5, %6 : vector<16x1024xf32>
    %8 = arith.truncf %7 : vector<16x1024xf32> to vector<16x1024xbf16>
    %c0_6 = arith.constant 0 : index
    %c0_7 = arith.constant 0 : index
    %9 = vector.load %arg4[%c0_6, %c0_7] : memref<1024x256xbf16, #tpu.memory_space<vmem>>, vector<1024x256xbf16>
    %cst_8 = arith.constant dense<0.000000e+00> : vector<16x256xf32>
    %10 = tpu.matmul %8, %9, %cst_8 {dimension_numbers = #tpu.dot_dimension_numbers<[1], [0], [0], [1], [0, 0, 1, 1], [], []>} : vector<16x1024xbf16>, vector<1024x256xbf16>, vector<16x256xf32> -> vector<16x256xf32>
    %c0_9 = arith.constant 0 : index
    %c0_10 = arith.constant 0 : index
    %11 = vector.load %arg5[%c0_9, %c0_10] : memref<1x256xf32, #tpu.memory_space<vmem>>, vector<1x256xf32>
    %12 = vector.broadcast %11 : vector<1x256xf32> to vector<16x256xf32>
    %13 = arith.addf %10, %12 : vector<16x256xf32>
    %cst_11 = arith.constant 0.000000e+00 : f32
    %14 = vector.broadcast %cst_11 : f32 to vector<16x256xf32>
    %15 = arith.maximumf %13, %14 : vector<16x256xf32>
    %16 = arith.truncf %15 : vector<16x256xf32> to vector<16x256xbf16>
    %c0_12 = arith.constant 0 : index
    %c0_13 = arith.constant 0 : index
    %17 = vector.load %arg6[%c0_12, %c0_13] : memref<256x128xbf16, #tpu.memory_space<vmem>>, vector<256x128xbf16>
    %cst_14 = arith.constant dense<0.000000e+00> : vector<16x128xf32>
    %18 = tpu.matmul %16, %17, %cst_14 {dimension_numbers = #tpu.dot_dimension_numbers<[1], [0], [0], [1], [0, 0, 1, 1], [], []>} : vector<16x256xbf16>, vector<256x128xbf16>, vector<16x128xf32> -> vector<16x128xf32>
    %c0_15 = arith.constant 0 : index
    %c0_16 = arith.constant 0 : index
    %19 = vector.load %arg7[%c0_15, %c0_16] : memref<1x128xf32, #tpu.memory_space<vmem>>, vector<1x128xf32>
    %20 = vector.broadcast %19 : vector<1x128xf32> to vector<16x128xf32>
    %21 = arith.addf %18, %20 : vector<16x128xf32>
    %cst_17 = arith.constant 0.000000e+00 : f32
    %22 = vector.broadcast %cst_17 : f32 to vector<16x128xf32>
    %23 = arith.maximumf %21, %22 : vector<16x128xf32>
    %24 = arith.truncf %23 : vector<16x128xf32> to vector<16x128xbf16>
    %c0_18 = arith.constant 0 : index
    %c0_19 = arith.constant 0 : index
    %25 = vector.load %arg8[%c0_18, %c0_19] : memref<128x128xbf16, #tpu.memory_space<vmem>>, vector<128x128xbf16>
    %cst_20 = arith.constant dense<0.000000e+00> : vector<16x128xf32>
    %26 = tpu.matmul %24, %25, %cst_20 {dimension_numbers = #tpu.dot_dimension_numbers<[1], [0], [0], [1], [0, 0, 1, 1], [], []>} : vector<16x128xbf16>, vector<128x128xbf16>, vector<16x128xf32> -> vector<16x128xf32>
    %c0_21 = arith.constant 0 : index
    %c0_22 = arith.constant 0 : index
    %27 = vector.load %arg9[%c0_21, %c0_22] : memref<1x128xf32, #tpu.memory_space<vmem>>, vector<1x128xf32>
    %28 = vector.broadcast %27 : vector<1x128xf32> to vector<16x128xf32>
    %29 = arith.addf %26, %28 : vector<16x128xf32>
    %30 = arith.truncf %29 : vector<16x128xf32> to vector<16x128xbf16>
    %c0_23 = arith.constant 0 : index
    %c0_24 = arith.constant 0 : index
    %31 = vector.load %arg10[%c0_23, %c0_24] : memref<16x128xbf16, #tpu.memory_space<vmem>>, vector<16x128xbf16>
    tpu.vector_store %arg10[%c0_23, %c0_24], %30 {strides = array<i32>} : memref<16x128xbf16, #tpu.memory_space<vmem>>, vector<16x128xbf16>,
    return
  }
  func.func @transform_0(%arg0: i32) -> (i32, i32) {
    %c0_i32 = arith.constant 0 : i32
    %c0_i32_0 = arith.constant 0 : i32
    return %arg0, %c0_i32 : i32, i32
  }
  func.func @transform_1(%arg0: i32) -> (i32, i32) {
    %c0_i32 = arith.constant 0 : i32
    %c0_i32_0 = arith.constant 0 : i32
    %c0_i32_1 = arith.constant 0 : i32
    return %c0_i32, %c0_i32_0 : i32, i32
  }
  func.func @transform_2(%arg0: i32) -> (i32, i32) {
    %c0_i32 = arith.constant 0 : i32
    %c0_i32_0 = arith.constant 0 : i32
    %c0_i32_1 = arith.constant 0 : i32
    return %c0_i32, %c0_i32_0 : i32, i32
  }
  func.func @transform_3(%arg0: i32) -> (i32, i32) {
    %c0_i32 = arith.constant 0 : i32
    %c0_i32_0 = arith.constant 0 : i32
    %c0_i32_1 = arith.constant 0 : i32
    return %c0_i32, %c0_i32_0 : i32, i32
  }
  func.func @transform_4(%arg0: i32) -> (i32, i32) {
    %c0_i32 = arith.constant 0 : i32
    %c0_i32_0 = arith.constant 0 : i32
    %c0_i32_1 = arith.constant 0 : i32
    return %c0_i32, %c0_i32_0 : i32, i32
  }
  func.func @transform_5(%arg0: i32) -> (i32, i32) {
    %c0_i32 = arith.constant 0 : i32
    %c0_i32_0 = arith.constant 0 : i32
    %c0_i32_1 = arith.constant 0 : i32
    return %c0_i32, %c0_i32_0 : i32, i32
  }
  func.func @transform_6(%arg0: i32) -> (i32, i32) {
    %c0_i32 = arith.constant 0 : i32
    %c0_i32_0 = arith.constant 0 : i32
    %c0_i32_1 = arith.constant 0 : i32
    return %c0_i32, %c0_i32_0 : i32, i32
  }
  func.func @transform_7(%arg0: i32) -> (i32, i32) {
    %c0_i32 = arith.constant 0 : i32
    %c0_i32_0 = arith.constant 0 : i32
    %c0_i32_1 = arith.constant 0 : i32
    return %c0_i32, %c0_i32_0 : i32, i32
  }
  func.func @transform_8(%arg0: i32) -> (i32, i32) {
    %c0_i32 = arith.constant 0 : i32
    %c0_i32_0 = arith.constant 0 : i32
    %c0_i32_1 = arith.constant 0 : i32
    return %c0_i32, %c0_i32_0 : i32, i32
  }
  func.func @transform_9(%arg0: i32) -> (i32, i32) {
    %c0_i32 = arith.constant 0 : i32
    %c0_i32_0 = arith.constant 0 : i32
    return %arg0, %c0_i32 : i32, i32
  }
}

</mosaic_0001>

<bundles_post_ra>
// kernel: tpu_custom_call.1
= control target key start
LH: loop header
LB: loop body
LE: loop exit
PB: predicated region body
PF: predicated region fallthrough
CT: control target
= control target key end

     0   :  { %14 = vsyncpa [#allocation3], 0  ;;  %s6799_s0 = inlined_call_operand.hbm [shape: bf16[16,1024], index: 0, kind: input, shape index: {}]   ;;  %s6800_s1 = inlined_call_operand.hbm [shape: bf16[1024,1024], index: 1, kind: input, shape index: {}]   ;;  %s6801_s2 = inlined_call_operand.hbm [shape: f32[1,1024], index: 2, kind: input, shape index: {}]   ;;  %s6802_s3 = inlined_call_operand.hbm [shape: bf16[1024,256], index: 3, kind: input, shape index: {}]   ;;  %s6803_s4 = inlined_call_operand.hbm [shape: f32[1,256], index: 4, kind: input, shape index: {}]   ;;  %s6804_s5 = inlined_call_operand.hbm [shape: bf16[256,128], index: 5, kind: input, shape index: {}]   ;;  %s6805_s6 = inlined_call_operand.hbm [shape: f32[1,128], index: 6, kind: input, shape index: {}]   ;;  %s6806_s7 = inlined_call_operand.hbm [shape: bf16[128,128], index: 7, kind: input, shape index: {}]   ;;  %s6807_s8 = inlined_call_operand.hbm [shape: f32[1,128], index: 8, kind: input, shape index: {}]   ;;  %s6808_s9 = inlined_call_operand.hbm [shape: bf16[16,128], index: 9, kind: output, shape index: {}]  }
   0x1   :  { %15 = vsyncpa [#allocation6], 0 }
   0x2   :  { %16 = vsyncpa [#allocation9], 0 }
   0x3   :  { %17 = vsyncpa [#allocation12], 0 }
   0x4   :  { %18 = vsyncpa [#allocation15], 0 }
   0x5   :  { %19 = vsyncpa [#allocation4], 0  ;;  %s6483_s30 = smov [#allocation5]   ;;  %s6484_s11 = smov [#allocation8]  }
   0x6   :  { %s37_s10 = sshll.u32 %s6483_s30, 4  ;;  %s59_s12 = sshll.u32 %s6484_s11, 4  ;;  %s38_s10 = int_to_ptr.vmem [resolvable:$true] %s37_s10  ;;  %s60_s12 = int_to_ptr.vmem [resolvable:$true] %s59_s12 }
   0x7   :  { %s6279_s13 = scalar_lea.vmem %s38_s10, 65536  ;;  %p6284_p1 = scmp.lt.s32.totalorder %s38_s10, %s38_s10 }
   0x8   :  { %p6280_p0 = scmp.ne.s32.totalorder %s38_s10, %s6279_s13  ;;  %p6285_p2 = scmp.lt.s32.totalorder %s6279_s13, %s6279_s13 }
   0xa   :  { %p6286_p3 = por %p6285_p2, %p6284_p1 }
   0xc   :  { %p6287_p4 = pnand %p6286_p3, %p6280_p0 }
   0xe   :  { %6290 = shalt.err (!%p6287_p4)
}
   0xf   :  { %s6485_s14 = smov 512   ;;  %s6486_s15 = smov 32  }
  0x10   :  { %43 = dma.hbm_to_vmem [thread:$0]  %s6800_s1, 65536, %s38_s10, [#allocation6], %s6485_s14, %s6485_s14, %s6486_s15  }
  0x11   :  { %s6299_s18 = scalar_lea.vmem %s60_s12, 16384  ;;  %p6304_p6 = scmp.lt.s32.totalorder %s60_s12, %s60_s12 }
  0x12   :  { %p6300_p5 = scmp.ne.s32.totalorder %s60_s12, %s6299_s18  ;;  %p6305_p7 = scmp.lt.s32.totalorder %s6299_s18, %s6299_s18 }
  0x14   :  { %p6306_p8 = por %p6305_p7, %p6304_p6 }
  0x16   :  { %p6307_p9 = pnand %p6306_p8, %p6300_p5 }
  0x18   :  { %6310 = shalt.err (!%p6307_p9)
}
  0x19   :  { %s6487_s19 = smov 128   ;;  %s6488_s20 = smov 8  }
  0x1a   :  { %65 = dma.hbm_to_vmem [thread:$0]  %s6802_s3, 16384, %s60_s12, [#allocation9], %s6487_s19, %s6487_s19, %s6488_s20  }
  0x1b   :  { %s6489_s23 = smov [#allocation11]  }
  0x1c   :  { %s81_s24 = sshll.u32 %s6489_s23, 4  ;;  %s82_s24 = int_to_ptr.vmem [resolvable:$true] %s81_s24 }
  0x1d   :  { %s6319_s25 = scalar_lea.vmem %s82_s24, 2048  ;;  %p6324_p11 = scmp.lt.s32.totalorder %s82_s24, %s82_s24 }
  0x1e   :  { %p6320_p10 = scmp.ne.s32.totalorder %s82_s24, %s6319_s25  ;;  %p6325_p12 = scmp.lt.s32.totalorder %s6319_s25, %s6319_s25 }
  0x20   :  { %p6326_p13 = por %p6325_p12, %p6324_p11 }
  0x22   :  { %p6327_p0 = pnand %p6326_p13, %p6320_p10 }
  0x24   :  { %6330 = shalt.err (!%p6327_p0)
}
  0x25   :  { %s6490_s1 = smov 64   ;;  %s6491_s26 = smov 4  }
  0x26   :  { %87 = dma.hbm_to_vmem [thread:$0]  %s6804_s5, 2048, %s82_s24, [#allocation12], %s6490_s1, %s6490_s1, %s6491_s26  }
  0x27   :  { %s6492_s3 = smov [#allocation14]   ;;  %s6493_s30 = smov [#allocation2]  }
  0x28   :  { %s103_s29 = sshll.u32 %s6492_s3, 4  ;;  %s25_s10 = sshll.u32 %s6493_s30, 4  ;;  %s104_s29 = int_to_ptr.vmem [resolvable:$true] %s103_s29  ;;  %s26_s10 = int_to_ptr.vmem [resolvable:$true] %s25_s10 }
  0x29   :  { %s6339_s11 = scalar_lea.vmem %s104_s29, 1024  ;;  %p6344_p2 = scmp.lt.s32.totalorder %s104_s29, %s104_s29 }
  0x2a   :  { %p6340_p1 = scmp.ne.s32.totalorder %s104_s29, %s6339_s11  ;;  %p6345_p3 = scmp.lt.s32.totalorder %s6339_s11, %s6339_s11 }
  0x2c   :  { %p6346_p4 = por %p6345_p3, %p6344_p2 }
  0x2e   :  { %p6347_p5 = pnand %p6346_p4, %p6340_p1 }
  0x30   :  { %6350 = shalt.err (!%p6347_p5)
}
  0x31   :  { %109 = dma.hbm_to_vmem [thread:$0]  %s6806_s7, 1024, %s104_s29, [#allocation15], %s6490_s1, %s6490_s1, %s6491_s26  }
  0x32   :  { %s6359_s5 = scalar_lea.vmem %s26_s10, 1024  ;;  %p6364_p7 = scmp.lt.s32.totalorder %s26_s10, %s26_s10 }
  0x33   :  { %p6360_p6 = scmp.ne.s32.totalorder %s26_s10, %s6359_s5  ;;  %p6365_p8 = scmp.lt.s32.totalorder %s6359_s5, %s6359_s5 }
  0x35   :  { %p6366_p9 = por %p6365_p8, %p6364_p7 }
  0x37   :  { %p6367_p10 = pnand %p6366_p9, %p6360_p6 }
  0x39   :  { %6370 = shalt.err (!%p6367_p10)
}
  0x3a   :  { %31 = dma.hbm_to_vmem [thread:$0]  %s6799_s0, 1024, %s26_s10, [#allocation3], %s6485_s14, %s6485_s14, %s6486_s15  }
  0x3b   :  { %s6494_s18 = smov [#allocation7]   ;;  %s6495_s20 = smov [#allocation10]  }
  0x3c   :  { %s50_s19 = sshll.u32 %s6494_s18, 4  ;;  %s72_s7 = sshll.u32 %s6495_s20, 4  ;;  %s51_s19 = int_to_ptr.vmem [resolvable:$true] %s50_s19  ;;  %s73_s7 = int_to_ptr.vmem [resolvable:$true] %s72_s7 }
  0x3d   :  { %s6379_s21 = scalar_lea.vmem %s51_s19, 128  ;;  %p6384_p12 = scmp.lt.s32.totalorder %s51_s19, %s51_s19 }
  0x3e   :  { %p6380_p11 = scmp.ne.s32.totalorder %s51_s19, %s6379_s21  ;;  %p6385_p13 = scmp.lt.s32.totalorder %s6379_s21, %s6379_s21 }
  0x40   :  { %p6386_p0 = por %p6385_p13, %p6384_p12 }
  0x42   :  { %p6387_p1 = pnand %p6386_p0, %p6380_p11 }
  0x44   :  { %6390 = shalt.err (!%p6387_p1)
}
  0x45   :  { %53 = dma.hbm_to_vmem [thread:$0]  %s6801_s2, 128, %s51_s19, [#allocation6]  }
  0x46   :  { %s6399_s24 = scalar_lea.vmem %s73_s7, 32  ;;  %p6404_p3 = scmp.lt.s32.totalorder %s73_s7, %s73_s7 }
  0x47   :  { %p6400_p2 = scmp.ne.s32.totalorder %s73_s7, %s6399_s24  ;;  %p6405_p4 = scmp.lt.s32.totalorder %s6399_s24, %s6399_s24 }
  0x49   :  { %p6406_p5 = por %p6405_p4, %p6404_p3 }
  0x4b   :  { %p6407_p6 = pnand %p6406_p5, %p6400_p2 }
  0x4d   :  { %6410 = shalt.err (!%p6407_p6)
}
  0x4e   :  { %75 = dma.hbm_to_vmem [thread:$0]  %s6803_s4, 32, %s73_s7, [#allocation9]  }
  0x4f   :  { %s6496_s15 = smov [#allocation13]   ;;  %s6497_s27 = smov [#allocation16]  }
  0x50   :  { %s94_s25 = sshll.u32 %s6496_s15, 4  ;;  %s116_s28 = sshll.u32 %s6497_s27, 4  ;;  %s95_s25 = int_to_ptr.vmem [resolvable:$true] %s94_s25  ;;  %s117_s28 = int_to_ptr.vmem [resolvable:$true] %s116_s28 }
  0x51   :  { %s6419_s3 = scalar_lea.vmem %s95_s25, 16  ;;  %s6423_s2 = scalar_lea.vmem %s95_s25, 32 }
  0x52   :  { %p6420_p7 = scmp.ne.s32.totalorder %s95_s25, %s6419_s3  ;;  %p6424_p8 = scmp.lt.s32.totalorder %s95_s25, %s95_s25 }
  0x53   :  { %p6425_p9 = scmp.lt.s32.totalorder %s6423_s2, %s6419_s3 }
  0x55   :  { %p6426_p10 = por %p6425_p9, %p6424_p8 }
  0x57   :  { %p6427_p11 = pnand %p6426_p10, %p6420_p7 }
  0x59   :  { %6430 = shalt.err (!%p6427_p11)
}
  0x5a   :  { %97 = dma.hbm_to_vmem [thread:$0]  %s6805_s6, 16, %s95_s25, [#allocation12]  }
  0x5b   :  { %s6439_s10 = scalar_lea.vmem %s117_s28, 16  ;;  %s6443_s4 = scalar_lea.vmem %s117_s28, 32 }
  0x5c   :  { %p6440_p12 = scmp.ne.s32.totalorder %s117_s28, %s6439_s10  ;;  %p6444_p13 = scmp.lt.s32.totalorder %s117_s28, %s117_s28 }
  0x5d   :  { %p6445_p0 = scmp.lt.s32.totalorder %s6443_s4, %s6439_s10 }
  0x5f   :  { %p6446_p1 = por %p6445_p0, %p6444_p13 }
  0x61   :  { %p6447_p2 = pnand %p6446_p1, %p6440_p12 }
  0x63   :  { %6450 = shalt.err (!%p6447_p2)
}
  0x64   :  { %119 = dma.hbm_to_vmem [thread:$0]  %s6807_s8, 16, %s117_s28, [#allocation15]  }
  0x65   :  { %6471 = dma.done.wait [#allocation3], 1024  }
  0x66   :  { %6472 = vsyncadd [#allocation3], 4294966272 }
  0x67   :  { %6473 = dma.done.wait [#allocation6], 65664  }
  0x68   :  { %6474 = vsyncadd [#allocation6], 4294901632 }
  0x69   :  { %6475 = dma.done.wait [#allocation9], 16416  }
  0x6a   :  { %6476 = vsyncadd [#allocation9], 4294950880 }
  0x6b   :  { %6477 = dma.done.wait [#allocation12], 2064  }
  0x6c   :  { %6478 = vsyncadd [#allocation12], 4294965232 }
  0x6d   :  { %6479 = dma.done.wait [#allocation15], 1040  }
  0x6e   :  { %6480 = vsyncadd [#allocation15], 4294966256  ;;  %v212_v0 = vld [vmem:[#allocation5 + $0x1c0] sm:$0xff]  ;;  %v6598_v59 = vld [vmem:[#allocation2 + $0x8] sm:$0xff]  ;;  %vm6499_vm0 = vmmov 0   ;;  %s6500_s6 = smov [#allocation17]  }
  0x6f   :  { %v216_v1 = vld [vmem:[#allocation5 + $0x1e0] sm:$0xff]  ;;  %v6600_v60 = vld [vmem:[#allocation2 + $0x28] sm:$0xff]  ;;  %s5286_s8 = sshll.u32 %s6500_s6, 4  ;;  %s5287_s8 = int_to_ptr.vmem [resolvable:$true] %s5286_s8 }
  0x70   :  { %v340_v2 = vld [vmem:[#allocation5 + $0x5c0] sm:$0xff]  ;;  %v5367_v3 = vcombine.high %v212_v0, %v216_v1  ;;  %v5366_v5 = vcombine.low %v212_v0, %v216_v1  ;;  %v6604_v63 = vcombine.high %v6598_v59, %v6600_v60  ;;  %s6451_s13 = scalar_lea.vmem %s5287_s8, 128  ;;  %p6456_p4 = scmp.lt.s32.totalorder %s5287_s8, %s5287_s8 }
  0x71   :  { %v344_v4 = vld [vmem:[#allocation5 + $0x5e0] sm:$0xff]  ;;  %p6452_p3 = scmp.ne.s32.totalorder %s5287_s8, %s6451_s13  ;;  %p6457_p5 = scmp.lt.s32.totalorder %s6451_s13, %s6451_s13 }
  0x72   :  { %v204_v6 = vld [vmem:[#allocation5 + $0x180] sm:$0xff]  ;;  %v5495_v8 = vcombine.high %v340_v2, %v344_v4  ;;  %v5494_v9 = vcombine.low %v340_v2, %v344_v4  ;;  %3310 = vmatprep.subr.bf16.mxu0 %v5367_v3  ;;  %3385 = vmatprep.mubr.bf16.mxu1 %v6604_v63 }
  0x73   :  { %v208_v7 = vld [vmem:[#allocation5 + $0x1a0] sm:$0xff]  ;;  %3311 = vmatpush1.bf16.msra.mxu0 %v5366_v5  ;;  %p6458_p6 = por %p6457_p5, %p6456_p4 }
  0x74   :  { %v5359_v10 = vcombine.high %v204_v6, %v208_v7  ;;  %v332_v11 = vld [vmem:[#allocation5 + $0x580] sm:$0xff]  ;;  %3353 = vmatprep.subr.bf16.mxu1 %v5495_v8  ;;  %v5358_v18 = vcombine.low %v204_v6, %v208_v7 }
  0x75   :  { %v336_v12 = vld [vmem:[#allocation5 + $0x5a0] sm:$0xff]  ;;  %3354 = vmatpush1.bf16.msra.mxu1 %v5494_v9  ;;  %p6459_p7 = pnand %p6458_p6, %p6452_p3 }
  0x76   :  { %v196_v13 = vld [vmem:[#allocation5 + $0x140] sm:$0xff]  ;;  %v5487_v14 = vcombine.high %v332_v11, %v336_v12  ;;  %3312 = vmatprep.subr.bf16.mxu0 %v5359_v10  ;;  %v5486_v19 = vcombine.low %v332_v11, %v336_v12 }
  0x77   :  { %v200_v15 = vld [vmem:[#allocation5 + $0x160] sm:$0xff]  ;;  %3313 = vmatpush1.bf16.msra.mxu0 %v5358_v18 }
  0x78   :  { %v324_v16 = vld [vmem:[#allocation5 + $0x540] sm:$0xff]  ;;  %v5351_v20 = vcombine.high %v196_v13, %v200_v15  ;;  %3355 = vmatprep.subr.bf16.mxu1 %v5487_v14  ;;  %v5350_v26 = vcombine.low %v196_v13, %v200_v15 }
  0x79   :  { %v328_v17 = vld [vmem:[#allocation5 + $0x560] sm:$0xff]  ;;  %3356 = vmatpush1.bf16.msra.mxu1 %v5486_v19 }
  0x7a   :  { %v5479_v21 = vcombine.high %v324_v16, %v328_v17  ;;  %v188_v22 = vld [vmem:[#allocation5 + $0x100] sm:$0xff]  ;;  %3314 = vmatprep.subr.bf16.mxu0 %v5351_v20  ;;  %v5478_v27 = vcombine.low %v324_v16, %v328_v17 }
  0x7b   :  { %v192_v23 = vld [vmem:[#allocation5 + $0x120] sm:$0xff]  ;;  %3315 = vmatpush1.bf16.msra.mxu0 %v5350_v26 }
  0x7c   :  { %v316_v24 = vld [vmem:[#allocation5 + $0x500] sm:$0xff]  ;;  %v5343_v28 = vcombine.high %v188_v22, %v192_v23  ;;  %3357 = vmatprep.subr.bf16.mxu1 %v5479_v21  ;;  %v5342_v34 = vcombine.low %v188_v22, %v192_v23 }
  0x7d   :  { %v320_v25 = vld [vmem:[#allocation5 + $0x520] sm:$0xff]  ;;  %3358 = vmatpush1.bf16.msra.mxu1 %v5478_v27 }
  0x7e   :  { %v5471_v29 = vcombine.high %v316_v24, %v320_v25  ;;  %v180_v30 = vld [vmem:[#allocation5 + $0xc0] sm:$0xff]  ;;  %3316 = vmatprep.subr.bf16.mxu0 %v5343_v28  ;;  %v5470_v35 = vcombine.low %v316_v24, %v320_v25 }
  0x7f   :  { %v184_v31 = vld [vmem:[#allocation5 + $0xe0] sm:$0xff]  ;;  %3317 = vmatpush1.bf16.msra.mxu0 %v5342_v34 }
  0x80   :  { %v308_v32 = vld [vmem:[#allocation5 + $0x4c0] sm:$0xff]  ;;  %v5335_v36 = vcombine.high %v180_v30, %v184_v31  ;;  %3359 = vmatprep.subr.bf16.mxu1 %v5471_v29  ;;  %v5334_v42 = vcombine.low %v180_v30, %v184_v31 }
  0x81   :  { %v312_v33 = vld [vmem:[#allocation5 + $0x4e0] sm:$0xff]  ;;  %3360 = vmatpush1.bf16.msra.mxu1 %v5470_v35 }
  0x82   :  { %v5463_v37 = vcombine.high %v308_v32, %v312_v33  ;;  %v172_v38 = vld [vmem:[#allocation5 + $0x80] sm:$0xff]  ;;  %3318 = vmatprep.subr.bf16.mxu0 %v5335_v36  ;;  %v5462_v43 = vcombine.low %v308_v32, %v312_v33 }
  0x83   :  { %v176_v39 = vld [vmem:[#allocation5 + $0xa0] sm:$0xff]  ;;  %3319 = vmatpush1.bf16.msra.mxu0 %v5334_v42 }
  0x84   :  { %v300_v40 = vld [vmem:[#allocation5 + $0x480] sm:$0xff]  ;;  %v5327_v44 = vcombine.high %v172_v38, %v176_v39  ;;  %3361 = vmatprep.subr.bf16.mxu1 %v5463_v37  ;;  %v5326_v50 = vcombine.low %v172_v38, %v176_v39 }
  0x85   :  { %v304_v41 = vld [vmem:[#allocation5 + $0x4a0] sm:$0xff]  ;;  %3362 = vmatpush1.bf16.msra.mxu1 %v5462_v43 }
  0x86   :  { %v5455_v45 = vcombine.high %v300_v40, %v304_v41  ;;  %v164_v46 = vld [vmem:[#allocation5 + $0x40] sm:$0xff]  ;;  %3320 = vmatprep.subr.bf16.mxu0 %v5327_v44  ;;  %v5454_v51 = vcombine.low %v300_v40, %v304_v41 }
  0x87   :  { %v168_v47 = vld [vmem:[#allocation5 + $0x60] sm:$0xff]  ;;  %3321 = vmatpush1.bf16.msra.mxu0 %v5326_v50 }
  0x88   :  { %v292_v48 = vld [vmem:[#allocation5 + $0x440] sm:$0xff]  ;;  %v5319_v52 = vcombine.high %v164_v46, %v168_v47  ;;  %3363 = vmatprep.subr.bf16.mxu1 %v5455_v45  ;;  %v5318_v0 = vcombine.low %v164_v46, %v168_v47 }
  0x89   :  { %v296_v49 = vld [vmem:[#allocation5 + $0x460] sm:$0xff]  ;;  %3364 = vmatpush1.bf16.msra.mxu1 %v5454_v51 }
  0x8a   :  { %v156_v53 = vld [vmem:[#allocation5] sm:$0xff]  ;;  %v5447_v56 = vcombine.high %v292_v48, %v296_v49  ;;  %3322 = vmatprep.subr.bf16.mxu0 %v5319_v52  ;;  %v5446_v1 = vcombine.low %v292_v48, %v296_v49 }
  0x8b   :  { %v6590_v54 = vld [vmem:[#allocation2] sm:$0xff]  ;;  %3323 = vmatpush1.bf16.msra.mxu0 %v5318_v0 }
  0x8c   :  { %v6592_v55 = vld [vmem:[#allocation2 + $0x20] sm:$0xff]  ;;  %3365 = vmatprep.subr.bf16.mxu1 %v5447_v56 }
  0x8d   :  { %v160_v57 = vld [vmem:[#allocation5 + $0x20] sm:$0xff]  ;;  %v6596_v58 = vcombine.high %v6590_v54, %v6592_v55  ;;  %3366 = vmatpush1.bf16.msra.mxu1 %v5446_v1 }
  0x8e   :  { %v284_v61 = vld [vmem:[#allocation5 + $0x400] sm:$0xff]  ;;  %v5311_v2 = vcombine.high %v156_v53, %v160_v57  ;;  %v5310_v8 = vcombine.low %v156_v53, %v160_v57 }
  0x8f   :  { %v288_v62 = vld [vmem:[#allocation5 + $0x420] sm:$0xff]  ;;  %3342 = vmatprep.mubr.bf16.mxu0 %v6596_v58 }
  0x90   :  { %v5439_v3 = vcombine.high %v284_v61, %v288_v62  ;;  %v276_v4 = vld [vmem:[#allocation5 + $0x3c0] sm:$0xff]  ;;  %3324 = vmatprep.subr.bf16.mxu0 %v5311_v2  ;;  %v5438_v9 = vcombine.low %v284_v61, %v288_v62 }
  0x91   :  { %v280_v5 = vld [vmem:[#allocation5 + $0x3e0] sm:$0xff]  ;;  %3325 = vmatpush1.bf16.msra.mxu0 %v5310_v8 }
  0x92   :  { %v404_v6 = vld [vmem:[#allocation5 + $0x7c0] sm:$0xff]  ;;  %v5431_v10 = vcombine.high %v276_v4, %v280_v5  ;;  %3367 = vmatprep.subr.bf16.mxu1 %v5439_v3  ;;  %v5430_v16 = vcombine.low %v276_v4, %v280_v5 }
  0x93   :  { %v408_v7 = vld [vmem:[#allocation5 + $0x7e0] sm:$0xff]  ;;  %3368 = vmatpush1.bf16.msra.mxu1 %v5438_v9 }
  0x94   :  { %v5559_v11 = vcombine.high %v404_v6, %v408_v7  ;;  %v268_v12 = vld [vmem:[#allocation5 + $0x380] sm:$0xff]  ;;  %3326 = vmatprep.subr.bf16.mxu0 %v5431_v10  ;;  %v5558_v17 = vcombine.low %v404_v6, %v408_v7 }
  0x95   :  { %v272_v13 = vld [vmem:[#allocation5 + $0x3a0] sm:$0xff]  ;;  %3327 = vmatpush2.bf16.msra.mxu0 %v5430_v16 }
  0x96   :  { %v396_v14 = vld [vmem:[#allocation5 + $0x780] sm:$0xff]  ;;  %v5423_v18 = vcombine.high %v268_v12, %v272_v13  ;;  %3369 = vmatprep.subr.bf16.mxu1 %v5559_v11  ;;  %v5422_v24 = vcombine.low %v268_v12, %v272_v13 }
  0x97   :  { %v400_v15 = vld [vmem:[#allocation5 + $0x7a0] sm:$0xff]  ;;  %3370 = vmatpush2.bf16.msra.mxu1 %v5558_v17 }
  0x98   :  { %v5551_v19 = vcombine.high %v396_v14, %v400_v15  ;;  %v260_v20 = vld [vmem:[#allocation5 + $0x340] sm:$0xff]  ;;  %3328 = vmatprep.subr.bf16.mxu0 %v5423_v18  ;;  %v5550_v25 = vcombine.low %v396_v14, %v400_v15 }
  0x99   :  { %v264_v21 = vld [vmem:[#allocation5 + $0x360] sm:$0xff]  ;;  %3329 = vmatpush2.bf16.msra.mxu0 %v5422_v24  ;;  %v6614_v24 = vld [vmem:[#allocation2 + $0x30] sm:$0xff] }
  0x9a   :  { %v388_v22 = vld [vmem:[#allocation5 + $0x740] sm:$0xff]  ;;  %v5415_v26 = vcombine.high %v260_v20, %v264_v21  ;;  %3371 = vmatprep.subr.bf16.mxu1 %v5551_v19  ;;  %v5414_v32 = vcombine.low %v260_v20, %v264_v21  ;;  %v6610_v21 = vcombine.low %v6590_v54, %v6592_v55 }
  0x9b   :  { %v392_v23 = vld [vmem:[#allocation5 + $0x760] sm:$0xff]  ;;  %3372 = vmatpush2.bf16.msra.mxu1 %v5550_v25  ;;  %v6618_v25 = vcombine.low %v6598_v59, %v6600_v60 }
  0x9c   :  { %v5543_v27 = vcombine.high %v388_v22, %v392_v23  ;;  %v252_v28 = vld [vmem:[#allocation5 + $0x300] sm:$0xff]  ;;  %3330 = vmatprep.subr.bf16.mxu0 %v5415_v26  ;;  %v5542_v33 = vcombine.low %v388_v22, %v392_v23  ;;  %v6612_v23 = vld [vmem:[#allocation2 + $0x10] sm:$0xff] }
  0x9d   :  { %v256_v29 = vld [vmem:[#allocation5 + $0x320] sm:$0xff]  ;;  %3331 = vmatpush2.bf16.msra.mxu0 %v5414_v32  ;;  %v6626_v32 = vcombine.high %v6612_v23, %v6614_v24 }
  0x9e   :  { %v380_v30 = vld [vmem:[#allocation5 + $0x700] sm:$0xff]  ;;  %v5407_v34 = vcombine.high %v252_v28, %v256_v29  ;;  %3373 = vmatprep.subr.bf16.mxu1 %v5543_v27  ;;  %v5406_v40 = vcombine.low %v252_v28, %v256_v29  ;;  %v6620_v27 = vld [vmem:[#allocation2 + $0x18] sm:$0xff] }
  0x9f   :  { %v384_v31 = vld [vmem:[#allocation5 + $0x720] sm:$0xff]  ;;  %3374 = vmatpush2.bf16.msra.mxu1 %v5542_v33  ;;  %v6622_v28 = vld [vmem:[#allocation2 + $0x38] sm:$0xff] }
  0xa0   :  { %v5535_v35 = vcombine.high %v380_v30, %v384_v31  ;;  %v244_v36 = vld [vmem:[#allocation5 + $0x2c0] sm:$0xff]  ;;  %3332 = vmatprep.subr.bf16.mxu0 %v5407_v34  ;;  %v5534_v41 = vcombine.low %v380_v30, %v384_v31  ;;  %v6631_v33 = vcombine.high %v6620_v27, %v6622_v28 }
  0xa1   :  { %v248_v37 = vld [vmem:[#allocation5 + $0x2e0] sm:$0xff]  ;;  %3333 = vmatpush2.bf16.msra.mxu0 %v5406_v40 }
  0xa2   :  { %v372_v38 = vld [vmem:[#allocation5 + $0x6c0] sm:$0xff]  ;;  %v5399_v42 = vcombine.high %v244_v36, %v248_v37  ;;  %3375 = vmatprep.subr.bf16.mxu1 %v5535_v35  ;;  %v5398_v48 = vcombine.low %v244_v36, %v248_v37 }
  0xa3   :  { %v376_v39 = vld [vmem:[#allocation5 + $0x6e0] sm:$0xff]  ;;  %3376 = vmatpush2.bf16.msra.mxu1 %v5534_v41 }
  0xa4   :  { %v5527_v43 = vcombine.high %v372_v38, %v376_v39  ;;  %v236_v44 = vld [vmem:[#allocation5 + $0x280] sm:$0xff]  ;;  %3334 = vmatprep.subr.bf16.mxu0 %v5399_v42  ;;  %v5526_v49 = vcombine.low %v372_v38, %v376_v39 }
  0xa5   :  { %v240_v45 = vld [vmem:[#allocation5 + $0x2a0] sm:$0xff]  ;;  %3335 = vmatpush2.bf16.msra.mxu0 %v5398_v48 }
  0xa6   :  { %v364_v46 = vld [vmem:[#allocation5 + $0x680] sm:$0xff]  ;;  %v5391_v50 = vcombine.high %v236_v44, %v240_v45  ;;  %3377 = vmatprep.subr.bf16.mxu1 %v5527_v43  ;;  %v5390_v61 = vcombine.low %v236_v44, %v240_v45 }
  0xa7   :  { %v368_v47 = vld [vmem:[#allocation5 + $0x6a0] sm:$0xff]  ;;  %3378 = vmatpush2.bf16.msra.mxu1 %v5526_v49 }
  0xa8   :  { %v5519_v51 = vcombine.high %v364_v46, %v368_v47  ;;  %v228_v52 = vld [vmem:[#allocation5 + $0x240] sm:$0xff]  ;;  %3336 = vmatprep.subr.bf16.mxu0 %v5391_v50  ;;  %v5518_v62 = vcombine.low %v364_v46, %v368_v47 }
  0xa9   :  { %v232_v53 = vld [vmem:[#allocation5 + $0x260] sm:$0xff]  ;;  %3337 = vmatpush2.bf16.msra.mxu0 %v5390_v61 }
  0xaa   :  { %v356_v56 = vld [vmem:[#allocation5 + $0x640] sm:$0xff]  ;;  %v5383_v0 = vcombine.high %v228_v52, %v232_v53  ;;  %3379 = vmatprep.subr.bf16.mxu1 %v5519_v51  ;;  %v5382_v6 = vcombine.low %v228_v52, %v232_v53 }
  0xab   :  { %v360_v57 = vld [vmem:[#allocation5 + $0x660] sm:$0xff]  ;;  %3380 = vmatpush2.bf16.msra.mxu1 %v5518_v62 }
  0xac   :  { %v5511_v1 = vcombine.high %v356_v56, %v360_v57  ;;  %v220_v2 = vld [vmem:[#allocation5 + $0x200] sm:$0xff]  ;;  %3338 = vmatprep.subr.bf16.mxu0 %v5383_v0  ;;  %v5510_v7 = vcombine.low %v356_v56, %v360_v57 }
  0xad   :  { %v224_v3 = vld [vmem:[#allocation5 + $0x220] sm:$0xff]  ;;  %3339 = vmatpush2.bf16.msra.mxu0 %v5382_v6 }
  0xae   :  { %v348_v4 = vld [vmem:[#allocation5 + $0x600] sm:$0xff]  ;;  %v5375_v8 = vcombine.high %v220_v2, %v224_v3  ;;  %3381 = vmatprep.subr.bf16.mxu1 %v5511_v1  ;;  %v5374_v14 = vcombine.low %v220_v2, %v224_v3 }
  0xaf   :  { %v352_v5 = vld [vmem:[#allocation5 + $0x620] sm:$0xff]  ;;  %3382 = vmatpush2.bf16.msra.mxu1 %v5510_v7 }
  0xb0   :  { %v5503_v9 = vcombine.high %v348_v4, %v352_v5  ;;  %v468_v10 = vld [vmem:[#allocation5 + $0x9c0] sm:$0xff]  ;;  %3340 = vmatprep.subr.bf16.mxu0 %v5375_v8  ;;  %v5502_v15 = vcombine.low %v348_v4, %v352_v5 }
  0xb1   :  { %v472_v11 = vld [vmem:[#allocation5 + $0x9e0] sm:$0xff]  ;;  %3341 = vmatpush2.bf16.msra.mxu0 %v5374_v14 }
  0xb2   :  { %v596_v12 = vld [vmem:[#allocation5 + $0xdc0] sm:$0xff]  ;;  %v5623_v16 = vcombine.high %v468_v10, %v472_v11  ;;  %3383 = vmatprep.subr.bf16.mxu1 %v5503_v9  ;;  %v5622_v26 = vcombine.low %v468_v10, %v472_v11 }
  0xb3   :  { %v600_v13 = vld [vmem:[#allocation5 + $0xde0] sm:$0xff]  ;;  %3384 = vmatpush2.bf16.msra.mxu1 %v5502_v15 }
  0xb4   :  { %v5751_v17 = vcombine.high %v596_v12, %v600_v13  ;;  %v460_v18 = vld [vmem:[#allocation5 + $0x980] sm:$0xff]  ;;  %3396 = vmatprep.subr.bf16.mxu0 %v5623_v16  ;;  %v5750_v29 = vcombine.low %v596_v12, %v600_v13  ;;  %3343 = vmatmul.mubr.bf16.vlgmr.msra.gmra.mxu0 %v6610_v21 }
  0xb5   :  { %v464_v19 = vld [vmem:[#allocation5 + $0x9a0] sm:$0xff]  ;;  %3397 = vmatpush1.bf16.msra.mxu0 %v5622_v26  ;;  %3428 = vmatprep.mubr.bf16.mxu0 %v6626_v32 }
  0xb6   :  { %v588_v20 = vld [vmem:[#allocation5 + $0xd80] sm:$0xff]  ;;  %v5615_v54 = vcombine.high %v460_v18, %v464_v19  ;;  %3439 = vmatprep.subr.bf16.mxu1 %v5751_v17  ;;  %3386 = vmatmul.mubr.bf16.vlgmr.msra.gmra.mxu1 %v6618_v25  ;;  %v5614_v34 = vcombine.low %v460_v18, %v464_v19 }
  0xb7   :  { %v592_v22 = vld [vmem:[#allocation5 + $0xda0] sm:$0xff]  ;;  %3440 = vmatpush1.bf16.msra.mxu1 %v5750_v29  ;;  %3471 = vmatprep.mubr.bf16.mxu1 %v6631_v33 }
  0xb8   :  { %v5743_v55 = vcombine.high %v588_v20, %v592_v22  ;;  %v452_v30 = vld [vmem:[#allocation5 + $0x940] sm:$0xff]  ;;  %3398 = vmatprep.subr.bf16.mxu0 %v5615_v54  ;;  %v5742_v35 = vcombine.low %v588_v20, %v592_v22 }
  0xb9   :  { %v456_v31 = vld [vmem:[#allocation5 + $0x960] sm:$0xff]  ;;  %3399 = vmatpush1.bf16.msra.mxu0 %v5614_v34 }
  0xba   :  { %v580_v59 = vld [vmem:[#allocation5 + $0xd40] sm:$0xff]  ;;  %v5607_v36 = vcombine.high %v452_v30, %v456_v31  ;;  %3441 = vmatprep.subr.bf16.mxu1 %v5743_v55  ;;  %v5606_v42 = vcombine.low %v452_v30, %v456_v31 }
  0xbb   :  { %v584_v60 = vld [vmem:[#allocation5 + $0xd60] sm:$0xff]  ;;  %3442 = vmatpush1.bf16.msra.mxu1 %v5742_v35 }
  0xbc   :  { %v444_v37 = vld [vmem:[#allocation5 + $0x900] sm:$0xff]  ;;  %v5735_v40 = vcombine.high %v580_v59, %v584_v60  ;;  %3400 = vmatprep.subr.bf16.mxu0 %v5607_v36  ;;  %v5734_v43 = vcombine.low %v580_v59, %v584_v60 }
  0xbd   :  { %v448_v38 = vld [vmem:[#allocation5 + $0x920] sm:$0xff]  ;;  %3401 = vmatpush1.bf16.msra.mxu0 %v5606_v42 }
  0xbe   :  { %v572_v39 = vld [vmem:[#allocation5 + $0xd00] sm:$0xff]  ;;  %v5599_v44 = vcombine.high %v444_v37, %v448_v38  ;;  %3443 = vmatprep.subr.bf16.mxu1 %v5735_v40  ;;  %v5598_v50 = vcombine.low %v444_v37, %v448_v38 }
  0xbf   :  { %v576_v41 = vld [vmem:[#allocation5 + $0xd20] sm:$0xff]  ;;  %3444 = vmatpush1.bf16.msra.mxu1 %v5734_v43 }
  0xc0   :  { %v436_v45 = vld [vmem:[#allocation5 + $0x8c0] sm:$0xff]  ;;  %v5727_v48 = vcombine.high %v572_v39, %v576_v41  ;;  %3402 = vmatprep.subr.bf16.mxu0 %v5599_v44  ;;  %v5726_v51 = vcombine.low %v572_v39, %v576_v41 }
  0xc1   :  { %v440_v46 = vld [vmem:[#allocation5 + $0x8e0] sm:$0xff]  ;;  %3403 = vmatpush1.bf16.msra.mxu0 %v5598_v50 }
  0xc2   :  { %v564_v47 = vld [vmem:[#allocation5 + $0xcc0] sm:$0xff]  ;;  %v5591_v52 = vcombine.high %v436_v45, %v440_v46  ;;  %3445 = vmatprep.subr.bf16.mxu1 %v5727_v48  ;;  %v5590_v0 = vcombine.low %v436_v45, %v440_v46 }
  0xc3   :  { %v568_v49 = vld [vmem:[#allocation5 + $0xce0] sm:$0xff]  ;;  %3446 = vmatpush1.bf16.msra.mxu1 %v5726_v51 }
  0xc4   :  { %v428_v53 = vld [vmem:[#allocation5 + $0x880] sm:$0xff]  ;;  %v5719_v61 = vcombine.high %v564_v47, %v568_v49  ;;  %3404 = vmatprep.subr.bf16.mxu0 %v5591_v52  ;;  %v5718_v1 = vcombine.low %v564_v47, %v568_v49 }
  0xc5   :  { %v432_v56 = vld [vmem:[#allocation5 + $0x8a0] sm:$0xff]  ;;  %3405 = vmatpush1.bf16.msra.mxu0 %v5590_v0 }
  0xc6   :  { %v556_v57 = vld [vmem:[#allocation5 + $0xc80] sm:$0xff]  ;;  %v5583_v2 = vcombine.high %v428_v53, %v432_v56  ;;  %3447 = vmatprep.subr.bf16.mxu1 %v5719_v61  ;;  %v5582_v8 = vcombine.low %v428_v53, %v432_v56 }
  0xc7   :  { %v560_v62 = vld [vmem:[#allocation5 + $0xca0] sm:$0xff]  ;;  %3448 = vmatpush1.bf16.msra.mxu1 %v5718_v1 }
  0xc8   :  { %v420_v3 = vld [vmem:[#allocation5 + $0x840] sm:$0xff]  ;;  %v5711_v6 = vcombine.high %v556_v57, %v560_v62  ;;  %3406 = vmatprep.subr.bf16.mxu0 %v5583_v2  ;;  %v5710_v9 = vcombine.low %v556_v57, %v560_v62 }
  0xc9   :  { %v424_v4 = vld [vmem:[#allocation5 + $0x860] sm:$0xff]  ;;  %3407 = vmatpush1.bf16.msra.mxu0 %v5582_v8 }
  0xca   :  { %v548_v5 = vld [vmem:[#allocation5 + $0xc40] sm:$0xff]  ;;  %v5575_v10 = vcombine.high %v420_v3, %v424_v4  ;;  %3449 = vmatprep.subr.bf16.mxu1 %v5711_v6  ;;  %v5574_v16 = vcombine.low %v420_v3, %v424_v4 }
  0xcb   :  { %v552_v7 = vld [vmem:[#allocation5 + $0xc60] sm:$0xff]  ;;  %3450 = vmatpush1.bf16.msra.mxu1 %v5710_v9 }
  0xcc   :  { %v412_v11 = vld [vmem:[#allocation5 + $0x800] sm:$0xff]  ;;  %v5703_v14 = vcombine.high %v548_v5, %v552_v7  ;;  %3408 = vmatprep.subr.bf16.mxu0 %v5575_v10  ;;  %v5702_v17 = vcombine.low %v548_v5, %v552_v7 }
  0xcd   :  { %v416_v12 = vld [vmem:[#allocation5 + $0x820] sm:$0xff]  ;;  %3409 = vmatpush1.bf16.msra.mxu0 %v5574_v16 }
  0xce   :  { %v540_v13 = vld [vmem:[#allocation5 + $0xc00] sm:$0xff]  ;;  %v5567_v18 = vcombine.high %v412_v11, %v416_v12  ;;  %3451 = vmatprep.subr.bf16.mxu1 %v5703_v14  ;;  %v5566_v54 = vcombine.low %v412_v11, %v416_v12 }
  0xcf   :  { %v544_v15 = vld [vmem:[#allocation5 + $0xc20] sm:$0xff]  ;;  %3452 = vmatpush1.bf16.msra.mxu1 %v5702_v17 }
  0xd0   :  { %v532_v19 = vld [vmem:[#allocation5 + $0xbc0] sm:$0xff]  ;;  %v5695_v26 = vcombine.high %v540_v13, %v544_v15  ;;  %3410 = vmatprep.subr.bf16.mxu0 %v5567_v18  ;;  %v5694_v55 = vcombine.low %v540_v13, %v544_v15 }
  0xd1   :  { %v536_v20 = vld [vmem:[#allocation5 + $0xbe0] sm:$0xff]  ;;  %3411 = vmatpush1.bf16.msra.mxu0 %v5566_v54 }
  0xd2   :  { %v660_v22 = vld [vmem:[#allocation5 + $0xfc0] sm:$0xff]  ;;  %v5687_v30 = vcombine.high %v532_v19, %v536_v20  ;;  %3453 = vmatprep.subr.bf16.mxu1 %v5695_v26  ;;  %v5686_v36 = vcombine.low %v532_v19, %v536_v20 }
  0xd3   :  { %v664_v29 = vld [vmem:[#allocation5 + $0xfe0] sm:$0xff]  ;;  %3454 = vmatpush1.bf16.msra.mxu1 %v5694_v55 }
  0xd4   :  { %v524_v31 = vld [vmem:[#allocation5 + $0xb80] sm:$0xff]  ;;  %v5815_v34 = vcombine.high %v660_v22, %v664_v29  ;;  %3412 = vmatprep.subr.bf16.mxu0 %v5687_v30  ;;  %v5814_v37 = vcombine.low %v660_v22, %v664_v29 }
  0xd5   :  { %v528_v59 = vld [vmem:[#allocation5 + $0xba0] sm:$0xff]  ;;  %3413 = vmatpush2.bf16.msra.mxu0 %v5686_v36 }
  0xd6   :  { %v652_v60 = vld [vmem:[#allocation5 + $0xf80] sm:$0xff]  ;;  %v5679_v38 = vcombine.high %v524_v31, %v528_v59  ;;  %3455 = vmatprep.subr.bf16.mxu1 %v5815_v34  ;;  %v5678_v44 = vcombine.low %v524_v31, %v528_v59  ;;  %v217_v34 = vld [vmem:[#allocation5 + $0x1e8] sm:$0xff] }
  0xd7   :  { %v656_v35 = vld [vmem:[#allocation5 + $0xfa0] sm:$0xff]  ;;  %3456 = vmatpush2.bf16.msra.mxu1 %v5814_v37  ;;  %v345_v37 = vld [vmem:[#allocation5 + $0x5e8] sm:$0xff] }
  0xd8   :  { %v516_v39 = vld [vmem:[#allocation5 + $0xb40] sm:$0xff]  ;;  %v5807_v42 = vcombine.high %v652_v60, %v656_v35  ;;  %3414 = vmatprep.subr.bf16.mxu0 %v5679_v38  ;;  %v5806_v45 = vcombine.low %v652_v60, %v656_v35  ;;  %v213_v60 = vld [vmem:[#allocation5 + $0x1c8] sm:$0xff] }
  0xd9   :  { %v520_v40 = vld [vmem:[#allocation5 + $0xb60] sm:$0xff]  ;;  %3415 = vmatpush2.bf16.msra.mxu0 %v5678_v44  ;;  %v341_v35 = vld [vmem:[#allocation5 + $0x5c8] sm:$0xff] }
  0xda   :  { %v644_v41 = vld [vmem:[#allocation5 + $0xf40] sm:$0xff]  ;;  %v5671_v46 = vcombine.high %v516_v39, %v520_v40  ;;  %3457 = vmatprep.subr.bf16.mxu1 %v5807_v42  ;;  %v5670_v52 = vcombine.low %v516_v39, %v520_v40  ;;  %v5369_v40 = vcombine.high %v213_v60, %v217_v34  ;;  %v209_v42 = vld [vmem:[#allocation5 + $0x1a8] sm:$0xff]  ;;  %v5497_v44 = vcombine.high %v341_v35, %v345_v37 }
  0xdb   :  { %v648_v43 = vld [vmem:[#allocation5 + $0xf60] sm:$0xff]  ;;  %3458 = vmatpush2.bf16.msra.mxu1 %v5806_v45  ;;  %v337_v45 = vld [vmem:[#allocation5 + $0x5a8] sm:$0xff] }
  0xdc   :  { %v508_v47 = vld [vmem:[#allocation5 + $0xb00] sm:$0xff]  ;;  %v5799_v50 = vcombine.high %v644_v41, %v648_v43  ;;  %3416 = vmatprep.subr.bf16.mxu0 %v5671_v46  ;;  %v5798_v53 = vcombine.low %v644_v41, %v648_v43  ;;  %v205_v41 = vld [vmem:[#allocation5 + $0x188] sm:$0xff]  ;;  %v6638_v46 = vcombine.low %v6612_v23, %v6614_v24 }
  0xdd   :  { %v512_v48 = vld [vmem:[#allocation5 + $0xb20] sm:$0xff]  ;;  %3417 = vmatpush2.bf16.msra.mxu0 %v5670_v52  ;;  %v333_v43 = vld [vmem:[#allocation5 + $0x588] sm:$0xff]  ;;  %v5360_v23 = vcombine.low %v205_v41, %v209_v42 }
  0xde   :  { %v636_v49 = vld [vmem:[#allocation5 + $0xf00] sm:$0xff]  ;;  %v5663_v56 = vcombine.high %v508_v47, %v512_v48  ;;  %3459 = vmatprep.subr.bf16.mxu1 %v5799_v50  ;;  %v5662_v2 = vcombine.low %v508_v47, %v512_v48  ;;  %v6642_v47 = vcombine.low %v6620_v27, %v6622_v28  ;;  %v5368_v48 = vcombine.low %v213_v60, %v217_v34  ;;  %v201_v52 = vld [vmem:[#allocation5 + $0x168] sm:$0xff] }
  0xdf   :  { %v640_v51 = vld [vmem:[#allocation5 + $0xf20] sm:$0xff]  ;;  %3460 = vmatpush2.bf16.msra.mxu1 %v5798_v53  ;;  %v5361_v50 = vcombine.high %v205_v41, %v209_v42  ;;  %v5489_v53 = vcombine.high %v333_v43, %v337_v45  ;;  %v5488_v24 = vcombine.low %v333_v43, %v337_v45  ;;  %v189_v28 = vld [vmem:[#allocation5 + $0x108] sm:$0xff] }
  0xe0   :  { %v500_v57 = vld [vmem:[#allocation5 + $0xac0] sm:$0xff]  ;;  %v5791_v0 = vcombine.high %v636_v49, %v640_v51  ;;  %3418 = vmatprep.subr.bf16.mxu0 %v5663_v56  ;;  %v5790_v3 = vcombine.low %v636_v49, %v640_v51  ;;  %v5496_v49 = vcombine.low %v341_v35, %v345_v37  ;;  %v197_v51 = vld [vmem:[#allocation5 + $0x148] sm:$0xff] }
  0xe1   :  { %v504_v61 = vld [vmem:[#allocation5 + $0xae0] sm:$0xff]  ;;  %3419 = vmatpush2.bf16.msra.mxu0 %v5662_v2  ;;  %v325_v56 = vld [vmem:[#allocation5 + $0x548] sm:$0xff]  ;;  %v5353_v27 = vcombine.high %v197_v51, %v201_v52  ;;  %v5352_v2 = vcombine.low %v197_v51, %v201_v52 }
  0xe2   :  { %v628_v62 = vld [vmem:[#allocation5 + $0xec0] sm:$0xff]  ;;  %v5655_v4 = vcombine.high %v500_v57, %v504_v61  ;;  %3461 = vmatprep.subr.bf16.mxu1 %v5791_v0  ;;  %v5654_v10 = vcombine.low %v500_v57, %v504_v61  ;;  %v329_v57 = vld [vmem:[#allocation5 + $0x568] sm:$0xff] }
  0xe3   :  { %v632_v1 = vld [vmem:[#allocation5 + $0xee0] sm:$0xff]  ;;  %3462 = vmatpush2.bf16.msra.mxu1 %v5790_v3  ;;  %v193_v61 = vld [vmem:[#allocation5 + $0x128] sm:$0xff]  ;;  %v5481_v0 = vcombine.high %v325_v56, %v329_v57  ;;  %v5480_v3 = vcombine.low %v325_v56, %v329_v57 }
  0xe4   :  { %v492_v5 = vld [vmem:[#allocation5 + $0xa80] sm:$0xff]  ;;  %v5783_v8 = vcombine.high %v628_v62, %v632_v1  ;;  %3420 = vmatprep.subr.bf16.mxu0 %v5655_v4  ;;  %v5782_v11 = vcombine.low %v628_v62, %v632_v1  ;;  %v317_v62 = vld [vmem:[#allocation5 + $0x508] sm:$0xff]  ;;  %v5345_v4 = vcombine.high %v189_v28, %v193_v61 }
  0xe5   :  { %v496_v6 = vld [vmem:[#allocation5 + $0xaa0] sm:$0xff]  ;;  %3421 = vmatpush2.bf16.msra.mxu0 %v5654_v10  ;;  %v321_v1 = vld [vmem:[#allocation5 + $0x528] sm:$0xff]  ;;  %v5344_v10 = vcombine.low %v189_v28, %v193_v61 }
  0xe6   :  { %v620_v7 = vld [vmem:[#allocation5 + $0xe80] sm:$0xff]  ;;  %v5647_v12 = vcombine.high %v492_v5, %v496_v6  ;;  %3463 = vmatprep.subr.bf16.mxu1 %v5783_v8  ;;  %v5646_v18 = vcombine.low %v492_v5, %v496_v6  ;;  %v181_v5 = vld [vmem:[#allocation5 + $0xc8] sm:$0xff]  ;;  %v5473_v8 = vcombine.high %v317_v62, %v321_v1 }
  0xe7   :  { %v624_v9 = vld [vmem:[#allocation5 + $0xea0] sm:$0xff]  ;;  %3464 = vmatpush2.bf16.msra.mxu1 %v5782_v11  ;;  %v185_v6 = vld [vmem:[#allocation5 + $0xe8] sm:$0xff]  ;;  %v5472_v11 = vcombine.low %v317_v62, %v321_v1 }
  0xe8   :  { %v484_v13 = vld [vmem:[#allocation5 + $0xa40] sm:$0xff]  ;;  %v5775_v16 = vcombine.high %v620_v7, %v624_v9  ;;  %3422 = vmatprep.subr.bf16.mxu0 %v5647_v12  ;;  %v5774_v19 = vcombine.low %v620_v7, %v624_v9  ;;  %v309_v7 = vld [vmem:[#allocation5 + $0x4c8] sm:$0xff]  ;;  %v5337_v12 = vcombine.high %v181_v5, %v185_v6 }
  0xe9   :  { %v488_v14 = vld [vmem:[#allocation5 + $0xa60] sm:$0xff]  ;;  %3423 = vmatpush2.bf16.msra.mxu0 %v5646_v18  ;;  %v313_v9 = vld [vmem:[#allocation5 + $0x4e8] sm:$0xff]  ;;  %v5336_v18 = vcombine.low %v181_v5, %v185_v6 }
  0xea   :  { %v612_v15 = vld [vmem:[#allocation5 + $0xe40] sm:$0xff]  ;;  %v5639_v20 = vcombine.high %v484_v13, %v488_v14  ;;  %3465 = vmatprep.subr.bf16.mxu1 %v5775_v16  ;;  %v5638_v30 = vcombine.low %v484_v13, %v488_v14  ;;  %v173_v13 = vld [vmem:[#allocation5 + $0x88] sm:$0xff]  ;;  %v5465_v16 = vcombine.high %v309_v7, %v313_v9 }
  0xeb   :  { %v616_v17 = vld [vmem:[#allocation5 + $0xe60] sm:$0xff]  ;;  %3466 = vmatpush2.bf16.msra.mxu1 %v5774_v19  ;;  %v177_v14 = vld [vmem:[#allocation5 + $0xa8] sm:$0xff]  ;;  %v5464_v19 = vcombine.low %v309_v7, %v313_v9 }
  0xec   :  { %v476_v22 = vld [vmem:[#allocation5 + $0xa00] sm:$0xff]  ;;  %v5767_v54 = vcombine.high %v612_v15, %v616_v17  ;;  %3424 = vmatprep.subr.bf16.mxu0 %v5639_v20  ;;  %v5766_v31 = vcombine.low %v612_v15, %v616_v17  ;;  %v301_v15 = vld [vmem:[#allocation5 + $0x488] sm:$0xff]  ;;  %v5329_v20 = vcombine.high %v173_v13, %v177_v14 }
  0xed   :  { %v480_v26 = vld [vmem:[#allocation5 + $0xa20] sm:$0xff]  ;;  %3425 = vmatpush2.bf16.msra.mxu0 %v5638_v30  ;;  %v305_v17 = vld [vmem:[#allocation5 + $0x4a8] sm:$0xff]  ;;  %v5328_v30 = vcombine.low %v173_v13, %v177_v14 }
  0xee   :  { %v604_v29 = vld [vmem:[#allocation5 + $0xe00] sm:$0xff]  ;;  %v5631_v59 = vcombine.high %v476_v22, %v480_v26  ;;  %3467 = vmatprep.subr.bf16.mxu1 %v5767_v54  ;;  %v5630_v38 = vcombine.low %v476_v22, %v480_v26  ;;  %v165_v22 = vld [vmem:[#allocation5 + $0x48] sm:$0xff]  ;;  %v5457_v54 = vcombine.high %v301_v15, %v305_v17 }
  0xef   :  { %v608_v55 = vld [vmem:[#allocation5 + $0xe20] sm:$0xff]  ;;  %3468 = vmatpush2.bf16.msra.mxu1 %v5766_v31  ;;  %v169_v26 = vld [vmem:[#allocation5 + $0x68] sm:$0xff]  ;;  %v5456_v31 = vcombine.low %v301_v15, %v305_v17 }
  0xf0   :  { %v5759_v36 = vcombine.high %v604_v29, %v608_v55  ;;  %3426 = vmatprep.subr.bf16.mxu0 %v5631_v59  ;;  %v5758_v39 = vcombine.low %v604_v29, %v608_v55  ;;  %v293_v29 = vld [vmem:[#allocation5 + $0x448] sm:$0xff]  ;;  %v5321_v59 = vcombine.high %v165_v22, %v169_v26 }
  0xf1   :  { %3427 = vmatpush2.bf16.msra.mxu0 %v5630_v38  ;;  %v297_v55 = vld [vmem:[#allocation5 + $0x468] sm:$0xff]  ;;  %v5320_v38 = vcombine.low %v165_v22, %v169_v26 }
  0xf2   :  { %3469 = vmatprep.subr.bf16.mxu1 %v5759_v36  ;;  %3482 = vmatprep.subr.bf16.mxu0 %v5369_v40  ;;  %v157_v60 = vld [vmem:[#allocation5 + $0x8] sm:$0xff]  ;;  %v5449_v36 = vcombine.high %v293_v29, %v297_v55 }
  0xf3   :  { %3470 = vmatpush2.bf16.msra.mxu1 %v5758_v39  ;;  %v161_v34 = vld [vmem:[#allocation5 + $0x28] sm:$0xff]  ;;  %v5448_v39 = vcombine.low %v293_v29, %v297_v55 }
  0xf4   :  { %3525 = vmatprep.subr.bf16.mxu1 %v5497_v44  ;;  %3429 = vmatmul.mubr.bf16.vlgmr.msra.gmra.mxu0 %v6638_v46  ;;  %v285_v35 = vld [vmem:[#allocation5 + $0x408] sm:$0xff]  ;;  %v5313_v40 = vcombine.high %v157_v60, %v161_v34 }
  0xf5   :  { %3483 = vmatpush1.bf16.msra.mxu0 %v5368_v48  ;;  %3514 = vmatprep.mubr.bf16.mxu0 %v6596_v58  ;;  %v289_v37 = vld [vmem:[#allocation5 + $0x428] sm:$0xff]  ;;  %v5312_v48 = vcombine.low %v157_v60, %v161_v34 }
  0xf6   :  { %3472 = vmatmul.mubr.bf16.vlgmr.msra.gmra.mxu1 %v6642_v47  ;;  %3484 = vmatprep.subr.bf16.mxu0 %v5361_v50  ;;  %v277_v41 = vld [vmem:[#allocation5 + $0x3c8] sm:$0xff]  ;;  %v5441_v44 = vcombine.high %v285_v35, %v289_v37 }
  0xf7   :  { %3526 = vmatpush1.bf16.msra.mxu1 %v5496_v49  ;;  %3557 = vmatprep.mubr.bf16.mxu1 %v6604_v63  ;;  %v281_v42 = vld [vmem:[#allocation5 + $0x3e8] sm:$0xff]  ;;  %v5440_v49 = vcombine.low %v285_v35, %v289_v37 }
  0xf8   :  { %3527 = vmatprep.subr.bf16.mxu1 %v5489_v53  ;;  %v405_v43 = vld [vmem:[#allocation5 + $0x7c8] sm:$0xff]  ;;  %v5433_v50 = vcombine.high %v277_v41, %v281_v42 }
  0xf9   :  { %3485 = vmatpush1.bf16.msra.mxu0 %v5360_v23  ;;  %v409_v45 = vld [vmem:[#allocation5 + $0x7e8] sm:$0xff]  ;;  %v5432_v23 = vcombine.low %v277_v41, %v281_v42 }
  0xfa   :  { %3486 = vmatprep.subr.bf16.mxu0 %v5353_v27  ;;  %v5561_v51 = vcombine.high %v405_v43, %v409_v45  ;;  %v269_v52 = vld [vmem:[#allocation5 + $0x388] sm:$0xff] }
  0xfb   :  { %3528 = vmatpush1.bf16.msra.mxu1 %v5488_v24  ;;  %v273_v53 = vld [vmem:[#allocation5 + $0x3a8] sm:$0xff]  ;;  %v5560_v24 = vcombine.low %v405_v43, %v409_v45 }
  0xfc   :  { %3529 = vmatprep.subr.bf16.mxu1 %v5481_v0  ;;  %v397_v56 = vld [vmem:[#allocation5 + $0x788] sm:$0xff]  ;;  %v5425_v27 = vcombine.high %v269_v52, %v273_v53 }
  0xfd   :  { %3487 = vmatpush1.bf16.msra.mxu0 %v5352_v2  ;;  %v401_v57 = vld [vmem:[#allocation5 + $0x7a8] sm:$0xff]  ;;  %v5424_v2 = vcombine.low %v269_v52, %v273_v53 }
  0xfe   :  { %3488 = vmatprep.subr.bf16.mxu0 %v5345_v4  ;;  %v5553_v28 = vcombine.high %v397_v56, %v401_v57  ;;  %v261_v61 = vld [vmem:[#allocation5 + $0x348] sm:$0xff] }
  0xff   :  { %3530 = vmatpush1.bf16.msra.mxu1 %v5480_v3  ;;  %v265_v62 = vld [vmem:[#allocation5 + $0x368] sm:$0xff]  ;;  %v5552_v3 = vcombine.low %v397_v56, %v401_v57 }
 0x100   :  { %3531 = vmatprep.subr.bf16.mxu1 %v5473_v8  ;;  %v389_v0 = vld [vmem:[#allocation5 + $0x748] sm:$0xff]  ;;  %v5417_v4 = vcombine.high %v261_v61, %v265_v62 }
 0x101   :  { %3489 = vmatpush1.bf16.msra.mxu0 %v5344_v10  ;;  %v393_v1 = vld [vmem:[#allocation5 + $0x768] sm:$0xff]  ;;  %v5416_v10 = vcombine.low %v261_v61, %v265_v62 }
 0x102   :  { %3490 = vmatprep.subr.bf16.mxu0 %v5337_v12  ;;  %v5545_v5 = vcombine.high %v389_v0, %v393_v1  ;;  %v253_v6 = vld [vmem:[#allocation5 + $0x308] sm:$0xff] }
 0x103   :  { %3532 = vmatpush1.bf16.msra.mxu1 %v5472_v11  ;;  %v257_v7 = vld [vmem:[#allocation5 + $0x328] sm:$0xff]  ;;  %v5544_v11 = vcombine.low %v389_v0, %v393_v1 }
 0x104   :  { %3533 = vmatprep.subr.bf16.mxu1 %v5465_v16  ;;  %v381_v8 = vld [vmem:[#allocation5 + $0x708] sm:$0xff]  ;;  %v5409_v12 = vcombine.high %v253_v6, %v257_v7 }
 0x105   :  { %3491 = vmatpush1.bf16.msra.mxu0 %v5336_v18  ;;  %v385_v9 = vld [vmem:[#allocation5 + $0x728] sm:$0xff]  ;;  %v5408_v18 = vcombine.low %v253_v6, %v257_v7 }
 0x106   :  { %3492 = vmatprep.subr.bf16.mxu0 %v5329_v20  ;;  %v5537_v13 = vcombine.high %v381_v8, %v385_v9  ;;  %v245_v14 = vld [vmem:[#allocation5 + $0x2c8] sm:$0xff] }
 0x107   :  { %3534 = vmatpush1.bf16.msra.mxu1 %v5464_v19  ;;  %v249_v15 = vld [vmem:[#allocation5 + $0x2e8] sm:$0xff]  ;;  %v5536_v19 = vcombine.low %v381_v8, %v385_v9 }
 0x108   :  { %3535 = vmatprep.subr.bf16.mxu1 %v5457_v54  ;;  %v373_v16 = vld [vmem:[#allocation5 + $0x6c8] sm:$0xff]  ;;  %v5401_v20 = vcombine.high %v245_v14, %v249_v15 }
 0x109   :  { %3493 = vmatpush1.bf16.msra.mxu0 %v5328_v30  ;;  %v377_v17 = vld [vmem:[#allocation5 + $0x6e8] sm:$0xff]  ;;  %v5400_v30 = vcombine.low %v245_v14, %v249_v15 }
 0x10a   :  { %3494 = vmatprep.subr.bf16.mxu0 %v5321_v59  ;;  %v5529_v22 = vcombine.high %v373_v16, %v377_v17  ;;  %v237_v26 = vld [vmem:[#allocation5 + $0x288] sm:$0xff] }
 0x10b   :  { %3536 = vmatpush1.bf16.msra.mxu1 %v5456_v31  ;;  %v241_v29 = vld [vmem:[#allocation5 + $0x2a8] sm:$0xff]  ;;  %v5528_v31 = vcombine.low %v373_v16, %v377_v17 }
 0x10c   :  { %3537 = vmatprep.subr.bf16.mxu1 %v5449_v36  ;;  %v365_v54 = vld [vmem:[#allocation5 + $0x688] sm:$0xff]  ;;  %v5393_v59 = vcombine.high %v237_v26, %v241_v29 }
 0x10d   :  { %3495 = vmatpush1.bf16.msra.mxu0 %v5320_v38  ;;  %v369_v55 = vld [vmem:[#allocation5 + $0x6a8] sm:$0xff]  ;;  %v5392_v38 = vcombine.low %v237_v26, %v241_v29 }
 0x10e   :  { %3496 = vmatprep.subr.bf16.mxu0 %v5313_v40  ;;  %v5521_v60 = vcombine.high %v365_v54, %v369_v55  ;;  %v229_v34 = vld [vmem:[#allocation5 + $0x248] sm:$0xff] }
 0x10f   :  { %3538 = vmatpush1.bf16.msra.mxu1 %v5448_v39  ;;  %v233_v35 = vld [vmem:[#allocation5 + $0x268] sm:$0xff]  ;;  %v5520_v39 = vcombine.low %v365_v54, %v369_v55 }
 0x110   :  { %3539 = vmatprep.subr.bf16.mxu1 %v5441_v44  ;;  %v357_v36 = vld [vmem:[#allocation5 + $0x648] sm:$0xff]  ;;  %v5385_v40 = vcombine.high %v229_v34, %v233_v35 }
 0x111   :  { %3497 = vmatpush1.bf16.msra.mxu0 %v5312_v48  ;;  %v361_v37 = vld [vmem:[#allocation5 + $0x668] sm:$0xff]  ;;  %v5384_v48 = vcombine.low %v229_v34, %v233_v35 }
 0x112   :  { %3498 = vmatprep.subr.bf16.mxu0 %v5433_v50  ;;  %v5513_v41 = vcombine.high %v357_v36, %v361_v37  ;;  %v221_v42 = vld [vmem:[#allocation5 + $0x208] sm:$0xff] }
 0x113   :  { %3540 = vmatpush1.bf16.msra.mxu1 %v5440_v49  ;;  %v225_v43 = vld [vmem:[#allocation5 + $0x228] sm:$0xff]  ;;  %v5512_v49 = vcombine.low %v357_v36, %v361_v37 }
 0x114   :  { %3541 = vmatprep.subr.bf16.mxu1 %v5561_v51  ;;  %v349_v44 = vld [vmem:[#allocation5 + $0x608] sm:$0xff]  ;;  %v5377_v50 = vcombine.high %v221_v42, %v225_v43 }
 0x115   :  { %3499 = vmatpush2.bf16.msra.mxu0 %v5432_v23  ;;  %v353_v45 = vld [vmem:[#allocation5 + $0x628] sm:$0xff]  ;;  %v5376_v23 = vcombine.low %v221_v42, %v225_v43 }
 0x116   :  { %3500 = vmatprep.subr.bf16.mxu0 %v5425_v27  ;;  %v5505_v51 = vcombine.high %v349_v44, %v353_v45  ;;  %v469_v52 = vld [vmem:[#allocation5 + $0x9c8] sm:$0xff] }
 0x117   :  { %3542 = vmatpush2.bf16.msra.mxu1 %v5560_v24  ;;  %v473_v53 = vld [vmem:[#allocation5 + $0x9e8] sm:$0xff]  ;;  %v5504_v24 = vcombine.low %v349_v44, %v353_v45 }
 0x118   :  { %3543 = vmatprep.subr.bf16.mxu1 %v5553_v28  ;;  %v597_v56 = vld [vmem:[#allocation5 + $0xdc8] sm:$0xff]  ;;  %v5625_v27 = vcombine.high %v469_v52, %v473_v53 }
 0x119   :  { %3501 = vmatpush2.bf16.msra.mxu0 %v5424_v2  ;;  %v601_v57 = vld [vmem:[#allocation5 + $0xde8] sm:$0xff]  ;;  %v5624_v2 = vcombine.low %v469_v52, %v473_v53 }
 0x11a   :  { %3502 = vmatprep.subr.bf16.mxu0 %v5417_v4  ;;  %v5753_v28 = vcombine.high %v597_v56, %v601_v57  ;;  %v461_v61 = vld [vmem:[#allocation5 + $0x988] sm:$0xff] }
 0x11b   :  { %3544 = vmatpush2.bf16.msra.mxu1 %v5552_v3  ;;  %v465_v62 = vld [vmem:[#allocation5 + $0x9a8] sm:$0xff]  ;;  %v5752_v3 = vcombine.low %v597_v56, %v601_v57 }
 0x11c   :  { %3545 = vmatprep.subr.bf16.mxu1 %v5545_v5  ;;  %v589_v0 = vld [vmem:[#allocation5 + $0xd88] sm:$0xff]  ;;  %v5617_v4 = vcombine.high %v461_v61, %v465_v62 }
 0x11d   :  { %3503 = vmatpush2.bf16.msra.mxu0 %v5416_v10  ;;  %v593_v1 = vld [vmem:[#allocation5 + $0xda8] sm:$0xff]  ;;  %v5616_v10 = vcombine.low %v461_v61, %v465_v62 }
 0x11e   :  { %3504 = vmatprep.subr.bf16.mxu0 %v5409_v12  ;;  %v5745_v5 = vcombine.high %v589_v0, %v593_v1  ;;  %v453_v6 = vld [vmem:[#allocation5 + $0x948] sm:$0xff] }
 0x11f   :  { %3546 = vmatpush2.bf16.msra.mxu1 %v5544_v11  ;;  %v457_v7 = vld [vmem:[#allocation5 + $0x968] sm:$0xff]  ;;  %v5744_v11 = vcombine.low %v589_v0, %v593_v1 }
 0x120   :  { %3547 = vmatprep.subr.bf16.mxu1 %v5537_v13  ;;  %v581_v8 = vld [vmem:[#allocation5 + $0xd48] sm:$0xff]  ;;  %v5609_v12 = vcombine.high %v453_v6, %v457_v7 }
 0x121   :  { %3505 = vmatpush2.bf16.msra.mxu0 %v5408_v18  ;;  %v585_v9 = vld [vmem:[#allocation5 + $0xd68] sm:$0xff]  ;;  %v5608_v18 = vcombine.low %v453_v6, %v457_v7 }
 0x122   :  { %3506 = vmatprep.subr.bf16.mxu0 %v5401_v20  ;;  %v5737_v13 = vcombine.high %v581_v8, %v585_v9  ;;  %v445_v14 = vld [vmem:[#allocation5 + $0x908] sm:$0xff] }
 0x123   :  { %3548 = vmatpush2.bf16.msra.mxu1 %v5536_v19  ;;  %v449_v15 = vld [vmem:[#allocation5 + $0x928] sm:$0xff]  ;;  %v5736_v19 = vcombine.low %v581_v8, %v585_v9 }
 0x124   :  { %3549 = vmatprep.subr.bf16.mxu1 %v5529_v22  ;;  %v573_v16 = vld [vmem:[#allocation5 + $0xd08] sm:$0xff]  ;;  %v5601_v20 = vcombine.high %v445_v14, %v449_v15 }
 0x125   :  { %3507 = vmatpush2.bf16.msra.mxu0 %v5400_v30  ;;  %v577_v17 = vld [vmem:[#allocation5 + $0xd28] sm:$0xff]  ;;  %v5600_v30 = vcombine.low %v445_v14, %v449_v15 }
 0x126   :  { %3508 = vmatprep.subr.bf16.mxu0 %v5393_v59  ;;  %v5729_v22 = vcombine.high %v573_v16, %v577_v17  ;;  %v437_v26 = vld [vmem:[#allocation5 + $0x8c8] sm:$0xff] }
 0x127   :  { %3550 = vmatpush2.bf16.msra.mxu1 %v5528_v31  ;;  %v441_v29 = vld [vmem:[#allocation5 + $0x8e8] sm:$0xff]  ;;  %v5728_v31 = vcombine.low %v573_v16, %v577_v17 }
 0x128   :  { %3551 = vmatprep.subr.bf16.mxu1 %v5521_v60  ;;  %v565_v54 = vld [vmem:[#allocation5 + $0xcc8] sm:$0xff]  ;;  %v5593_v59 = vcombine.high %v437_v26, %v441_v29 }
 0x129   :  { %3509 = vmatpush2.bf16.msra.mxu0 %v5392_v38  ;;  %v569_v55 = vld [vmem:[#allocation5 + $0xce8] sm:$0xff]  ;;  %v5592_v38 = vcombine.low %v437_v26, %v441_v29 }
 0x12a   :  { %3510 = vmatprep.subr.bf16.mxu0 %v5385_v40  ;;  %v5721_v60 = vcombine.high %v565_v54, %v569_v55  ;;  %v429_v34 = vld [vmem:[#allocation5 + $0x888] sm:$0xff] }
 0x12b   :  { %3552 = vmatpush2.bf16.msra.mxu1 %v5520_v39  ;;  %v433_v35 = vld [vmem:[#allocation5 + $0x8a8] sm:$0xff]  ;;  %v5720_v39 = vcombine.low %v565_v54, %v569_v55 }
 0x12c   :  { %3553 = vmatprep.subr.bf16.mxu1 %v5513_v41  ;;  %v557_v36 = vld [vmem:[#allocation5 + $0xc88] sm:$0xff]  ;;  %v5585_v40 = vcombine.high %v429_v34, %v433_v35 }
 0x12d   :  { %3511 = vmatpush2.bf16.msra.mxu0 %v5384_v48  ;;  %v561_v37 = vld [vmem:[#allocation5 + $0xca8] sm:$0xff]  ;;  %v5584_v48 = vcombine.low %v429_v34, %v433_v35 }
 0x12e   :  { %3512 = vmatprep.subr.bf16.mxu0 %v5377_v50  ;;  %v5713_v41 = vcombine.high %v557_v36, %v561_v37  ;;  %v421_v42 = vld [vmem:[#allocation5 + $0x848] sm:$0xff] }
 0x12f   :  { %3554 = vmatpush2.bf16.msra.mxu1 %v5512_v49  ;;  %v425_v43 = vld [vmem:[#allocation5 + $0x868] sm:$0xff]  ;;  %v5712_v49 = vcombine.low %v557_v36, %v561_v37 }
 0x130   :  { %3555 = vmatprep.subr.bf16.mxu1 %v5505_v51  ;;  %v549_v44 = vld [vmem:[#allocation5 + $0xc48] sm:$0xff]  ;;  %v5577_v50 = vcombine.high %v421_v42, %v425_v43 }
 0x131   :  { %3513 = vmatpush2.bf16.msra.mxu0 %v5376_v23  ;;  %v553_v45 = vld [vmem:[#allocation5 + $0xc68] sm:$0xff]  ;;  %v5576_v23 = vcombine.low %v421_v42, %v425_v43 }
 0x132   :  { %3568 = vmatprep.subr.bf16.mxu0 %v5625_v27  ;;  %v5705_v51 = vcombine.high %v549_v44, %v553_v45  ;;  %v413_v52 = vld [vmem:[#allocation5 + $0x808] sm:$0xff] }
 0x133   :  { %3556 = vmatpush2.bf16.msra.mxu1 %v5504_v24  ;;  %v417_v53 = vld [vmem:[#allocation5 + $0x828] sm:$0xff]  ;;  %v5704_v24 = vcombine.low %v549_v44, %v553_v45 }
 0x134   :  { %3611 = vmatprep.subr.bf16.mxu1 %v5753_v28  ;;  %3515 = vmatmul.mubr.bf16.vlgmr.msra.gmra.mxu0 %v6610_v21  ;;  %v541_v56 = vld [vmem:[#allocation5 + $0xc08] sm:$0xff]  ;;  %v5569_v27 = vcombine.high %v413_v52, %v417_v53 }
 0x135   :  { %3569 = vmatpush1.bf16.msra.mxu0 %v5624_v2  ;;  %3600 = vmatprep.mubr.bf16.mxu0 %v6626_v32  ;;  %v545_v57 = vld [vmem:[#allocation5 + $0xc28] sm:$0xff]  ;;  %v5568_v2 = vcombine.low %v413_v52, %v417_v53 }
 0x136   :  { %3558 = vmatmul.mubr.bf16.vlgmr.msra.gmra.mxu1 %v6618_v25  ;;  %3570 = vmatprep.subr.bf16.mxu0 %v5617_v4  ;;  %v5697_v28 = vcombine.high %v541_v56, %v545_v57  ;;  %v533_v61 = vld [vmem:[#allocation5 + $0xbc8] sm:$0xff] }
 0x137   :  { %3612 = vmatpush1.bf16.msra.mxu1 %v5752_v3  ;;  %3643 = vmatprep.mubr.bf16.mxu1 %v6631_v33  ;;  %v537_v62 = vld [vmem:[#allocation5 + $0xbe8] sm:$0xff]  ;;  %v5696_v3 = vcombine.low %v541_v56, %v545_v57 }
 0x138   :  { %3613 = vmatprep.subr.bf16.mxu1 %v5745_v5  ;;  %v661_v0 = vld [vmem:[#allocation5 + $0xfc8] sm:$0xff]  ;;  %v5689_v4 = vcombine.high %v533_v61, %v537_v62 }
 0x139   :  { %3571 = vmatpush1.bf16.msra.mxu0 %v5616_v10  ;;  %v665_v1 = vld [vmem:[#allocation5 + $0xfe8] sm:$0xff]  ;;  %v5688_v10 = vcombine.low %v533_v61, %v537_v62 }
 0x13a   :  { %3572 = vmatprep.subr.bf16.mxu0 %v5609_v12  ;;  %v5817_v5 = vcombine.high %v661_v0, %v665_v1  ;;  %v525_v6 = vld [vmem:[#allocation5 + $0xb88] sm:$0xff] }
 0x13b   :  { %3614 = vmatpush1.bf16.msra.mxu1 %v5744_v11  ;;  %v529_v7 = vld [vmem:[#allocation5 + $0xba8] sm:$0xff]  ;;  %v5816_v11 = vcombine.low %v661_v0, %v665_v1 }
 0x13c   :  { %3615 = vmatprep.subr.bf16.mxu1 %v5737_v13  ;;  %v653_v8 = vld [vmem:[#allocation5 + $0xf88] sm:$0xff]  ;;  %v5681_v12 = vcombine.high %v525_v6, %v529_v7 }
 0x13d   :  { %3573 = vmatpush1.bf16.msra.mxu0 %v5608_v18  ;;  %v657_v9 = vld [vmem:[#allocation5 + $0xfa8] sm:$0xff]  ;;  %v5680_v18 = vcombine.low %v525_v6, %v529_v7 }
 0x13e   :  { %3574 = vmatprep.subr.bf16.mxu0 %v5601_v20  ;;  %v5809_v13 = vcombine.high %v653_v8, %v657_v9  ;;  %v517_v14 = vld [vmem:[#allocation5 + $0xb48] sm:$0xff] }
 0x13f   :  { %3616 = vmatpush1.bf16.msra.mxu1 %v5736_v19  ;;  %v521_v15 = vld [vmem:[#allocation5 + $0xb68] sm:$0xff]  ;;  %v5808_v19 = vcombine.low %v653_v8, %v657_v9  ;;  %v214_v8 = vld [vmem:[#allocation5 + $0x1d0] sm:$0xff] }
 0x140   :  { %3617 = vmatprep.subr.bf16.mxu1 %v5729_v22  ;;  %v645_v16 = vld [vmem:[#allocation5 + $0xf48] sm:$0xff]  ;;  %v5673_v20 = vcombine.high %v517_v14, %v521_v15  ;;  %v218_v9 = vld [vmem:[#allocation5 + $0x1f0] sm:$0xff] }
 0x141   :  { %3575 = vmatpush1.bf16.msra.mxu0 %v5600_v30  ;;  %v649_v17 = vld [vmem:[#allocation5 + $0xf68] sm:$0xff]  ;;  %v5672_v30 = vcombine.low %v517_v14, %v521_v15  ;;  %v6655_v15 = vld [vmem:[#allocation7] sm:$0xff] }
 0x142   :  { %3576 = vmatprep.subr.bf16.mxu0 %v5593_v59  ;;  %v5801_v22 = vcombine.high %v645_v16, %v649_v17  ;;  %v509_v26 = vld [vmem:[#allocation5 + $0xb08] sm:$0xff] }
 0x143   :  { %3618 = vmatpush1.bf16.msra.mxu1 %v5728_v31  ;;  %v513_v29 = vld [vmem:[#allocation5 + $0xb28] sm:$0xff]  ;;  %v5800_v31 = vcombine.low %v645_v16, %v649_v17  ;;  %v5371_v16 = vcombine.high %v214_v8, %v218_v9 }
 0x144   :  { %3619 = vmatprep.subr.bf16.mxu1 %v5721_v60  ;;  %v637_v54 = vld [vmem:[#allocation5 + $0xf08] sm:$0xff]  ;;  %v5665_v59 = vcombine.high %v509_v26, %v513_v29 }
 0x145   :  { %3577 = vmatpush1.bf16.msra.mxu0 %v5592_v38  ;;  %v641_v55 = vld [vmem:[#allocation5 + $0xf28] sm:$0xff]  ;;  %v5664_v38 = vcombine.low %v509_v26, %v513_v29  ;;  %v5370_v29 = vcombine.low %v214_v8, %v218_v9  ;;  %v302_v8 = vld [vmem:[#allocation5 + $0x490] sm:$0xff] }
 0x146   :  { %3578 = vmatprep.subr.bf16.mxu0 %v5585_v40  ;;  %v5793_v60 = vcombine.high %v637_v54, %v641_v55  ;;  %v501_v34 = vld [vmem:[#allocation5 + $0xac8] sm:$0xff]  ;;  %v306_v9 = vld [vmem:[#allocation5 + $0x4b0] sm:$0xff] }
 0x147   :  { %3620 = vmatpush1.bf16.msra.mxu1 %v5720_v39  ;;  %v505_v35 = vld [vmem:[#allocation5 + $0xae8] sm:$0xff]  ;;  %v5792_v39 = vcombine.low %v637_v54, %v641_v55 }
 0x148   :  { %3621 = vmatprep.subr.bf16.mxu1 %v5713_v41  ;;  %v629_v36 = vld [vmem:[#allocation5 + $0xec8] sm:$0xff]  ;;  %v5657_v40 = vcombine.high %v501_v34, %v505_v35 }
 0x149   :  { %3579 = vmatpush1.bf16.msra.mxu0 %v5584_v48  ;;  %v633_v37 = vld [vmem:[#allocation5 + $0xee8] sm:$0xff]  ;;  %v5656_v48 = vcombine.low %v501_v34, %v505_v35  ;;  %v326_v34 = vld [vmem:[#allocation5 + $0x550] sm:$0xff] }
 0x14a   :  { %3580 = vmatprep.subr.bf16.mxu0 %v5577_v50  ;;  %v5785_v41 = vcombine.high %v629_v36, %v633_v37  ;;  %v493_v42 = vld [vmem:[#allocation5 + $0xa88] sm:$0xff]  ;;  %v330_v35 = vld [vmem:[#allocation5 + $0x570] sm:$0xff] }
 0x14b   :  { %3622 = vmatpush1.bf16.msra.mxu1 %v5712_v49  ;;  %v497_v43 = vld [vmem:[#allocation5 + $0xaa8] sm:$0xff]  ;;  %v5784_v49 = vcombine.low %v629_v36, %v633_v37 }
 0x14c   :  { %3623 = vmatprep.subr.bf16.mxu1 %v5705_v51  ;;  %v621_v44 = vld [vmem:[#allocation5 + $0xe88] sm:$0xff]  ;;  %v5649_v50 = vcombine.high %v493_v42, %v497_v43 }
 0x14d   :  { %3581 = vmatpush1.bf16.msra.mxu0 %v5576_v23  ;;  %v625_v45 = vld [vmem:[#allocation5 + $0xea8] sm:$0xff]  ;;  %v5648_v23 = vcombine.low %v493_v42, %v497_v43 }
 0x14e   :  { %3582 = vmatprep.subr.bf16.mxu0 %v5569_v27  ;;  %v5777_v51 = vcombine.high %v621_v44, %v625_v45  ;;  %v485_v52 = vld [vmem:[#allocation5 + $0xa48] sm:$0xff]  ;;  %v5776_v27 = vcombine.low %v621_v44, %v625_v45  ;;  %v5483_v44 = vcombine.high %v326_v34, %v330_v35  ;;  %v190_v45 = vld [vmem:[#allocation5 + $0x110] sm:$0xff] }
 0x14f   :  { %3624 = vmatpush1.bf16.msra.mxu1 %v5704_v24  ;;  %v489_v53 = vld [vmem:[#allocation5 + $0xa68] sm:$0xff]  ;;  %v670_v24 = vlaneseq }
 0x150   :  { %3625 = vmatprep.subr.bf16.mxu1 %v5697_v28  ;;  %v613_v56 = vld [vmem:[#allocation5 + $0xe48] sm:$0xff]  ;;  %v5641_v28 = vcombine.high %v485_v52, %v489_v53 }
 0x151   :  { %3583 = vmatpush1.bf16.msra.mxu0 %v5568_v2  ;;  %v617_v57 = vld [vmem:[#allocation5 + $0xe68] sm:$0xff] }
 0x152   :  { %3584 = vmatprep.subr.bf16.mxu0 %v5689_v4  ;;  %v5769_v61 = vcombine.high %v613_v56, %v617_v57  ;;  %v477_v62 = vld [vmem:[#allocation5 + $0xa08] sm:$0xff]  ;;  %v6652_v4 = vshrl.u32 %v670_v24, 7 }
 0x153   :  { %3626 = vmatpush1.bf16.msra.mxu1 %v5696_v3  ;;  %v481_v0 = vld [vmem:[#allocation5 + $0xa28] sm:$0xff]  ;;  %v5640_v3 = vcombine.low %v485_v52, %v489_v53 }
 0x154   :  { %3627 = vmatprep.subr.bf16.mxu1 %v5817_v5  ;;  %v605_v1 = vld [vmem:[#allocation5 + $0xe08] sm:$0xff]  ;;  %v5768_v5 = vcombine.low %v613_v56, %v617_v57  ;;  %v5633_v6 = vcombine.high %v477_v62, %v481_v0  ;;  %v5482_v57 = vcombine.low %v326_v34, %v330_v35 }
 0x155   :  { %3585 = vmatpush2.bf16.msra.mxu0 %v5688_v10  ;;  %v609_v2 = vld [vmem:[#allocation5 + $0xe28] sm:$0xff]  ;;  %v342_v10 = vld [vmem:[#allocation5 + $0x5d0] sm:$0xff] }
 0x156   :  { %3586 = vmatprep.subr.bf16.mxu0 %v5681_v12  ;;  %v5761_v7 = vcombine.high %v605_v1, %v609_v2  ;;  %v5632_v12 = vcombine.low %v477_v62, %v481_v0  ;;  %v5760_v14 = vcombine.low %v605_v1, %v609_v2  ;;  %v310_v62 = vld [vmem:[#allocation5 + $0x4d0] sm:$0xff] }
 0x157   :  { %3628 = vmatpush2.bf16.msra.mxu1 %v5816_v11  ;;  %v346_v11 = vld [vmem:[#allocation5 + $0x5f0] sm:$0xff] }
 0x158   :  { %3629 = vmatprep.subr.bf16.mxu1 %v5809_v13  ;;  %v672_v13 = vsub.s32 0, %v6652_v4  ;;  %v5499_v17 = vcombine.high %v342_v10, %v346_v11  ;;  %v5498_v54 = vcombine.low %v342_v10, %v346_v11  ;;  %v314_v0 = vld [vmem:[#allocation5 + $0x4f0] sm:$0xff] }
 0x159   :  { %3587 = vmatpush2.bf16.msra.mxu0 %v5680_v18  ;;  %v206_v18 = vld [vmem:[#allocation5 + $0x190] sm:$0xff]  ;;  %v5466_v11 = vcombine.low %v310_v62, %v314_v0 }
 0x15a   :  { %3588 = vmatprep.subr.bf16.mxu0 %v5673_v20  ;;  %v334_v20 = vld [vmem:[#allocation5 + $0x590] sm:$0xff]  ;;  %v673_v26 = vrot.slane %v6655_v15, %v672_v13 }
 0x15b   :  { %3630 = vmatpush2.bf16.msra.mxu1 %v5808_v19  ;;  %v210_v19 = vld [vmem:[#allocation5 + $0x1b0] sm:$0xff] }
 0x15c   :  { %3631 = vmatprep.subr.bf16.mxu1 %v5801_v22  ;;  %v338_v22 = vld [vmem:[#allocation5 + $0x5b0] sm:$0xff]  ;;  %v5363_v55 = vcombine.high %v206_v18, %v210_v19 }
 0x15d   :  { %3589 = vmatpush2.bf16.msra.mxu0 %v5672_v30  ;;  %v5491_v30 = vcombine.high %v334_v20, %v338_v22 }
 0x15e   :  { %3590 = vmatprep.subr.bf16.mxu0 %v5665_v59  ;;  %v202_v59 = vld [vmem:[#allocation5 + $0x170] sm:$0xff] }
 0x15f   :  { %3632 = vmatpush2.bf16.msra.mxu1 %v5800_v31  ;;  %v198_v31 = vld [vmem:[#allocation5 + $0x150] sm:$0xff] }
 0x160   :  { %3633 = vmatprep.subr.bf16.mxu1 %v5793_v60  ;;  %v5354_v53 = vcombine.low %v198_v31, %v202_v59 }
 0x161   :  { %3591 = vmatpush2.bf16.msra.mxu0 %v5664_v38  ;;  %v5362_v38 = vcombine.low %v206_v18, %v210_v19  ;;  %v294_v18 = vld [vmem:[#allocation5 + $0x450] sm:$0xff] }
 0x162   :  { %3592 = vmatprep.subr.bf16.mxu0 %v5657_v40  ;;  %v5490_v40 = vcombine.low %v334_v20, %v338_v22  ;;  %v298_v19 = vld [vmem:[#allocation5 + $0x470] sm:$0xff]  ;;  %v5458_v22 = vcombine.low %v302_v8, %v306_v9 }
 0x163   :  { %3634 = vmatpush2.bf16.msra.mxu1 %v5792_v39 }
 0x164   :  { %3635 = vmatprep.subr.bf16.mxu1 %v5785_v41  ;;  %v5355_v41 = vcombine.high %v198_v31, %v202_v59  ;;  %v290_v31 = vld [vmem:[#allocation5 + $0x430] sm:$0xff] }
 0x165   :  { %3593 = vmatpush2.bf16.msra.mxu0 %v5656_v48  ;;  %v194_v48 = vld [vmem:[#allocation5 + $0x130] sm:$0xff] }
 0x166   :  { %3594 = vmatprep.subr.bf16.mxu0 %v5649_v50  ;;  %v318_v50 = vld [vmem:[#allocation5 + $0x510] sm:$0xff]  ;;  %v5346_v1 = vcombine.low %v190_v45, %v194_v48 }
 0x167   :  { %3636 = vmatpush2.bf16.msra.mxu1 %v5784_v49 }
 0x168   :  { %3637 = vmatprep.subr.bf16.mxu1 %v5777_v51  ;;  %v322_v51 = vld [vmem:[#allocation5 + $0x530] sm:$0xff] }
 0x169   :  { %3595 = vmatpush2.bf16.msra.mxu0 %v5648_v23  ;;  %v5347_v23 = vcombine.high %v190_v45, %v194_v48  ;;  %v5474_v2 = vcombine.low %v318_v50, %v322_v51 }
 0x16a   :  { %3596 = vmatprep.subr.bf16.mxu0 %v5641_v28  ;;  %v182_v28 = vld [vmem:[#allocation5 + $0xd0] sm:$0xff] }
 0x16b   :  { %3638 = vmatpush2.bf16.msra.mxu1 %v5776_v27  ;;  %v5475_v27 = vcombine.high %v318_v50, %v322_v51  ;;  %v274_v50 = vld [vmem:[#allocation5 + $0x3b0] sm:$0xff] }
 0x16c   :  { %3639 = vmatprep.subr.bf16.mxu1 %v5769_v61  ;;  %v186_v61 = vld [vmem:[#allocation5 + $0xf0] sm:$0xff] }
 0x16d   :  { %3597 = vmatpush2.bf16.msra.mxu0 %v5640_v3  ;;  %v5339_v3 = vcombine.high %v182_v28, %v186_v61  ;;  %v5338_v10 = vcombine.low %v182_v28, %v186_v61  ;;  %v398_v51 = vld [vmem:[#allocation5 + $0x790] sm:$0xff] }
 0x16e   :  { %3598 = vmatprep.subr.bf16.mxu0 %v5633_v6  ;;  %v174_v6 = vld [vmem:[#allocation5 + $0x90] sm:$0xff] }
 0x16f   :  { %3640 = vmatpush2.bf16.msra.mxu1 %v5768_v5  ;;  %v5467_v5 = vcombine.high %v310_v62, %v314_v0  ;;  %v266_v28 = vld [vmem:[#allocation5 + $0x370] sm:$0xff] }
 0x170   :  { %3641 = vmatprep.subr.bf16.mxu1 %v5761_v7  ;;  %v178_v7 = vld [vmem:[#allocation5 + $0xb0] sm:$0xff] }
 0x171   :  { %3599 = vmatpush2.bf16.msra.mxu0 %v5632_v12  ;;  %v5331_v12 = vcombine.high %v174_v6, %v178_v7  ;;  %v5330_v20 = vcombine.low %v174_v6, %v178_v7  ;;  %v390_v61 = vld [vmem:[#allocation5 + $0x750] sm:$0xff] }
 0x172   :  { %3654 = vmatprep.subr.bf16.mxu0 %v5371_v16  ;;  %v166_v16 = vld [vmem:[#allocation5 + $0x50] sm:$0xff] }
 0x173   :  { %3642 = vmatpush2.bf16.msra.mxu1 %v5760_v14  ;;  %v5459_v14 = vcombine.high %v302_v8, %v306_v9  ;;  %v394_v62 = vld [vmem:[#allocation5 + $0x770] sm:$0xff] }
 0x174   :  { %3697 = vmatprep.subr.bf16.mxu1 %v5499_v17  ;;  %v3344_v60 = vpop.f32.mrf.mxu0  ;;  %3601 = vmatmul.mubr.bf16.vlgmr.msra.gmra.mxu0 %v6638_v46  ;;  %v170_v17 = vld [vmem:[#allocation5 + $0x70] sm:$0xff] }
 0x175   :  { %v3345_v36 = vadd.f32 %v3344_v60, %v673_v26  ;;  %3655 = vmatpush1.bf16.msra.mxu0 %v5370_v29  ;;  %3686 = vmatprep.mubr.bf16.mxu0 %v6596_v58  ;;  %v5451_v29 = vcombine.high %v294_v18, %v298_v19  ;;  %v5322_v59 = vcombine.low %v166_v16, %v170_v17  ;;  %v258_v6 = vld [vmem:[#allocation5 + $0x330] sm:$0xff] }
 0x176   :  { %v3387_v37 = vpop.f32.mrf.mxu1  ;;  %3644 = vmatmul.mubr.bf16.vlgmr.msra.gmra.mxu1 %v6642_v47  ;;  %v6662_v39 = vpop.f32.mrf.mxu0  ;;  %3656 = vmatprep.subr.bf16.mxu0 %v5363_v55  ;;  %v162_v55 = vld [vmem:[#allocation5 + $0x30] sm:$0xff]  ;;  %v5450_v60 = vcombine.low %v294_v18, %v298_v19 }
 0x177   :  { %3698 = vmatpush1.bf16.msra.mxu1 %v5498_v54  ;;  %v6664_v42 = vadd.f32 %v3387_v37, %v3345_v36  ;;  %3729 = vmatprep.mubr.bf16.mxu1 %v6604_v63  ;;  %v158_v54 = vld [vmem:[#allocation5 + $0x10] sm:$0xff] }
 0x178   :  { %v6666_v43 = vpop.f32.mrf.mxu1  ;;  %3699 = vmatprep.subr.bf16.mxu1 %v5491_v30  ;;  %v3348_v49 = vpop.f32.mrf.mxu0  ;;  %v286_v30 = vld [vmem:[#allocation5 + $0x410] sm:$0xff]  ;;  %v5315_v34 = vcombine.high %v158_v54, %v162_v55 }
 0x179   :  { %v3349_v52 = vadd.f32 %v3348_v49, %v673_v26  ;;  %3657 = vmatpush1.bf16.msra.mxu0 %v5362_v38  ;;  %v5323_v26 = vcombine.high %v166_v16, %v170_v17  ;;  %v5443_v35 = vcombine.high %v286_v30, %v290_v31  ;;  %v278_v36 = vld [vmem:[#allocation5 + $0x3d0] sm:$0xff] }
 0x17a   :  { %v3391_v56 = vpop.f32.mrf.mxu1  ;;  %3658 = vmatprep.subr.bf16.mxu0 %v5355_v41  ;;  %v282_v37 = vld [vmem:[#allocation5 + $0x3f0] sm:$0xff]  ;;  %v5314_v41 = vcombine.low %v158_v54, %v162_v55 }
 0x17b   :  { %3700 = vmatpush1.bf16.msra.mxu1 %v5490_v40  ;;  %v6670_v24 = vadd.f32 %v3391_v56, %v3349_v52  ;;  %v406_v38 = vld [vmem:[#allocation5 + $0x7d0] sm:$0xff]  ;;  %v5435_v45 = vcombine.high %v278_v36, %v282_v37 }
 0x17c   :  { %3701 = vmatprep.subr.bf16.mxu1 %v5483_v44  ;;  %v410_v40 = vld [vmem:[#allocation5 + $0x7f0] sm:$0xff]  ;;  %v5442_v44 = vcombine.low %v286_v30, %v290_v31 }
 0x17d   :  { %3659 = vmatpush1.bf16.msra.mxu0 %v5354_v53  ;;  %v5563_v48 = vcombine.high %v406_v38, %v410_v40  ;;  %v270_v49 = vld [vmem:[#allocation5 + $0x390] sm:$0xff]  ;;  %v5434_v53 = vcombine.low %v278_v36, %v282_v37  ;;  %v5562_v56 = vcombine.low %v406_v38, %v410_v40 }
 0x17e   :  { %3660 = vmatprep.subr.bf16.mxu0 %v5347_v23  ;;  %v402_v52 = vld [vmem:[#allocation5 + $0x7b0] sm:$0xff]  ;;  %v5426_v0 = vcombine.low %v270_v49, %v274_v50 }
 0x17f   :  { %3702 = vmatpush1.bf16.msra.mxu1 %v5482_v57  ;;  %v5427_v57 = vcombine.high %v270_v49, %v274_v50  ;;  %v5555_v23 = vcombine.high %v398_v51, %v402_v52  ;;  %v382_v7 = vld [vmem:[#allocation5 + $0x710] sm:$0xff] }
 0x180   :  { %3703 = vmatprep.subr.bf16.mxu1 %v5475_v27  ;;  %v262_v27 = vld [vmem:[#allocation5 + $0x350] sm:$0xff] }
 0x181   :  { %3661 = vmatpush1.bf16.msra.mxu0 %v5346_v1  ;;  %v5554_v1 = vcombine.low %v398_v51, %v402_v52  ;;  %v386_v8 = vld [vmem:[#allocation5 + $0x730] sm:$0xff]  ;;  %v5418_v9 = vcombine.low %v262_v27, %v266_v28 }
 0x182   :  { %3662 = vmatprep.subr.bf16.mxu0 %v5339_v3  ;;  %v5547_v3 = vcombine.high %v390_v61, %v394_v62  ;;  %v250_v16 = vld [vmem:[#allocation5 + $0x2f0] sm:$0xff] }
 0x183   :  { %3704 = vmatpush1.bf16.msra.mxu1 %v5474_v2  ;;  %v5419_v2 = vcombine.high %v262_v27, %v266_v28  ;;  %v374_v17 = vld [vmem:[#allocation5 + $0x6d0] sm:$0xff] }
 0x184   :  { %3705 = vmatprep.subr.bf16.mxu1 %v5467_v5  ;;  %v254_v5 = vld [vmem:[#allocation5 + $0x310] sm:$0xff] }
 0x185   :  { %3663 = vmatpush1.bf16.msra.mxu0 %v5338_v10  ;;  %v5546_v10 = vcombine.low %v390_v61, %v394_v62  ;;  %v378_v18 = vld [vmem:[#allocation5 + $0x6f0] sm:$0xff]  ;;  %v5410_v19 = vcombine.low %v254_v5, %v258_v6 }
 0x186   :  { %3664 = vmatprep.subr.bf16.mxu0 %v5331_v12  ;;  %v5539_v12 = vcombine.high %v382_v7, %v386_v8  ;;  %v242_v54 = vld [vmem:[#allocation5 + $0x2b0] sm:$0xff] }
 0x187   :  { %3706 = vmatpush1.bf16.msra.mxu1 %v5466_v11  ;;  %v5411_v11 = vcombine.high %v254_v5, %v258_v6  ;;  %v366_v55 = vld [vmem:[#allocation5 + $0x690] sm:$0xff] }
 0x188   :  { %3707 = vmatprep.subr.bf16.mxu1 %v5459_v14  ;;  %v246_v14 = vld [vmem:[#allocation5 + $0x2d0] sm:$0xff] }
 0x189   :  { %3665 = vmatpush1.bf16.msra.mxu0 %v5330_v20  ;;  %v5538_v20 = vcombine.low %v382_v7, %v386_v8  ;;  %v370_v30 = vld [vmem:[#allocation5 + $0x6b0] sm:$0xff]  ;;  %v5402_v31 = vcombine.low %v246_v14, %v250_v16 }
 0x18a   :  { %3666 = vmatprep.subr.bf16.mxu0 %v5323_v26  ;;  %v5531_v26 = vcombine.high %v374_v17, %v378_v18  ;;  %v234_v36 = vld [vmem:[#allocation5 + $0x270] sm:$0xff] }
 0x18b   :  { %3708 = vmatpush1.bf16.msra.mxu1 %v5458_v22  ;;  %v5403_v22 = vcombine.high %v246_v14, %v250_v16  ;;  %v358_v37 = vld [vmem:[#allocation5 + $0x650] sm:$0xff] }
 0x18c   :  { %3709 = vmatprep.subr.bf16.mxu1 %v5451_v29  ;;  %v238_v29 = vld [vmem:[#allocation5 + $0x290] sm:$0xff] }
 0x18d   :  { %3667 = vmatpush1.bf16.msra.mxu0 %v5322_v59  ;;  %v5530_v59 = vcombine.low %v374_v17, %v378_v18  ;;  %v362_v38 = vld [vmem:[#allocation5 + $0x670] sm:$0xff]  ;;  %v5394_v40 = vcombine.low %v238_v29, %v242_v54 }
 0x18e   :  { %3668 = vmatprep.subr.bf16.mxu0 %v5315_v34  ;;  %v5523_v34 = vcombine.high %v366_v55, %v370_v30  ;;  %v226_v49 = vld [vmem:[#allocation5 + $0x230] sm:$0xff] }
 0x18f   :  { %3710 = vmatpush1.bf16.msra.mxu1 %v5450_v60  ;;  %v5395_v60 = vcombine.high %v238_v29, %v242_v54  ;;  %v350_v50 = vld [vmem:[#allocation5 + $0x610] sm:$0xff] }
 0x190   :  { %3711 = vmatprep.subr.bf16.mxu1 %v5443_v35  ;;  %v230_v35 = vld [vmem:[#allocation5 + $0x250] sm:$0xff] }
 0x191   :  { %3669 = vmatpush1.bf16.msra.mxu0 %v5314_v41  ;;  %v5522_v41 = vcombine.low %v366_v55, %v370_v30  ;;  %v354_v51 = vld [vmem:[#allocation5 + $0x630] sm:$0xff]  ;;  %v5386_v52 = vcombine.low %v230_v35, %v234_v36 }
 0x192   :  { %3670 = vmatprep.subr.bf16.mxu0 %v5435_v45  ;;  %v5515_v45 = vcombine.high %v358_v37, %v362_v38  ;;  %v474_v27 = vld [vmem:[#allocation5 + $0x9f0] sm:$0xff] }
 0x193   :  { %3712 = vmatpush1.bf16.msra.mxu1 %v5442_v44  ;;  %v5387_v44 = vcombine.high %v230_v35, %v234_v36  ;;  %v598_v28 = vld [vmem:[#allocation5 + $0xdd0] sm:$0xff] }
 0x194   :  { %3713 = vmatprep.subr.bf16.mxu1 %v5563_v48  ;;  %v222_v48 = vld [vmem:[#allocation5 + $0x210] sm:$0xff] }
 0x195   :  { %3671 = vmatpush2.bf16.msra.mxu0 %v5434_v53  ;;  %v5514_v53 = vcombine.low %v358_v37, %v362_v38  ;;  %v602_v61 = vld [vmem:[#allocation5 + $0xdf0] sm:$0xff]  ;;  %v5378_v62 = vcombine.low %v222_v48, %v226_v49 }
 0x196   :  { %3672 = vmatprep.subr.bf16.mxu0 %v5427_v57  ;;  %v5507_v57 = vcombine.high %v350_v50, %v354_v51  ;;  %v466_v5 = vld [vmem:[#allocation5 + $0x9b0] sm:$0xff] }
 0x197   :  { %3714 = vmatpush2.bf16.msra.mxu1 %v5562_v56  ;;  %v5379_v56 = vcombine.high %v222_v48, %v226_v49  ;;  %v590_v6 = vld [vmem:[#allocation5 + $0xd90] sm:$0xff] }
 0x198   :  { %3715 = vmatprep.subr.bf16.mxu1 %v5555_v23  ;;  %v470_v23 = vld [vmem:[#allocation5 + $0x9d0] sm:$0xff] }
 0x199   :  { %3673 = vmatpush2.bf16.msra.mxu0 %v5426_v0  ;;  %v5506_v0 = vcombine.low %v350_v50, %v354_v51  ;;  %v594_v7 = vld [vmem:[#allocation5 + $0xdb0] sm:$0xff]  ;;  %v5626_v8 = vcombine.low %v470_v23, %v474_v27 }
 0x19a   :  { %3674 = vmatprep.subr.bf16.mxu0 %v5419_v2  ;;  %v5755_v2 = vcombine.high %v598_v28, %v602_v61  ;;  %v5747_v14 = vcombine.high %v590_v6, %v594_v7  ;;  %v454_v16 = vld [vmem:[#allocation5 + $0x950] sm:$0xff]  ;;  %v5746_v55 = vcombine.low %v590_v6, %v594_v7 }
 0x19b   :  { %3716 = vmatpush2.bf16.msra.mxu1 %v5554_v1  ;;  %v5627_v1 = vcombine.high %v470_v23, %v474_v27  ;;  %v458_v17 = vld [vmem:[#allocation5 + $0x970] sm:$0xff] }
 0x19c   :  { %3717 = vmatprep.subr.bf16.mxu1 %v5547_v3  ;;  %v462_v3 = vld [vmem:[#allocation5 + $0x990] sm:$0xff]  ;;  %v5611_v30 = vcombine.high %v454_v16, %v458_v17 }
 0x19d   :  { %3675 = vmatpush2.bf16.msra.mxu0 %v5418_v9  ;;  %v6672_v9 = vpop.f32.mrf.mxu0  ;;  %v5618_v29 = vcombine.low %v462_v3, %v466_v5  ;;  %v450_v35 = vld [vmem:[#allocation5 + $0x930] sm:$0xff] }
 0x19e   :  { %3676 = vmatprep.subr.bf16.mxu0 %v5411_v11  ;;  %v5619_v11 = vcombine.high %v462_v3, %v466_v5  ;;  %v574_v36 = vld [vmem:[#allocation5 + $0xd10] sm:$0xff] }
 0x19f   :  { %3718 = vmatpush2.bf16.msra.mxu1 %v5546_v10  ;;  %v5754_v10 = vcombine.low %v598_v28, %v602_v61  ;;  %v578_v37 = vld [vmem:[#allocation5 + $0xd30] sm:$0xff] }
 0x1a0   :  { %3719 = vmatprep.subr.bf16.mxu1 %v5539_v12  ;;  %v6674_v12 = vpop.f32.mrf.mxu1  ;;  %v5731_v49 = vcombine.high %v574_v36, %v578_v37  ;;  %v438_v50 = vld [vmem:[#allocation5 + $0x8d0] sm:$0xff] }
 0x1a1   :  { %3677 = vmatpush2.bf16.msra.mxu0 %v5410_v19  ;;  %v582_v19 = vld [vmem:[#allocation5 + $0xd50] sm:$0xff] }
 0x1a2   :  { %3678 = vmatprep.subr.bf16.mxu0 %v5403_v22  ;;  %v442_v51 = vld [vmem:[#allocation5 + $0x8f0] sm:$0xff] }
 0x1a3   :  { %3720 = vmatpush2.bf16.msra.mxu1 %v5538_v20  ;;  %v586_v20 = vld [vmem:[#allocation5 + $0xd70] sm:$0xff]  ;;  %v5595_v27 = vcombine.high %v438_v50, %v442_v51  ;;  %v5594_v3 = vcombine.low %v438_v50, %v442_v51 }
 0x1a4   :  { %3721 = vmatprep.subr.bf16.mxu1 %v5531_v26 }
 0x1a5   :  { %3679 = vmatpush2.bf16.msra.mxu0 %v5402_v31 }
 0x1a6   :  { %3680 = vmatprep.subr.bf16.mxu0 %v5395_v60  ;;  %v5739_v60 = vcombine.high %v582_v19, %v586_v20 }
 0x1a7   :  { %3722 = vmatpush2.bf16.msra.mxu1 %v5530_v59 }
 0x1a8   :  { %3723 = vmatprep.subr.bf16.mxu1 %v5523_v34  ;;  %v446_v34 = vld [vmem:[#allocation5 + $0x910] sm:$0xff] }
 0x1a9   :  { %3681 = vmatpush2.bf16.msra.mxu0 %v5394_v40  ;;  %v5610_v40 = vcombine.low %v454_v16, %v458_v17  ;;  %v5602_v23 = vcombine.low %v446_v34, %v450_v35 }
 0x1aa   :  { %3682 = vmatprep.subr.bf16.mxu0 %v5387_v44  ;;  %v5738_v44 = vcombine.low %v582_v19, %v586_v20  ;;  %v414_v20 = vld [vmem:[#allocation5 + $0x810] sm:$0xff] }
 0x1ab   :  { %3724 = vmatpush2.bf16.msra.mxu1 %v5522_v41 }
 0x1ac   :  { %3725 = vmatprep.subr.bf16.mxu1 %v5515_v45  ;;  %v5603_v45 = vcombine.high %v446_v34, %v450_v35  ;;  %v534_v34 = vld [vmem:[#allocation5 + $0xbd0] sm:$0xff] }
 0x1ad   :  { %3683 = vmatpush2.bf16.msra.mxu0 %v5386_v52  ;;  %v566_v52 = vld [vmem:[#allocation5 + $0xcd0] sm:$0xff] }
 0x1ae   :  { %3684 = vmatprep.subr.bf16.mxu0 %v5379_v56  ;;  %v538_v35 = vld [vmem:[#allocation5 + $0xbf0] sm:$0xff] }
 0x1af   :  { %3726 = vmatpush2.bf16.msra.mxu1 %v5514_v53  ;;  %v570_v53 = vld [vmem:[#allocation5 + $0xcf0] sm:$0xff]  ;;  %v5690_v50 = vcombine.low %v534_v34, %v538_v35 }
 0x1b0   :  { %3727 = vmatprep.subr.bf16.mxu1 %v5507_v57  ;;  %v5723_v61 = vcombine.high %v566_v52, %v570_v53  ;;  %v5722_v5 = vcombine.low %v566_v52, %v570_v53 }
 0x1b1   :  { %3685 = vmatpush2.bf16.msra.mxu0 %v5378_v62  ;;  %v430_v62 = vld [vmem:[#allocation5 + $0x890] sm:$0xff] }
 0x1b2   :  { %3740 = vmatprep.subr.bf16.mxu0 %v5627_v1  ;;  %v558_v1 = vld [vmem:[#allocation5 + $0xc90] sm:$0xff] }
 0x1b3   :  { %3728 = vmatpush2.bf16.msra.mxu1 %v5506_v0  ;;  %v434_v0 = vld [vmem:[#allocation5 + $0x8b0] sm:$0xff] }
 0x1b4   :  { %3783 = vmatprep.subr.bf16.mxu1 %v5755_v2  ;;  %v3430_v18 = vpop.f32.mrf.mxu0  ;;  %3687 = vmatmul.mubr.bf16.vlgmr.msra.gmra.mxu0 %v6610_v21  ;;  %v562_v2 = vld [vmem:[#allocation5 + $0xcb0] sm:$0xff]  ;;  %v5587_v6 = vcombine.high %v430_v62, %v434_v0  ;;  %v5586_v16 = vcombine.low %v430_v62, %v434_v0 }
 0x1b5   :  { %v3431_v22 = vadd.f32 %v3430_v18, %v6664_v42  ;;  %3741 = vmatpush1.bf16.msra.mxu0 %v5626_v8  ;;  %3772 = vmatprep.mubr.bf16.mxu0 %v6626_v32  ;;  %v5715_v7 = vcombine.high %v558_v1, %v562_v2  ;;  %v422_v8 = vld [vmem:[#allocation5 + $0x850] sm:$0xff]  ;;  %v5714_v17 = vcombine.low %v558_v1, %v562_v2 }
 0x1b6   :  { %v3473_v26 = vpop.f32.mrf.mxu1  ;;  %3730 = vmatmul.mubr.bf16.vlgmr.msra.gmra.mxu1 %v6618_v25  ;;  %v6679_v54 = vpop.f32.mrf.mxu0  ;;  %3742 = vmatprep.subr.bf16.mxu0 %v5619_v11  ;;  %v550_v11 = vld [vmem:[#allocation5 + $0xc50] sm:$0xff] }
 0x1b7   :  { %3784 = vmatpush1.bf16.msra.mxu1 %v5754_v10  ;;  %v3474_v31 = vadd.f32 %v3473_v26, %v3431_v22  ;;  %3815 = vmatprep.mubr.bf16.mxu1 %v6631_v33  ;;  %v426_v10 = vld [vmem:[#allocation5 + $0x870] sm:$0xff] }
 0x1b8   :  { %v6681_v59 = vpop.f32.mrf.mxu1  ;;  %3785 = vmatprep.subr.bf16.mxu1 %v5747_v14  ;;  %v3434_v42 = vpop.f32.mrf.mxu0  ;;  %v554_v14 = vld [vmem:[#allocation5 + $0xc70] sm:$0xff]  ;;  %v5579_v18 = vcombine.high %v422_v8, %v426_v10 }
 0x1b9   :  { %v3435_v38 = vadd.f32 %v3434_v42, %v6670_v24  ;;  %3743 = vmatpush1.bf16.msra.mxu0 %v5618_v29  ;;  %v3998_v56 = vmax.f32 %v3474_v31, 0.0  ;;  %v5730_v24 = vcombine.low %v574_v36, %v578_v37  ;;  %v5707_v19 = vcombine.high %v550_v11, %v554_v14  ;;  %v418_v22 = vld [vmem:[#allocation5 + $0x830] sm:$0xff] }
 0x1ba   :  { %v3477_v41 = vpop.f32.mrf.mxu1  ;;  %3744 = vmatprep.subr.bf16.mxu0 %v5611_v30  ;;  %v542_v26 = vld [vmem:[#allocation5 + $0xc10] sm:$0xff]  ;;  %v5706_v30 = vcombine.low %v550_v11, %v554_v14  ;;  %v5571_v31 = vcombine.high %v414_v20, %v418_v22  ;;  %v5570_v37 = vcombine.low %v414_v20, %v418_v22 }
 0x1bb   :  { %3786 = vmatpush1.bf16.msra.mxu1 %v5746_v55  ;;  %v3478_v48 = vadd.f32 %v3477_v41, %v3435_v38  ;;  %v546_v29 = vld [vmem:[#allocation5 + $0xc30] sm:$0xff]  ;;  %v5578_v55 = vcombine.low %v422_v8, %v426_v10 }
 0x1bc   :  { %3787 = vmatprep.subr.bf16.mxu1 %v5739_v60  ;;  %v5699_v60 = vcombine.high %v542_v26, %v546_v29  ;;  %v662_v42 = vld [vmem:[#allocation5 + $0xfd0] sm:$0xff]  ;;  %v5698_v38 = vcombine.low %v542_v26, %v546_v29 }
 0x1bd   :  { %v4006_v57 = vmax.f32 %v3478_v48, 0.0  ;;  %3745 = vmatpush1.bf16.msra.mxu0 %v5610_v40  ;;  %v666_v36 = vld [vmem:[#allocation5 + $0xff0] sm:$0xff]  ;;  %v5691_v40 = vcombine.high %v534_v34, %v538_v35 }
 0x1be   :  { %3746 = vmatprep.subr.bf16.mxu0 %v5603_v45  ;;  %v5819_v41 = vcombine.high %v662_v42, %v666_v36  ;;  %v530_v45 = vld [vmem:[#allocation5 + $0xbb0] sm:$0xff]  ;;  %v5818_v51 = vcombine.low %v662_v42, %v666_v36 }
 0x1bf   :  { %3788 = vmatpush1.bf16.msra.mxu1 %v5738_v44  ;;  %v6686_v28 = vpack.c.bf16 %v4006_v57, %v3998_v56  ;;  %v526_v44 = vld [vmem:[#allocation5 + $0xb90] sm:$0xff] }
 0x1c0   :  { %3789 = vmatprep.subr.bf16.mxu1 %v5731_v49  ;;  %v654_v48 = vld [vmem:[#allocation5 + $0xf90] sm:$0xff]  ;;  %v5683_v52 = vcombine.high %v526_v44, %v530_v45 }
 0x1c1   :  { %3747 = vmatpush1.bf16.msra.mxu0 %v5602_v23  ;;  %v658_v49 = vld [vmem:[#allocation5 + $0xfb0] sm:$0xff] }
 0x1c2   :  { %3748 = vmatprep.subr.bf16.mxu0 %v5595_v27  ;;  %v5811_v53 = vcombine.high %v654_v48, %v658_v49  ;;  %v518_v56 = vld [vmem:[#allocation5 + $0xb50] sm:$0xff]  ;;  %v5682_v27 = vcombine.low %v526_v44, %v530_v45 }
 0x1c3   :  { %3790 = vmatpush1.bf16.msra.mxu1 %v5730_v24  ;;  %v522_v57 = vld [vmem:[#allocation5 + $0xb70] sm:$0xff] }
 0x1c4   :  { %3791 = vmatprep.subr.bf16.mxu1 %v5723_v61  ;;  %v646_v23 = vld [vmem:[#allocation5 + $0xf50] sm:$0xff]  ;;  %v5810_v61 = vcombine.low %v654_v48, %v658_v49  ;;  %v5675_v62 = vcombine.high %v518_v56, %v522_v57 }
 0x1c5   :  { %3749 = vmatpush1.bf16.msra.mxu0 %v5594_v3  ;;  %v650_v24 = vld [vmem:[#allocation5 + $0xf70] sm:$0xff] }
 0x1c6   :  { %3750 = vmatprep.subr.bf16.mxu0 %v5587_v6  ;;  %v5803_v0 = vcombine.high %v646_v23, %v650_v24  ;;  %v510_v1 = vld [vmem:[#allocation5 + $0xb10] sm:$0xff]  ;;  %v5674_v6 = vcombine.low %v518_v56, %v522_v57 }
 0x1c7   :  { %3792 = vmatpush1.bf16.msra.mxu1 %v5722_v5  ;;  %v514_v2 = vld [vmem:[#allocation5 + $0xb30] sm:$0xff] }
 0x1c8   :  { %3793 = vmatprep.subr.bf16.mxu1 %v5715_v7  ;;  %v638_v3 = vld [vmem:[#allocation5 + $0xf10] sm:$0xff]  ;;  %v5802_v7 = vcombine.low %v646_v23, %v650_v24  ;;  %v5667_v8 = vcombine.high %v510_v1, %v514_v2  ;;  %v215_v23 = vld [vmem:[#allocation5 + $0x1d8] sm:$0xff] }
 0x1c9   :  { %3751 = vmatpush1.bf16.msra.mxu0 %v5586_v16  ;;  %v642_v5 = vld [vmem:[#allocation5 + $0xf30] sm:$0xff]  ;;  %v219_v24 = vld [vmem:[#allocation5 + $0x1f8] sm:$0xff] }
 0x1ca   :  { %3752 = vmatprep.subr.bf16.mxu0 %v5579_v18  ;;  %v5795_v10 = vcombine.high %v638_v3, %v642_v5  ;;  %v502_v11 = vld [vmem:[#allocation5 + $0xad0] sm:$0xff]  ;;  %v5666_v18 = vcombine.low %v510_v1, %v514_v2  ;;  %v5373_v2 = vcombine.high %v215_v23, %v219_v24 }
 0x1cb   :  { %3794 = vmatpush1.bf16.msra.mxu1 %v5714_v17  ;;  %v506_v14 = vld [vmem:[#allocation5 + $0xaf0] sm:$0xff] }
 0x1cc   :  { %3795 = vmatprep.subr.bf16.mxu1 %v5707_v19  ;;  %v630_v16 = vld [vmem:[#allocation5 + $0xed0] sm:$0xff]  ;;  %v5794_v19 = vcombine.low %v638_v3, %v642_v5  ;;  %v5659_v20 = vcombine.high %v502_v11, %v506_v14  ;;  %v207_v5 = vld [vmem:[#allocation5 + $0x198] sm:$0xff] }
 0x1cd   :  { %3753 = vmatpush1.bf16.msra.mxu0 %v5578_v55  ;;  %v634_v17 = vld [vmem:[#allocation5 + $0xef0] sm:$0xff] }
 0x1ce   :  { %3754 = vmatprep.subr.bf16.mxu0 %v5571_v31  ;;  %v5787_v22 = vcombine.high %v630_v16, %v634_v17  ;;  %v494_v26 = vld [vmem:[#allocation5 + $0xa90] sm:$0xff]  ;;  %v5658_v31 = vcombine.low %v502_v11, %v506_v14  ;;  %v5372_v11 = vcombine.low %v215_v23, %v219_v24  ;;  %v6690_v14 = vpop.f32.mrf.mxu0  ;;  %v187_v23 = vld [vmem:[#allocation5 + $0xf8] sm:$0xff] }
 0x1cf   :  { %3796 = vmatpush1.bf16.msra.mxu1 %v5706_v30  ;;  %v498_v29 = vld [vmem:[#allocation5 + $0xab0] sm:$0xff]  ;;  %v315_v24 = vld [vmem:[#allocation5 + $0x4f8] sm:$0xff] }
 0x1d0   :  { %3797 = vmatprep.subr.bf16.mxu1 %v5699_v60  ;;  %v622_v55 = vld [vmem:[#allocation5 + $0xe90] sm:$0xff]  ;;  %v5786_v60 = vcombine.low %v630_v16, %v634_v17  ;;  %v5651_v34 = vcombine.high %v494_v26, %v498_v29 }
 0x1d1   :  { %3755 = vmatpush1.bf16.msra.mxu0 %v5570_v37  ;;  %v626_v30 = vld [vmem:[#allocation5 + $0xeb0] sm:$0xff] }
 0x1d2   :  { %3756 = vmatprep.subr.bf16.mxu0 %v5691_v40  ;;  %v5779_v35 = vcombine.high %v622_v55, %v626_v30  ;;  %v486_v42 = vld [vmem:[#allocation5 + $0xa50] sm:$0xff]  ;;  %v5650_v40 = vcombine.low %v494_v26, %v498_v29  ;;  %v327_v29 = vld [vmem:[#allocation5 + $0x558] sm:$0xff] }
 0x1d3   :  { %3798 = vmatpush1.bf16.msra.mxu1 %v5698_v38  ;;  %v490_v36 = vld [vmem:[#allocation5 + $0xa70] sm:$0xff] }
 0x1d4   :  { %3799 = vmatprep.subr.bf16.mxu1 %v5819_v41  ;;  %v614_v37 = vld [vmem:[#allocation5 + $0xe50] sm:$0xff]  ;;  %v5778_v41 = vcombine.low %v622_v55, %v626_v30  ;;  %v5643_v44 = vcombine.high %v486_v42, %v490_v36  ;;  %v331_v55 = vld [vmem:[#allocation5 + $0x578] sm:$0xff] }
 0x1d5   :  { %3757 = vmatpush2.bf16.msra.mxu0 %v5690_v50  ;;  %v618_v38 = vld [vmem:[#allocation5 + $0xe70] sm:$0xff] }
 0x1d6   :  { %3758 = vmatprep.subr.bf16.mxu0 %v5683_v52  ;;  %v5771_v45 = vcombine.high %v614_v37, %v618_v38  ;;  %v478_v48 = vld [vmem:[#allocation5 + $0xa10] sm:$0xff]  ;;  %v5642_v52 = vcombine.low %v486_v42, %v490_v36 }
 0x1d7   :  { %3800 = vmatpush2.bf16.msra.mxu1 %v5818_v51  ;;  %v482_v49 = vld [vmem:[#allocation5 + $0xa30] sm:$0xff] }
 0x1d8   :  { %3801 = vmatprep.subr.bf16.mxu1 %v5811_v53  ;;  %v606_v50 = vld [vmem:[#allocation5 + $0xe10] sm:$0xff]  ;;  %v5770_v53 = vcombine.low %v614_v37, %v618_v38  ;;  %v5635_v56 = vcombine.high %v478_v48, %v482_v49  ;;  %v5485_v37 = vcombine.high %v327_v29, %v331_v55  ;;  %v191_v38 = vld [vmem:[#allocation5 + $0x118] sm:$0xff] }
 0x1d9   :  { %3759 = vmatpush2.bf16.msra.mxu0 %v5682_v27  ;;  %v610_v51 = vld [vmem:[#allocation5 + $0xe30] sm:$0xff]  ;;  %v343_v27 = vld [vmem:[#allocation5 + $0x5d8] sm:$0xff] }
 0x1da   :  { %3760 = vmatprep.subr.bf16.mxu0 %v5675_v62  ;;  %v5763_v57 = vcombine.high %v606_v50, %v610_v51  ;;  %v5634_v62 = vcombine.low %v478_v48, %v482_v49  ;;  %v5762_v1 = vcombine.low %v606_v50, %v610_v51  ;;  %v5484_v51 = vcombine.low %v327_v29, %v331_v55  ;;  %v159_v29 = vld [vmem:[#allocation5 + $0x18] sm:$0xff] }
 0x1db   :  { %3802 = vmatpush2.bf16.msra.mxu1 %v5810_v61  ;;  %v347_v61 = vld [vmem:[#allocation5 + $0x5f8] sm:$0xff] }
 0x1dc   :  { %3803 = vmatprep.subr.bf16.mxu1 %v5803_v0  ;;  %v680_v0 = vsub.s32 2, %v6652_v4  ;;  %v5501_v3 = vcombine.high %v343_v27, %v347_v61  ;;  %v5500_v16 = vcombine.low %v343_v27, %v347_v61  ;;  %v163_v55 = vld [vmem:[#allocation5 + $0x38] sm:$0xff] }
 0x1dd   :  { %3761 = vmatpush2.bf16.msra.mxu0 %v5674_v6  ;;  %v211_v6 = vld [vmem:[#allocation5 + $0x1b8] sm:$0xff] }
 0x1de   :  { %3762 = vmatprep.subr.bf16.mxu0 %v5667_v8  ;;  %v339_v8 = vld [vmem:[#allocation5 + $0x5b8] sm:$0xff]  ;;  %v5365_v17 = vcombine.high %v207_v5, %v211_v6 }
 0x1df   :  { %3804 = vmatpush2.bf16.msra.mxu1 %v5802_v7  ;;  %v335_v7 = vld [vmem:[#allocation5 + $0x598] sm:$0xff] }
 0x1e0   :  { %3805 = vmatprep.subr.bf16.mxu1 %v5795_v10  ;;  %v681_v10 = vrot.slane %v6655_v15, %v680_v0  ;;  %v175_v0 = vld [vmem:[#allocation5 + $0x98] sm:$0xff] }
 0x1e1   :  { %3763 = vmatpush2.bf16.msra.mxu0 %v5666_v18  ;;  %v6692_v18 = vpop.f32.mrf.mxu1 }
 0x1e2   :  { %3764 = vmatprep.subr.bf16.mxu0 %v5659_v20  ;;  %v199_v20 = vld [vmem:[#allocation5 + $0x158] sm:$0xff] }
 0x1e3   :  { %3806 = vmatpush2.bf16.msra.mxu1 %v5794_v19  ;;  %v5493_v19 = vcombine.high %v335_v7, %v339_v8 }
 0x1e4   :  { %3807 = vmatprep.subr.bf16.mxu1 %v5787_v22  ;;  %v203_v22 = vld [vmem:[#allocation5 + $0x178] sm:$0xff] }
 0x1e5   :  { %3765 = vmatpush2.bf16.msra.mxu0 %v5658_v31  ;;  %v5364_v31 = vcombine.low %v207_v5, %v211_v6  ;;  %v5356_v49 = vcombine.low %v199_v20, %v203_v22 }
 0x1e6   :  { %3766 = vmatprep.subr.bf16.mxu0 %v5651_v34  ;;  %v5492_v34 = vcombine.low %v335_v7, %v339_v8 }
 0x1e7   :  { %3808 = vmatpush2.bf16.msra.mxu1 %v5786_v60 }
 0x1e8   :  { %3809 = vmatprep.subr.bf16.mxu1 %v5779_v35  ;;  %v5357_v35 = vcombine.high %v199_v20, %v203_v22 }
 0x1e9   :  { %3767 = vmatpush2.bf16.msra.mxu0 %v5650_v40  ;;  %v195_v40 = vld [vmem:[#allocation5 + $0x138] sm:$0xff] }
 0x1ea   :  { %3768 = vmatprep.subr.bf16.mxu0 %v5643_v44  ;;  %v319_v44 = vld [vmem:[#allocation5 + $0x518] sm:$0xff]  ;;  %v5348_v27 = vcombine.low %v191_v38, %v195_v40 }
 0x1eb   :  { %3810 = vmatpush2.bf16.msra.mxu1 %v5778_v41 }
 0x1ec   :  { %3811 = vmatprep.subr.bf16.mxu1 %v5771_v45  ;;  %v323_v45 = vld [vmem:[#allocation5 + $0x538] sm:$0xff] }
 0x1ed   :  { %3769 = vmatpush2.bf16.msra.mxu0 %v5642_v52  ;;  %v5349_v52 = vcombine.high %v191_v38, %v195_v40  ;;  %v279_v38 = vld [vmem:[#allocation5 + $0x3d8] sm:$0xff] }
 0x1ee   :  { %3770 = vmatprep.subr.bf16.mxu0 %v5635_v56  ;;  %v5477_v56 = vcombine.high %v319_v44, %v323_v45  ;;  %v283_v40 = vld [vmem:[#allocation5 + $0x3f8] sm:$0xff] }
 0x1ef   :  { %3812 = vmatpush2.bf16.msra.mxu1 %v5770_v53 }
 0x1f0   :  { %3813 = vmatprep.subr.bf16.mxu1 %v5763_v57  ;;  %v183_v57 = vld [vmem:[#allocation5 + $0xd8] sm:$0xff] }
 0x1f1   :  { %3771 = vmatpush2.bf16.msra.mxu0 %v5634_v62  ;;  %v5341_v61 = vcombine.high %v183_v57, %v187_v23  ;;  %v5340_v5 = vcombine.low %v183_v57, %v187_v23  ;;  %v403_v57 = vld [vmem:[#allocation5 + $0x7b8] sm:$0xff]  ;;  %v5436_v23 = vcombine.low %v279_v38, %v283_v40 }
 0x1f2   :  { %3826 = vmatprep.subr.bf16.mxu0 %v5373_v2  ;;  %v303_v2 = vld [vmem:[#allocation5 + $0x498] sm:$0xff] }
 0x1f3   :  { %3814 = vmatpush2.bf16.msra.mxu1 %v5762_v1  ;;  %v179_v1 = vld [vmem:[#allocation5 + $0xb8] sm:$0xff] }
 0x1f4   :  { %3869 = vmatprep.subr.bf16.mxu1 %v5501_v3  ;;  %v3516_v26 = vpop.f32.mrf.mxu0  ;;  %3773 = vmatmul.mubr.bf16.vlgmr.msra.gmra.mxu0 %v6638_v46  ;;  %v307_v3 = vld [vmem:[#allocation5 + $0x4b8] sm:$0xff]  ;;  %v5333_v7 = vcombine.high %v175_v0, %v179_v1 }
 0x1f5   :  { %v3517_v30 = vadd.f32 %v3516_v26, %v681_v10  ;;  %3827 = vmatpush1.bf16.msra.mxu0 %v5372_v11  ;;  %3858 = vmatprep.mubr.bf16.mxu0 %v6596_v58  ;;  %v311_v58 = vld [vmem:[#allocation5 + $0x4d8] sm:$0xff]  ;;  %v5461_v8 = vcombine.high %v303_v2, %v307_v3  ;;  %v5460_v20 = vcombine.low %v303_v2, %v307_v3 }
 0x1f6   :  { %v3559_v15 = vpop.f32.mrf.mxu1  ;;  %3816 = vmatmul.mubr.bf16.vlgmr.msra.gmra.mxu1 %v6642_v47  ;;  %v6696_v60 = vpop.f32.mrf.mxu0  ;;  %3828 = vmatprep.subr.bf16.mxu0 %v5365_v17  ;;  %v5469_v62 = vcombine.high %v311_v58, %v315_v24  ;;  %v5468_v6 = vcombine.low %v311_v58, %v315_v24  ;;  %v171_v11 = vld [vmem:[#allocation5 + $0x78] sm:$0xff] }
 0x1f7   :  { %3870 = vmatpush1.bf16.msra.mxu1 %v5500_v16  ;;  %v6698_v42 = vadd.f32 %v3559_v15, %v3517_v30  ;;  %3901 = vmatprep.mubr.bf16.mxu1 %v6604_v63  ;;  %v5476_v63 = vcombine.low %v319_v44, %v323_v45  ;;  %v295_v16 = vld [vmem:[#allocation5 + $0x458] sm:$0xff]  ;;  %v5316_v45 = vcombine.low %v159_v29, %v163_v55 }
 0x1f8   :  { %v6700_v36 = vpop.f32.mrf.mxu1  ;;  %3871 = vmatprep.subr.bf16.mxu1 %v5493_v19  ;;  %v3520_v41 = vpop.f32.mrf.mxu0  ;;  %v299_v17 = vld [vmem:[#allocation5 + $0x478] sm:$0xff]  ;;  %v5332_v19 = vcombine.low %v175_v0, %v179_v1 }
 0x1f9   :  { %v3521_v48 = vadd.f32 %v3520_v41, %v681_v10  ;;  %3829 = vmatpush1.bf16.msra.mxu0 %v5364_v31  ;;  %v167_v10 = vld [vmem:[#allocation5 + $0x58] sm:$0xff]  ;;  %v5453_v26 = vcombine.high %v295_v16, %v299_v17 }
 0x1fa   :  { %v3563_v50 = vpop.f32.mrf.mxu1  ;;  %3830 = vmatprep.subr.bf16.mxu0 %v5357_v35  ;;  %v5325_v22 = vcombine.high %v167_v10, %v171_v11  ;;  %v287_v30 = vld [vmem:[#allocation5 + $0x418] sm:$0xff]  ;;  %v5324_v31 = vcombine.low %v167_v10, %v171_v11  ;;  %v5317_v35 = vcombine.high %v159_v29, %v163_v55 }
 0x1fb   :  { %3872 = vmatpush1.bf16.msra.mxu1 %v5492_v34  ;;  %v6704_v53 = vadd.f32 %v3563_v50, %v3521_v48  ;;  %v291_v15 = vld [vmem:[#allocation5 + $0x438] sm:$0xff]  ;;  %v5452_v34 = vcombine.low %v295_v16, %v299_v17 }
 0x1fc   :  { %3873 = vmatprep.subr.bf16.mxu1 %v5485_v37  ;;  %v5445_v37 = vcombine.high %v287_v30, %v291_v15  ;;  %v407_v41 = vld [vmem:[#allocation5 + $0x7d8] sm:$0xff]  ;;  %v5444_v48 = vcombine.low %v287_v30, %v291_v15 }
 0x1fd   :  { %3831 = vmatpush1.bf16.msra.mxu0 %v5356_v49  ;;  %v411_v44 = vld [vmem:[#allocation5 + $0x7f8] sm:$0xff]  ;;  %v5437_v49 = vcombine.high %v279_v38, %v283_v40 }
 0x1fe   :  { %3832 = vmatprep.subr.bf16.mxu0 %v5349_v52  ;;  %v5565_v50 = vcombine.high %v407_v41, %v411_v44  ;;  %v275_v52 = vld [vmem:[#allocation5 + $0x3b8] sm:$0xff]  ;;  %v5564_v58 = vcombine.low %v407_v41, %v411_v44 }
 0x1ff   :  { %3874 = vmatpush1.bf16.msra.mxu1 %v5484_v51  ;;  %v271_v51 = vld [vmem:[#allocation5 + $0x398] sm:$0xff] }
 0x200   :  { %3875 = vmatprep.subr.bf16.mxu1 %v5477_v56  ;;  %v399_v56 = vld [vmem:[#allocation5 + $0x798] sm:$0xff]  ;;  %v5429_v24 = vcombine.high %v271_v51, %v275_v52  ;;  %v5428_v1 = vcombine.low %v271_v51, %v275_v52 }
 0x201   :  { %3833 = vmatpush1.bf16.msra.mxu0 %v5348_v27  ;;  %v5557_v27 = vcombine.high %v399_v56, %v403_v57  ;;  %v395_v0 = vld [vmem:[#allocation5 + $0x778] sm:$0xff]  ;;  %v5556_v2 = vcombine.low %v399_v56, %v403_v57 }
 0x202   :  { %3834 = vmatprep.subr.bf16.mxu0 %v5341_v61  ;;  %v267_v61 = vld [vmem:[#allocation5 + $0x378] sm:$0xff] }
 0x203   :  { %3876 = vmatpush1.bf16.msra.mxu1 %v5476_v63  ;;  %v263_v63 = vld [vmem:[#allocation5 + $0x358] sm:$0xff] }
 0x204   :  { %3877 = vmatprep.subr.bf16.mxu1 %v5469_v62  ;;  %v391_v62 = vld [vmem:[#allocation5 + $0x758] sm:$0xff]  ;;  %v5421_v3 = vcombine.high %v263_v63, %v267_v61  ;;  %v5420_v11 = vcombine.low %v263_v63, %v267_v61 }
 0x205   :  { %3835 = vmatpush1.bf16.msra.mxu0 %v5340_v5  ;;  %v5549_v5 = vcombine.high %v391_v62, %v395_v0  ;;  %v387_v10 = vld [vmem:[#allocation5 + $0x738] sm:$0xff]  ;;  %v5548_v16 = vcombine.low %v391_v62, %v395_v0 }
 0x206   :  { %3836 = vmatprep.subr.bf16.mxu0 %v5333_v7  ;;  %v259_v7 = vld [vmem:[#allocation5 + $0x338] sm:$0xff] }
 0x207   :  { %3878 = vmatpush1.bf16.msra.mxu1 %v5468_v6  ;;  %v255_v6 = vld [vmem:[#allocation5 + $0x318] sm:$0xff] }
 0x208   :  { %3879 = vmatprep.subr.bf16.mxu1 %v5461_v8  ;;  %v383_v8 = vld [vmem:[#allocation5 + $0x718] sm:$0xff]  ;;  %v5413_v17 = vcombine.high %v255_v6, %v259_v7  ;;  %v5412_v55 = vcombine.low %v255_v6, %v259_v7 }
 0x209   :  { %3837 = vmatpush1.bf16.msra.mxu0 %v5332_v19  ;;  %v5541_v19 = vcombine.high %v383_v8, %v387_v10  ;;  %v379_v29 = vld [vmem:[#allocation5 + $0x6f8] sm:$0xff]  ;;  %v5540_v30 = vcombine.low %v383_v8, %v387_v10 }
 0x20a   :  { %3838 = vmatprep.subr.bf16.mxu0 %v5325_v22  ;;  %v251_v22 = vld [vmem:[#allocation5 + $0x2f8] sm:$0xff] }
 0x20b   :  { %3880 = vmatpush1.bf16.msra.mxu1 %v5460_v20  ;;  %v247_v20 = vld [vmem:[#allocation5 + $0x2d8] sm:$0xff] }
 0x20c   :  { %3881 = vmatprep.subr.bf16.mxu1 %v5453_v26  ;;  %v375_v26 = vld [vmem:[#allocation5 + $0x6d8] sm:$0xff]  ;;  %v5405_v15 = vcombine.high %v247_v20, %v251_v22  ;;  %v5404_v40 = vcombine.low %v247_v20, %v251_v22 }
 0x20d   :  { %3839 = vmatpush1.bf16.msra.mxu0 %v5324_v31  ;;  %v5533_v31 = vcombine.high %v375_v26, %v379_v29  ;;  %v371_v38 = vld [vmem:[#allocation5 + $0x6b8] sm:$0xff]  ;;  %v5532_v41 = vcombine.low %v375_v26, %v379_v29  ;;  %v6706_v26 = vpop.f32.mrf.mxu0 }
 0x20e   :  { %3840 = vmatprep.subr.bf16.mxu0 %v5317_v35  ;;  %v243_v35 = vld [vmem:[#allocation5 + $0x2b8] sm:$0xff] }
 0x20f   :  { %3882 = vmatpush1.bf16.msra.mxu1 %v5452_v34  ;;  %v239_v34 = vld [vmem:[#allocation5 + $0x298] sm:$0xff] }
 0x210   :  { %3883 = vmatprep.subr.bf16.mxu1 %v5445_v37  ;;  %v367_v37 = vld [vmem:[#allocation5 + $0x698] sm:$0xff]  ;;  %v5397_v44 = vcombine.high %v239_v34, %v243_v35  ;;  %v5396_v52 = vcombine.low %v239_v34, %v243_v35 }
 0x211   :  { %3841 = vmatpush1.bf16.msra.mxu0 %v5316_v45  ;;  %v5525_v45 = vcombine.high %v367_v37, %v371_v38  ;;  %v363_v51 = vld [vmem:[#allocation5 + $0x678] sm:$0xff]  ;;  %v5524_v56 = vcombine.low %v367_v37, %v371_v38 }
 0x212   :  { %3842 = vmatprep.subr.bf16.mxu0 %v5437_v49  ;;  %v235_v49 = vld [vmem:[#allocation5 + $0x278] sm:$0xff] }
 0x213   :  { %3884 = vmatpush1.bf16.msra.mxu1 %v5444_v48  ;;  %v231_v48 = vld [vmem:[#allocation5 + $0x258] sm:$0xff] }
 0x214   :  { %3885 = vmatprep.subr.bf16.mxu1 %v5565_v50  ;;  %v359_v50 = vld [vmem:[#allocation5 + $0x658] sm:$0xff]  ;;  %v5389_v57 = vcombine.high %v231_v48, %v235_v49  ;;  %v5388_v61 = vcombine.low %v231_v48, %v235_v49 }
 0x215   :  { %3843 = vmatpush2.bf16.msra.mxu0 %v5436_v23  ;;  %v5517_v23 = vcombine.high %v359_v50, %v363_v51  ;;  %v355_v63 = vld [vmem:[#allocation5 + $0x638] sm:$0xff]  ;;  %v5516_v62 = vcombine.low %v359_v50, %v363_v51 }
 0x216   :  { %3844 = vmatprep.subr.bf16.mxu0 %v5429_v24  ;;  %v227_v24 = vld [vmem:[#allocation5 + $0x238] sm:$0xff] }
 0x217   :  { %3886 = vmatpush2.bf16.msra.mxu1 %v5564_v58  ;;  %v223_v58 = vld [vmem:[#allocation5 + $0x218] sm:$0xff] }
 0x218   :  { %3887 = vmatprep.subr.bf16.mxu1 %v5557_v27  ;;  %v351_v27 = vld [vmem:[#allocation5 + $0x618] sm:$0xff]  ;;  %v5381_v0 = vcombine.high %v223_v58, %v227_v24  ;;  %v5380_v7 = vcombine.low %v223_v58, %v227_v24 }
 0x219   :  { %3845 = vmatpush2.bf16.msra.mxu0 %v5428_v1  ;;  %v5509_v1 = vcombine.high %v351_v27, %v355_v63  ;;  %v603_v6 = vld [vmem:[#allocation5 + $0xdf8] sm:$0xff]  ;;  %v5508_v8 = vcombine.low %v351_v27, %v355_v63 }
 0x21a   :  { %3846 = vmatprep.subr.bf16.mxu0 %v5421_v3  ;;  %v475_v3 = vld [vmem:[#allocation5 + $0x9f8] sm:$0xff] }
 0x21b   :  { %3888 = vmatpush2.bf16.msra.mxu1 %v5556_v2  ;;  %v471_v2 = vld [vmem:[#allocation5 + $0x9d8] sm:$0xff] }
 0x21c   :  { %3889 = vmatprep.subr.bf16.mxu1 %v5549_v5  ;;  %v599_v5 = vld [vmem:[#allocation5 + $0xdd8] sm:$0xff]  ;;  %v5629_v10 = vcombine.high %v471_v2, %v475_v3  ;;  %v5628_v22 = vcombine.low %v471_v2, %v475_v3 }
 0x21d   :  { %3847 = vmatpush2.bf16.msra.mxu0 %v5420_v11  ;;  %v5757_v11 = vcombine.high %v599_v5, %v603_v6  ;;  %v595_v20 = vld [vmem:[#allocation5 + $0xdb8] sm:$0xff]  ;;  %v5756_v29 = vcombine.low %v599_v5, %v603_v6 }
 0x21e   :  { %3848 = vmatprep.subr.bf16.mxu0 %v5413_v17  ;;  %v467_v17 = vld [vmem:[#allocation5 + $0x9b8] sm:$0xff] }
 0x21f   :  { %3890 = vmatpush2.bf16.msra.mxu1 %v5548_v16  ;;  %v463_v16 = vld [vmem:[#allocation5 + $0x998] sm:$0xff] }
 0x220   :  { %3891 = vmatprep.subr.bf16.mxu1 %v5541_v19  ;;  %v591_v19 = vld [vmem:[#allocation5 + $0xd98] sm:$0xff] }
 0x221   :  { %3849 = vmatpush2.bf16.msra.mxu0 %v5412_v55  ;;  %v5621_v55 = vcombine.high %v463_v16, %v467_v17  ;;  %v459_v34 = vld [vmem:[#allocation5 + $0x978] sm:$0xff]  ;;  %v5748_v48 = vcombine.low %v591_v19, %v595_v20 }
 0x222   :  { %3850 = vmatprep.subr.bf16.mxu0 %v5405_v15  ;;  %v5749_v15 = vcombine.high %v591_v19, %v595_v20  ;;  %v583_v37 = vld [vmem:[#allocation5 + $0xd58] sm:$0xff] }
 0x223   :  { %3892 = vmatpush2.bf16.msra.mxu1 %v5540_v30  ;;  %v6708_v30 = vpop.f32.mrf.mxu1  ;;  %v587_v38 = vld [vmem:[#allocation5 + $0xd78] sm:$0xff] }
 0x224   :  { %3893 = vmatprep.subr.bf16.mxu1 %v5533_v31  ;;  %v455_v31 = vld [vmem:[#allocation5 + $0x958] sm:$0xff]  ;;  %v5740_v27 = vcombine.low %v583_v37, %v587_v38 }
 0x225   :  { %3851 = vmatpush2.bf16.msra.mxu0 %v5404_v40  ;;  %v5613_v49 = vcombine.high %v455_v31, %v459_v34  ;;  %v5612_v58 = vcombine.low %v455_v31, %v459_v34  ;;  %v571_v2 = vld [vmem:[#allocation5 + $0xcf8] sm:$0xff] }
 0x226   :  { %3852 = vmatprep.subr.bf16.mxu0 %v5397_v44  ;;  %v5620_v44 = vcombine.low %v463_v16, %v467_v17  ;;  %v559_v16 = vld [vmem:[#allocation5 + $0xc98] sm:$0xff] }
 0x227   :  { %3894 = vmatpush2.bf16.msra.mxu1 %v5532_v41  ;;  %v563_v17 = vld [vmem:[#allocation5 + $0xcb8] sm:$0xff] }
 0x228   :  { %3895 = vmatprep.subr.bf16.mxu1 %v5525_v45  ;;  %v551_v31 = vld [vmem:[#allocation5 + $0xc58] sm:$0xff] }
 0x229   :  { %3853 = vmatpush2.bf16.msra.mxu0 %v5396_v52  ;;  %v447_v52 = vld [vmem:[#allocation5 + $0x918] sm:$0xff] }
 0x22a   :  { %3854 = vmatprep.subr.bf16.mxu0 %v5389_v57  ;;  %v575_v57 = vld [vmem:[#allocation5 + $0xd18] sm:$0xff] }
 0x22b   :  { %3896 = vmatpush2.bf16.msra.mxu1 %v5524_v56  ;;  %v451_v56 = vld [vmem:[#allocation5 + $0x938] sm:$0xff] }
 0x22c   :  { %3897 = vmatprep.subr.bf16.mxu1 %v5517_v23  ;;  %v5605_v63 = vcombine.high %v447_v52, %v451_v56  ;;  %v555_v34 = vld [vmem:[#allocation5 + $0xc78] sm:$0xff] }
 0x22d   :  { %3855 = vmatpush2.bf16.msra.mxu0 %v5388_v61 }
 0x22e   :  { %3856 = vmatprep.subr.bf16.mxu0 %v5381_v0  ;;  %v439_v0 = vld [vmem:[#allocation5 + $0x8d8] sm:$0xff] }
 0x22f   :  { %3898 = vmatpush2.bf16.msra.mxu1 %v5516_v62 }
 0x230   :  { %3899 = vmatprep.subr.bf16.mxu1 %v5509_v1  ;;  %v443_v1 = vld [vmem:[#allocation5 + $0x8f8] sm:$0xff] }
 0x231   :  { %3857 = vmatpush2.bf16.msra.mxu0 %v5380_v7  ;;  %v5597_v6 = vcombine.high %v439_v0, %v443_v1  ;;  %v5596_v19 = vcombine.low %v439_v0, %v443_v1  ;;  %v655_v0 = vld [vmem:[#allocation5 + $0xf98] sm:$0xff] }
 0x232   :  { %3912 = vmatprep.subr.bf16.mxu0 %v5629_v10  ;;  %v431_v10 = vld [vmem:[#allocation5 + $0x898] sm:$0xff] }
 0x233   :  { %3900 = vmatpush2.bf16.msra.mxu1 %v5508_v8  ;;  %v659_v1 = vld [vmem:[#allocation5 + $0xfb8] sm:$0xff] }
 0x234   :  { %3955 = vmatprep.subr.bf16.mxu1 %v5757_v11  ;;  %v3602_v35 = vpop.f32.mrf.mxu0  ;;  %3859 = vmatmul.mubr.bf16.vlgmr.msra.gmra.mxu0 %v6610_v21  ;;  %v5741_v21 = vcombine.high %v583_v37, %v587_v38  ;;  %v435_v11 = vld [vmem:[#allocation5 + $0x8b8] sm:$0xff]  ;;  %v5716_v37 = vcombine.low %v559_v16, %v563_v17 }
 0x235   :  { %v3603_v40 = vadd.f32 %v3602_v35, %v6698_v42  ;;  %3913 = vmatpush1.bf16.msra.mxu0 %v5628_v22  ;;  %3944 = vmatprep.mubr.bf16.mxu0 %v6626_v32  ;;  %v567_v32 = vld [vmem:[#allocation5 + $0xcd8] sm:$0xff]  ;;  %v5589_v22 = vcombine.high %v431_v10, %v435_v11  ;;  %v5588_v35 = vcombine.low %v431_v10, %v435_v11 }
 0x236   :  { %v3645_v41 = vpop.f32.mrf.mxu1  ;;  %3902 = vmatmul.mubr.bf16.vlgmr.msra.gmra.mxu1 %v6618_v25  ;;  %v6713_v45 = vpop.f32.mrf.mxu0  ;;  %3914 = vmatprep.subr.bf16.mxu0 %v5621_v55  ;;  %v579_v25 = vld [vmem:[#allocation5 + $0xd38] sm:$0xff]  ;;  %v5725_v8 = vcombine.high %v567_v32, %v571_v2  ;;  %v5724_v20 = vcombine.low %v567_v32, %v571_v2  ;;  %v5812_v11 = vcombine.low %v655_v0, %v659_v1 }
 0x237   :  { %3956 = vmatpush1.bf16.msra.mxu1 %v5756_v29  ;;  %v3646_v50 = vadd.f32 %v3645_v41, %v3603_v40  ;;  %3987 = vmatprep.mubr.bf16.mxu1 %v6631_v33  ;;  %v5733_v62 = vcombine.high %v575_v57, %v579_v25  ;;  %v5604_v33 = vcombine.low %v447_v52, %v451_v56  ;;  %v423_v55 = vld [vmem:[#allocation5 + $0x858] sm:$0xff] }
 0x238   :  { %v6715_v51 = vpop.f32.mrf.mxu1  ;;  %3957 = vmatprep.subr.bf16.mxu1 %v5749_v15  ;;  %v3606_v42 = vpop.f32.mrf.mxu0  ;;  %v5717_v29 = vcombine.high %v559_v16, %v563_v17  ;;  %v427_v15 = vld [vmem:[#allocation5 + $0x878] sm:$0xff]  ;;  %v5709_v40 = vcombine.high %v551_v31, %v555_v34 }
 0x239   :  { %v3607_v23 = vadd.f32 %v3606_v42, %v6704_v53  ;;  %3915 = vmatpush1.bf16.msra.mxu0 %v5620_v44  ;;  %v4000_v3 = vmax.f32 %v3646_v50, 0.0  ;;  %v5732_v53 = vcombine.low %v575_v57, %v579_v25  ;;  %v5581_v38 = vcombine.high %v423_v55, %v427_v15  ;;  %v415_v41 = vld [vmem:[#allocation5 + $0x818] sm:$0xff] }
 0x23a   :  { %v3649_v24 = vpop.f32.mrf.mxu1  ;;  %3916 = vmatprep.subr.bf16.mxu0 %v5613_v49  ;;  %v419_v44 = vld [vmem:[#allocation5 + $0x838] sm:$0xff]  ;;  %v5580_v50 = vcombine.low %v423_v55, %v427_v15 }
 0x23b   :  { %3958 = vmatpush1.bf16.msra.mxu1 %v5748_v48  ;;  %v3650_v61 = vadd.f32 %v3649_v24, %v3607_v23  ;;  %v543_v48 = vld [vmem:[#allocation5 + $0xc18] sm:$0xff]  ;;  %v5573_v52 = vcombine.high %v415_v41, %v419_v44 }
 0x23c   :  { %3959 = vmatprep.subr.bf16.mxu1 %v5741_v21  ;;  %v547_v49 = vld [vmem:[#allocation5 + $0xc38] sm:$0xff]  ;;  %v5708_v21 = vcombine.low %v551_v31, %v555_v34 }
 0x23d   :  { %v4008_v5 = vmax.f32 %v3650_v61, 0.0  ;;  %3917 = vmatpush1.bf16.msra.mxu0 %v5612_v58  ;;  %v5701_v56 = vcombine.high %v543_v48, %v547_v49  ;;  %v535_v42 = vld [vmem:[#allocation5 + $0xbd8] sm:$0xff]  ;;  %v5572_v58 = vcombine.low %v415_v41, %v419_v44  ;;  %v5700_v24 = vcombine.low %v543_v48, %v547_v49 }
 0x23e   :  { %3918 = vmatprep.subr.bf16.mxu0 %v5605_v63  ;;  %v539_v57 = vld [vmem:[#allocation5 + $0xbf8] sm:$0xff]  ;;  %v684_v44 = vsub.s32 3, %v6652_v4 }
 0x23f   :  { %3960 = vmatpush1.bf16.msra.mxu1 %v5740_v27  ;;  %v6720_v7 = vpack.c.bf16 %v4008_v5, %v4000_v3  ;;  %v663_v25 = vld [vmem:[#allocation5 + $0xfd8] sm:$0xff]  ;;  %v5693_v27 = vcombine.high %v535_v42, %v539_v57  ;;  %v5692_v32 = vcombine.low %v535_v42, %v539_v57  ;;  %v5813_v5 = vcombine.high %v655_v0, %v659_v1  ;;  %v6724_v42 = vld [vmem:[#allocation7] sm:$0xff] }
 0x240   :  { %3961 = vmatprep.subr.bf16.mxu1 %v5733_v62  ;;  %v667_v23 = vld [vmem:[#allocation5 + $0xff8] sm:$0xff] }
 0x241   :  { %3919 = vmatpush1.bf16.msra.mxu0 %v5604_v33  ;;  %v5821_v63 = vcombine.high %v663_v25, %v667_v23  ;;  %v527_v61 = vld [vmem:[#allocation5 + $0xb98] sm:$0xff]  ;;  %v5820_v2 = vcombine.low %v663_v25, %v667_v23 }
 0x242   :  { %3920 = vmatprep.subr.bf16.mxu0 %v5597_v6  ;;  %v531_v62 = vld [vmem:[#allocation5 + $0xbb8] sm:$0xff] }
 0x243   :  { %3962 = vmatpush1.bf16.msra.mxu1 %v5732_v53  ;;  %v5685_v3 = vcombine.high %v527_v61, %v531_v62  ;;  %v519_v33 = vld [vmem:[#allocation5 + $0xb58] sm:$0xff]  ;;  %v5684_v10 = vcombine.low %v527_v61, %v531_v62 }
 0x244   :  { %3963 = vmatprep.subr.bf16.mxu1 %v5725_v8  ;;  %v523_v53 = vld [vmem:[#allocation5 + $0xb78] sm:$0xff] }
 0x245   :  { %3921 = vmatpush1.bf16.msra.mxu0 %v5596_v19  ;;  %v647_v6 = vld [vmem:[#allocation5 + $0xf58] sm:$0xff]  ;;  %v5677_v16 = vcombine.high %v519_v33, %v523_v53  ;;  %v5676_v55 = vcombine.low %v519_v33, %v523_v53 }
 0x246   :  { %3922 = vmatprep.subr.bf16.mxu0 %v5589_v22  ;;  %v651_v8 = vld [vmem:[#allocation5 + $0xf78] sm:$0xff] }
 0x247   :  { %3964 = vmatpush1.bf16.msra.mxu1 %v5724_v20  ;;  %v5805_v17 = vcombine.high %v647_v6, %v651_v8  ;;  %v511_v19 = vld [vmem:[#allocation5 + $0xb18] sm:$0xff]  ;;  %v5804_v15 = vcombine.low %v647_v6, %v651_v8  ;;  %v3608_v6 = vpop.f32.mrf.mxu0 }
 0x248   :  { %3965 = vmatprep.subr.bf16.mxu1 %v5717_v29  ;;  %v515_v20 = vld [vmem:[#allocation5 + $0xb38] sm:$0xff] }
 0x249   :  { %3923 = vmatpush1.bf16.msra.mxu0 %v5588_v35  ;;  %v639_v22 = vld [vmem:[#allocation5 + $0xf18] sm:$0xff]  ;;  %v5669_v31 = vcombine.high %v511_v19, %v515_v20  ;;  %v5668_v48 = vcombine.low %v511_v19, %v515_v20 }
 0x24a   :  { %3924 = vmatprep.subr.bf16.mxu0 %v5581_v38  ;;  %v643_v29 = vld [vmem:[#allocation5 + $0xf38] sm:$0xff]  ;;  %v676_v38 = vsub.s32 1, %v6652_v4 }
 0x24b   :  { %3966 = vmatpush1.bf16.msra.mxu1 %v5716_v37  ;;  %v5797_v34 = vcombine.high %v639_v22, %v643_v29  ;;  %v503_v35 = vld [vmem:[#allocation5 + $0xad8] sm:$0xff]  ;;  %v5796_v49 = vcombine.low %v639_v22, %v643_v29 }
 0x24c   :  { %3967 = vmatprep.subr.bf16.mxu1 %v5709_v40  ;;  %v507_v37 = vld [vmem:[#allocation5 + $0xaf8] sm:$0xff]  ;;  %v677_v57 = vrot.slane %v6724_v42, %v676_v38 }
 0x24d   :  { %3925 = vmatpush1.bf16.msra.mxu0 %v5580_v50  ;;  %v631_v40 = vld [vmem:[#allocation5 + $0xed8] sm:$0xff]  ;;  %v5661_v50 = vcombine.high %v503_v35, %v507_v37 }
 0x24e   :  { %3926 = vmatprep.subr.bf16.mxu0 %v5573_v52  ;;  %v635_v41 = vld [vmem:[#allocation5 + $0xef8] sm:$0xff] }
 0x24f   :  { %3968 = vmatpush1.bf16.msra.mxu1 %v5708_v21  ;;  %v5789_v21 = vcombine.high %v631_v40, %v635_v41  ;;  %v495_v52 = vld [vmem:[#allocation5 + $0xa98] sm:$0xff] }
 0x250   :  { %3969 = vmatprep.subr.bf16.mxu1 %v5701_v56  ;;  %v499_v56 = vld [vmem:[#allocation5 + $0xab8] sm:$0xff] }
 0x251   :  { %3927 = vmatpush1.bf16.msra.mxu0 %v5572_v58  ;;  %v623_v25 = vld [vmem:[#allocation5 + $0xe98] sm:$0xff]  ;;  %v685_v58 = vrot.slane %v6724_v42, %v684_v44  ;;  %v5653_v61 = vcombine.high %v495_v52, %v499_v56  ;;  %v5652_v53 = vcombine.low %v495_v52, %v499_v56  ;;  %v6062_v52 = vld [vmem:[#allocation8 + $0x64] ss:$8 sps:$4 sm:$0xff]  }
 0x252   :  { %3928 = vmatprep.subr.bf16.mxu0 %v5693_v27  ;;  %v627_v23 = vld [vmem:[#allocation5 + $0xeb8] sm:$0xff]  ;;  %v3351_v27 = vadd.f32 %v6672_v9, %v677_v57  ;;  %v6065_v56 = vld [vmem:[#allocation8 + $0x164] ss:$8 sps:$4 sm:$0xff]  }
 0x253   :  { %3970 = vmatpush1.bf16.msra.mxu1 %v5700_v24  ;;  %v5660_v24 = vcombine.low %v503_v35, %v507_v37  ;;  %v3523_v62 = vadd.f32 %v6706_v26, %v685_v58  ;;  %v5781_v0 = vcombine.high %v623_v25, %v627_v23  ;;  %v487_v1 = vld [vmem:[#allocation5 + $0xa58] sm:$0xff]  ;;  %v3519_v33 = vadd.f32 %v6696_v60, %v685_v58 }
 0x254   :  { %3971 = vmatprep.subr.bf16.mxu1 %v5821_v63  ;;  %v5788_v63 = vcombine.low %v631_v40, %v635_v41  ;;  %v3394_v9 = vadd.f32 %v6674_v12, %v3351_v27  ;;  %v5780_v8 = vcombine.low %v623_v25, %v627_v23  ;;  %v607_v60 = vld [vmem:[#allocation5 + $0xe18] sm:$0xff]  ;;  %v6063_v25 = vld [vmem:[#allocation8 + $0x160] ss:$8 sps:$4 sm:$0xff]  }
 0x255   :  { %3929 = vmatpush2.bf16.msra.mxu0 %v5692_v32  ;;  %v491_v32 = vld [vmem:[#allocation5 + $0xa78] sm:$0xff]  ;;  %v3566_v26 = vadd.f32 %v6708_v30, %v3523_v62  ;;  %v3562_v22 = vadd.f32 %v6700_v36, %v3519_v33  ;;  %v6087_v33 = vld [vmem:[#allocation8 + $0x120] ss:$8 sps:$4 sm:$0xff]  }
 0x256   :  { %3930 = vmatprep.subr.bf16.mxu0 %v5685_v3  ;;  %v615_v3 = vld [vmem:[#allocation5 + $0xe58] sm:$0xff]  ;;  %v3437_v19 = vadd.f32 %v6690_v14, %v3394_v9  ;;  %v5644_v29 = vcombine.low %v487_v1, %v491_v32  ;;  %v3651_v14 = vpop.f32.mrf.mxu1 }
 0x257   :  { %3972 = vmatpush2.bf16.msra.mxu1 %v5820_v2  ;;  %v3347_v2 = vadd.f32 %v6662_v39, %v677_v57  ;;  %v611_v20 = vld [vmem:[#allocation5 + $0xe38] sm:$0xff]  ;;  %v3609_v12 = vadd.f32 %v3608_v6, %v3566_v26  ;;  %v6101_v26 = vld [vmem:[#allocation8 + $0x104] ss:$8 sps:$4 sm:$0xff]  }
 0x258   :  { %3973 = vmatprep.subr.bf16.mxu1 %v5813_v5  ;;  %v619_v5 = vld [vmem:[#allocation5 + $0xe78] sm:$0xff]  ;;  %v5764_v40 = vcombine.low %v607_v60, %v611_v20 }
 0x259   :  { %3931 = vmatpush2.bf16.msra.mxu0 %v5684_v10  ;;  %v5645_v10 = vcombine.high %v487_v1, %v491_v32  ;;  %v3390_v39 = vadd.f32 %v6666_v43, %v3347_v2  ;;  %v5772_v30 = vcombine.low %v615_v3, %v619_v5  ;;  %v3480_v43 = vadd.f32 %v6692_v18, %v3437_v19  ;;  %v6059_v44 = vld [vmem:[#allocation8 + $0x174] ss:$8 sps:$4 sm:$0xff]   ;;  %v6057_v18 = vld [vmem:[#allocation8 + $0x170] ss:$8 sps:$4 sm:$0xff]   ;;  %v6086_v2 = vld [vmem:[#allocation8 + $0x24] ss:$8 sps:$4 sm:$0xff]  }
 0x25a   :  { %3932 = vmatprep.subr.bf16.mxu0 %v5677_v16  ;;  %v479_v16 = vld [vmem:[#allocation5 + $0xa18] sm:$0xff]  ;;  %v3652_v35 = vadd.f32 %v3651_v14, %v3609_v12  ;;  %v6108_v12 = vld [vmem:[#allocation8 + $0xe0] ss:$8 sps:$4 sm:$0xff]  }
 0x25b   :  { %3974 = vmatpush2.bf16.msra.mxu1 %v5812_v11  ;;  %v5773_v11 = vcombine.high %v615_v3, %v619_v5  ;;  %v6068_v23 = vld [vmem:[#allocation8 + $0x54] ss:$8 sps:$4 sm:$0xff]   ;;  %v6069_v27 = vld [vmem:[#allocation8 + $0x150] ss:$8 sps:$4 sm:$0xff]   ;;  %v6089_v3 = vld [vmem:[#allocation8 + $0x124] ss:$8 sps:$4 sm:$0xff]  }
 0x25c   :  { %3975 = vmatprep.subr.bf16.mxu1 %v5805_v17  ;;  %v483_v17 = vld [vmem:[#allocation5 + $0xa38] sm:$0xff]  ;;  %v6084_v5 = vld [vmem:[#allocation8 + $0x20] ss:$8 sps:$4 sm:$0xff]  }
 0x25d   :  { %3933 = vmatpush2.bf16.msra.mxu0 %v5676_v55  ;;  %v3433_v55 = vadd.f32 %v6679_v54, %v3390_v39  ;;  %v5636_v37 = vcombine.low %v479_v16, %v483_v17  ;;  %v6056_v54 = vld [vmem:[#allocation8 + $0x74] ss:$8 sps:$4 sm:$0xff]   ;;  %v6078_v1 = vld [vmem:[#allocation8 + $0x30] ss:$8 sps:$4 sm:$0xff]   ;;  %v6120_v14 = vld [vmem:[#allocation8 + $0xc0] ss:$8 sps:$4 sm:$0xff]  }
 0x25e   :  { %3934 = vmatprep.subr.bf16.mxu0 %v5669_v31  ;;  %v3605_v31 = vadd.f32 %v6713_v45, %v3562_v22  ;;  %v4009_v45 = vmax.f32 %v3652_v35, 0.0  ;;  %v6071_v58 = vld [vmem:[#allocation8 + $0x154] ss:$8 sps:$4 sm:$0xff]   ;;  %v6081_v32 = vld [vmem:[#allocation8 + $0x130] ss:$8 sps:$4 sm:$0xff]  }
 0x25f   :  { %3976 = vmatpush2.bf16.msra.mxu1 %v5804_v15  ;;  %v5637_v15 = vcombine.high %v479_v16, %v483_v17  ;;  %v3476_v36 = vadd.f32 %v6681_v59, %v3433_v55  ;;  %v6080_v62 = vld [vmem:[#allocation8 + $0x34] ss:$8 sps:$4 sm:$0xff]   ;;  %v6090_v6 = vld [vmem:[#allocation8 + $0x10] ss:$8 sps:$4 sm:$0xff]   ;;  %v6099_v16 = vld [vmem:[#allocation8 + $0x100] ss:$8 sps:$4 sm:$0xff]  }
 0x260   :  { %3977 = vmatprep.subr.bf16.mxu1 %v5797_v34  ;;  %v5765_v34 = vcombine.high %v607_v60, %v611_v20  ;;  %v3648_v41 = vadd.f32 %v6715_v51, %v3605_v31  ;;  %v6060_v51 = vld [vmem:[#allocation8 + $0x60] ss:$8 sps:$4 sm:$0xff]   ;;  %v6095_v9 = vld [vmem:[#allocation8 + $0x114] ss:$8 sps:$4 sm:$0xff]   ;;  %v6102_v19 = vld [vmem:[#allocation8 + $0xf0] ss:$8 sps:$4 sm:$0xff]  }
 0x261   :  { %3935 = vmatpush2.bf16.msra.mxu0 %v5668_v48  ;;  %v4007_v48 = vmax.f32 %v3480_v43, 0.0  ;;  %v6104_v17 = vld [vmem:[#allocation8 + $0xf4] ss:$8 sps:$4 sm:$0xff]   ;;  %v6105_v60 = vld [vmem:[#allocation8 + $0x1f0] ss:$8 sps:$4 sm:$0xff]  }
 0x262   :  { %3936 = vmatprep.subr.bf16.mxu0 %v5661_v50  ;;  %v3999_v50 = vmax.f32 %v3476_v36, 0.0  ;;  %v6107_v39 = vld [vmem:[#allocation8 + $0x1f4] ss:$8 sps:$4 sm:$0xff]   ;;  %v6110_v20 = vld [vmem:[#allocation8 + $0xe4] ss:$8 sps:$4 sm:$0xff]  }
 0x263   :  { %3978 = vmatpush2.bf16.msra.mxu1 %v5796_v49  ;;  %v6054_v49 = vld [vmem:[#allocation8 + $0x70] ss:$8 sps:$4 sm:$0xff]   ;;  %v6113_v22 = vld [vmem:[#allocation8 + $0x1e4] ss:$8 sps:$4 sm:$0xff]   ;;  %v6116_v55 = vld [vmem:[#allocation8 + $0xd4] ss:$8 sps:$4 sm:$0xff]  }
 0x264   :  { %3979 = vmatprep.subr.bf16.mxu1 %v5789_v21  ;;  %v4001_v21 = vmax.f32 %v3648_v41, 0.0  ;;  %v4015_v59 = vpack.c.bf16 %v4007_v48, %v3999_v50  ;;  %v6117_v31 = vld [vmem:[#allocation8 + $0x1d0] ss:$8 sps:$4 sm:$0xff]   ;;  %v6125_v43 = vld [vmem:[#allocation8 + $0x1c4] ss:$8 sps:$4 sm:$0xff]  }
 0x265   :  { %3937 = vmatpush2.bf16.msra.mxu0 %v5660_v24  ;;  %v6066_v24 = vld [vmem:[#allocation8 + $0x50] ss:$8 sps:$4 sm:$0xff]   ;;  %v6123_v35 = vld [vmem:[#allocation8 + $0x1c0] ss:$8 sps:$4 sm:$0xff]   ;;  %v6131_v36 = vld [vmem:[#allocation8 + $0x1b4] ss:$8 sps:$4 sm:$0xff]  }
 0x266   :  { %3938 = vmatprep.subr.bf16.mxu0 %v5653_v61  ;;  %v4017_v57 = vpack.c.bf16 %v4009_v45, %v4001_v21  ;;  %v6075_v61 = vld [vmem:[#allocation8 + $0x140] ss:$8 sps:$4 sm:$0xff]   ;;  %v6134_v41 = vld [vmem:[#allocation8 + $0xa4] ss:$8 sps:$4 sm:$0xff]   ;;  %v6140_v50 = vld [vmem:[#allocation8 + $0x94] ss:$8 sps:$4 sm:$0xff]  }
 0x267   :  { %3980 = vmatpush2.bf16.msra.mxu1 %v5788_v63  ;;  %v6077_v63 = vld [vmem:[#allocation8 + $0x144] ss:$8 sps:$4 sm:$0xff]   ;;  %v6132_v48 = vld [vmem:[#allocation8 + $0xa0] ss:$8 sps:$4 sm:$0xff]   ;;  %v6143_v21 = vld [vmem:[#allocation8 + $0x194] ss:$8 sps:$4 sm:$0xff]  }
 0x268   :  { %3981 = vmatprep.subr.bf16.mxu1 %v5781_v0  ;;  %v6083_v0 = vld [vmem:[#allocation8 + $0x134] ss:$8 sps:$4 sm:$0xff]  }
 0x269   :  { %3939 = vmatpush2.bf16.msra.mxu0 %v5652_v53  ;;  %v6092_v53 = vld [vmem:[#allocation8 + $0x14] ss:$8 sps:$4 sm:$0xff]  }
 0x26a   :  { %3940 = vmatprep.subr.bf16.mxu0 %v5645_v10  ;;  %v6098_v10 = vld [vmem:[#allocation8 + $0x4] ss:$8 sps:$4 sm:$0xff]  }
 0x26b   :  { %3982 = vmatpush2.bf16.msra.mxu1 %v5780_v8  ;;  %v6093_v8 = vld [vmem:[#allocation8 + $0x110] ss:$8 sps:$4 sm:$0xff]  }
 0x26c   :  { %3983 = vmatprep.subr.bf16.mxu1 %v5773_v11  ;;  %v6096_v11 = vld [vmem:[#allocation8] ss:$8 sps:$4 sm:$0xff]  }
 0x26d   :  { %3941 = vmatpush2.bf16.msra.mxu0 %v5644_v29  ;;  %v6111_v29 = vld [vmem:[#allocation8 + $0x1e0] ss:$8 sps:$4 sm:$0xff]  }
 0x26e   :  { %3942 = vmatprep.subr.bf16.mxu0 %v5637_v15  ;;  %v6114_v15 = vld [vmem:[#allocation8 + $0xd0] ss:$8 sps:$4 sm:$0xff]  }
 0x26f   :  { %3984 = vmatpush2.bf16.msra.mxu1 %v5772_v30  ;;  %v6119_v30 = vld [vmem:[#allocation8 + $0x1d4] ss:$8 sps:$4 sm:$0xff]  }
 0x270   :  { %3985 = vmatprep.subr.bf16.mxu1 %v5765_v34  ;;  %v6122_v34 = vld [vmem:[#allocation8 + $0xc4] ss:$8 sps:$4 sm:$0xff]  }
 0x271   :  { %3943 = vmatpush2.bf16.msra.mxu0 %v5636_v37  ;;  %v6128_v37 = vld [vmem:[#allocation8 + $0xb4] ss:$8 sps:$4 sm:$0xff]  }
 0x272   :  { %4802 = vmatprep.subr.bf16.mxu0 %v6056_v54  ;;  %v6129_v54 = vld [vmem:[#allocation8 + $0x1b0] ss:$8 sps:$4 sm:$0xff]  }
 0x273   :  { %3986 = vmatpush2.bf16.msra.mxu1 %v5764_v40  ;;  %v6126_v40 = vld [vmem:[#allocation8 + $0xb0] ss:$8 sps:$4 sm:$0xff]  }
 0x274   :  { %4845 = vmatprep.subr.bf16.mxu1 %v6059_v44  ;;  %3945 = vmatmul.mubr.bf16.vlgmr.msra.gmra.mxu0 %v6638_v46  ;;  %v6074_v46 = vld [vmem:[#allocation8 + $0x44] ss:$8 sps:$4 sm:$0xff]   ;;  %v6746_v45 = vpop.f32.mrf.mxu0 }
 0x275   :  { %4803 = vmatpush1.bf16.msra.mxu0 %v6054_v49  ;;  %4834 = vmatprep.mubr.bf16.mxu0 %v4015_v59  ;;  %v6137_v44 = vld [vmem:[#allocation8 + $0x1a4] ss:$8 sps:$4 sm:$0xff]   ;;  %v6135_v49 = vld [vmem:[#allocation8 + $0x1a0] ss:$8 sps:$4 sm:$0xff]   ;;  %v6138_v59 = vld [vmem:[#allocation8 + $0x90] ss:$8 sps:$4 sm:$0xff]  }
 0x276   :  { %3988 = vmatmul.mubr.bf16.vlgmr.msra.gmra.mxu1 %v6642_v47  ;;  %4804 = vmatprep.subr.bf16.mxu0 %v6062_v52  ;;  %v6072_v47 = vld [vmem:[#allocation8 + $0x40] ss:$8 sps:$4 sm:$0xff]   ;;  %v692_v52 = vsub.s32 5, %v6652_v4 }
 0x277   :  { %4846 = vmatpush1.bf16.msra.mxu1 %v6057_v18  ;;  %4877 = vmatprep.mubr.bf16.mxu1 %v4017_v57  ;;  %v6748_v18 = vpop.f32.mrf.mxu1  ;;  %v6141_v57 = vld [vmem:[#allocation8 + $0x190] ss:$8 sps:$4 sm:$0xff]  }
 0x278   :  { %4847 = vmatprep.subr.bf16.mxu1 %v6065_v56  ;;  %v3690_v56 = vpop.f32.mrf.mxu0 }
 0x279   :  { %4805 = vmatpush1.bf16.msra.mxu0 %v6060_v51  ;;  %v6146_v51 = vld [vmem:[#allocation8 + $0x84] ss:$8 sps:$4 sm:$0xff]  }
 0x27a   :  { %4806 = vmatprep.subr.bf16.mxu0 %v6068_v23  ;;  %v6149_v23 = vld [vmem:[#allocation8 + $0x184] ss:$8 sps:$4 sm:$0xff]  }
 0x27b   :  { %4848 = vmatpush1.bf16.msra.mxu1 %v6063_v25  ;;  %v3733_v25 = vpop.f32.mrf.mxu1 }
 0x27c   :  { %4849 = vmatprep.subr.bf16.mxu1 %v6071_v58  ;;  %v693_v58 = vrot.slane %v6724_v42, %v692_v52  ;;  %v6218_v52 = vld [vmem:[#allocation8 + $0x314] ss:$8 sps:$4 sm:$0xff]  }
 0x27d   :  { %4807 = vmatpush1.bf16.msra.mxu0 %v6066_v24  ;;  %v6144_v24 = vld [vmem:[#allocation8 + $0x80] ss:$8 sps:$4 sm:$0xff]  }
 0x27e   :  { %4808 = vmatprep.subr.bf16.mxu0 %v6074_v46  ;;  %v6147_v46 = vld [vmem:[#allocation8 + $0x180] ss:$8 sps:$4 sm:$0xff]  }
 0x27f   :  { %4850 = vmatpush1.bf16.msra.mxu1 %v6069_v27  ;;  %v6752_v27 = vpop.f32.mrf.mxu0 }
 0x280   :  { %4851 = vmatprep.subr.bf16.mxu1 %v6077_v63  ;;  %v6152_v63 = vld [vmem:[#allocation8 + $0x274] ss:$8 sps:$4 sm:$0xff]  }
 0x281   :  { %4809 = vmatpush1.bf16.msra.mxu0 %v6072_v47  ;;  %v6754_v47 = vpop.f32.mrf.mxu1 }
 0x282   :  { %4810 = vmatprep.subr.bf16.mxu0 %v6080_v62  ;;  %v3691_v62 = vadd.f32 %v3690_v56, %v693_v58  ;;  %v6173_v56 = vld [vmem:[#allocation8 + $0x204] ss:$8 sps:$4 sm:$0xff]  }
 0x283   :  { %4852 = vmatpush1.bf16.msra.mxu1 %v6075_v61  ;;  %v6200_v61 = vld [vmem:[#allocation8 + $0x374] ss:$8 sps:$4 sm:$0xff]  }
 0x284   :  { %4853 = vmatprep.subr.bf16.mxu1 %v6083_v0  ;;  %v6150_v0 = vld [vmem:[#allocation8 + $0x270] ss:$8 sps:$4 sm:$0xff]  }
 0x285   :  { %4811 = vmatpush1.bf16.msra.mxu0 %v6078_v1  ;;  %v3694_v1 = vpop.f32.mrf.mxu0 }
 0x286   :  { %4812 = vmatprep.subr.bf16.mxu0 %v6086_v2  ;;  %v6198_v2 = vld [vmem:[#allocation8 + $0x370] ss:$8 sps:$4 sm:$0xff]  }
 0x287   :  { %4854 = vmatpush1.bf16.msra.mxu1 %v6081_v32  ;;  %v6155_v32 = vld [vmem:[#allocation8 + $0x264] ss:$8 sps:$4 sm:$0xff]  }
 0x288   :  { %4855 = vmatprep.subr.bf16.mxu1 %v6089_v3  ;;  %v3737_v3 = vpop.f32.mrf.mxu1 }
 0x289   :  { %4813 = vmatpush1.bf16.msra.mxu0 %v6084_v5  ;;  %v6203_v5 = vld [vmem:[#allocation8 + $0x364] ss:$8 sps:$4 sm:$0xff]  }
 0x28a   :  { %4814 = vmatprep.subr.bf16.mxu0 %v6092_v53  ;;  %v3734_v53 = vadd.f32 %v3733_v25, %v3691_v62  ;;  %v6171_v25 = vld [vmem:[#allocation8 + $0x200] ss:$8 sps:$4 sm:$0xff]   ;;  %v6227_v62 = vld [vmem:[#allocation8 + $0x3e4] ss:$8 sps:$4 sm:$0xff]  }
 0x28b   :  { %4856 = vmatpush1.bf16.msra.mxu1 %v6087_v33 }
 0x28c   :  { %4857 = vmatprep.subr.bf16.mxu1 %v6095_v9  ;;  %v3695_v9 = vadd.f32 %v3694_v1, %v693_v58  ;;  %v6219_v58 = vld [vmem:[#allocation8 + $0x300] ss:$8 sps:$4 sm:$0xff]   ;;  %v6182_v1 = vld [vmem:[#allocation8 + $0x2d4] ss:$8 sps:$4 sm:$0xff]  }
 0x28d   :  { %4815 = vmatpush1.bf16.msra.mxu0 %v6090_v6 }
 0x28e   :  { %4816 = vmatprep.subr.bf16.mxu0 %v6098_v10 }
 0x28f   :  { %4858 = vmatpush1.bf16.msra.mxu1 %v6093_v8  ;;  %v6153_v8 = vld [vmem:[#allocation8 + $0x260] ss:$8 sps:$4 sm:$0xff]  }
 0x290   :  { %4859 = vmatprep.subr.bf16.mxu1 %v6101_v26  ;;  %v6158_v26 = vld [vmem:[#allocation8 + $0x254] ss:$8 sps:$4 sm:$0xff]  }
 0x291   :  { %4817 = vmatpush1.bf16.msra.mxu0 %v6096_v11  ;;  %v6201_v11 = vld [vmem:[#allocation8 + $0x360] ss:$8 sps:$4 sm:$0xff]  }
 0x292   :  { %4818 = vmatprep.subr.bf16.mxu0 %v6104_v17 }
 0x293   :  { %4860 = vmatpush1.bf16.msra.mxu1 %v6099_v16 }
 0x294   :  { %4861 = vmatprep.subr.bf16.mxu1 %v6107_v39  ;;  %v6206_v39 = vld [vmem:[#allocation8 + $0x354] ss:$8 sps:$4 sm:$0xff]  }
 0x295   :  { %4819 = vmatpush2.bf16.msra.mxu0 %v6102_v19 }
 0x296   :  { %4820 = vmatprep.subr.bf16.mxu0 %v6110_v20  ;;  %v6156_v20 = vld [vmem:[#allocation8 + $0x250] ss:$8 sps:$4 sm:$0xff]  }
 0x297   :  { %4862 = vmatpush2.bf16.msra.mxu1 %v6105_v60 }
 0x298   :  { %4863 = vmatprep.subr.bf16.mxu1 %v6113_v22 }
 0x299   :  { %4821 = vmatpush2.bf16.msra.mxu0 %v6108_v12  ;;  %v6204_v12 = vld [vmem:[#allocation8 + $0x350] ss:$8 sps:$4 sm:$0xff]  }
 0x29a   :  { %4822 = vmatprep.subr.bf16.mxu0 %v6116_v55 }
 0x29b   :  { %4864 = vmatpush2.bf16.msra.mxu1 %v6111_v29 }
 0x29c   :  { %4865 = vmatprep.subr.bf16.mxu1 %v6119_v30  ;;  %v6209_v30 = vld [vmem:[#allocation8 + $0x344] ss:$8 sps:$4 sm:$0xff]  }
 0x29d   :  { %4823 = vmatpush2.bf16.msra.mxu0 %v6114_v15 }
 0x29e   :  { %4824 = vmatprep.subr.bf16.mxu0 %v6122_v34  ;;  %v6159_v34 = vld [vmem:[#allocation8 + $0x240] ss:$8 sps:$4 sm:$0xff]  }
 0x29f   :  { %4866 = vmatpush2.bf16.msra.mxu1 %v6117_v31 }
 0x2a0   :  { %4867 = vmatprep.subr.bf16.mxu1 %v6125_v43  ;;  %v6164_v43 = vld [vmem:[#allocation8 + $0x234] ss:$8 sps:$4 sm:$0xff]  }
 0x2a1   :  { %4825 = vmatpush2.bf16.msra.mxu0 %v6120_v14  ;;  %v6207_v14 = vld [vmem:[#allocation8 + $0x340] ss:$8 sps:$4 sm:$0xff]  }
 0x2a2   :  { %4826 = vmatprep.subr.bf16.mxu0 %v6128_v37 }
 0x2a3   :  { %4868 = vmatpush2.bf16.msra.mxu1 %v6123_v35 }
 0x2a4   :  { %4869 = vmatprep.subr.bf16.mxu1 %v6131_v36  ;;  %v6212_v36 = vld [vmem:[#allocation8 + $0x334] ss:$8 sps:$4 sm:$0xff]  }
 0x2a5   :  { %4827 = vmatpush2.bf16.msra.mxu0 %v6126_v40 }
 0x2a6   :  { %4828 = vmatprep.subr.bf16.mxu0 %v6134_v41  ;;  %v6167_v41 = vld [vmem:[#allocation8 + $0x224] ss:$8 sps:$4 sm:$0xff]  }
 0x2a7   :  { %4870 = vmatpush2.bf16.msra.mxu1 %v6129_v54  ;;  %v6162_v54 = vld [vmem:[#allocation8 + $0x230] ss:$8 sps:$4 sm:$0xff]  }
 0x2a8   :  { %4871 = vmatprep.subr.bf16.mxu1 %v6137_v44  ;;  %v6210_v44 = vld [vmem:[#allocation8 + $0x330] ss:$8 sps:$4 sm:$0xff]  }
 0x2a9   :  { %4829 = vmatpush2.bf16.msra.mxu0 %v6132_v48  ;;  %v6215_v48 = vld [vmem:[#allocation8 + $0x324] ss:$8 sps:$4 sm:$0xff]  }
 0x2aa   :  { %4830 = vmatprep.subr.bf16.mxu0 %v6140_v50  ;;  %v6170_v50 = vld [vmem:[#allocation8 + $0x214] ss:$8 sps:$4 sm:$0xff]  }
 0x2ab   :  { %4872 = vmatpush2.bf16.msra.mxu1 %v6135_v49  ;;  %v6165_v49 = vld [vmem:[#allocation8 + $0x220] ss:$8 sps:$4 sm:$0xff]  }
 0x2ac   :  { %4873 = vmatprep.subr.bf16.mxu1 %v6143_v21  ;;  %v6213_v21 = vld [vmem:[#allocation8 + $0x320] ss:$8 sps:$4 sm:$0xff]  }
 0x2ad   :  { %4831 = vmatpush2.bf16.msra.mxu0 %v6138_v59  ;;  %v6168_v59 = vld [vmem:[#allocation8 + $0x210] ss:$8 sps:$4 sm:$0xff]  }
 0x2ae   :  { %4832 = vmatprep.subr.bf16.mxu0 %v6146_v51  ;;  %v6221_v51 = vld [vmem:[#allocation8 + $0x304] ss:$8 sps:$4 sm:$0xff]  }
 0x2af   :  { %4874 = vmatpush2.bf16.msra.mxu1 %v6141_v57  ;;  %v6216_v57 = vld [vmem:[#allocation8 + $0x310] ss:$8 sps:$4 sm:$0xff]  }
 0x2b0   :  { %4875 = vmatprep.subr.bf16.mxu1 %v6149_v23  ;;  %v6176_v23 = vld [vmem:[#allocation8 + $0x2f4] ss:$8 sps:$4 sm:$0xff]  }
 0x2b1   :  { %4833 = vmatpush2.bf16.msra.mxu0 %v6144_v24  ;;  %v6224_v24 = vld [vmem:[#allocation8 + $0x3f4] ss:$8 sps:$4 sm:$0xff]  }
 0x2b2   :  { %4888 = vmatprep.subr.bf16.mxu0 %v6152_v63  ;;  %v6179_v63 = vld [vmem:[#allocation8 + $0x2e4] ss:$8 sps:$4 sm:$0xff]  }
 0x2b3   :  { %4876 = vmatpush2.bf16.msra.mxu1 %v6147_v46  ;;  %v6174_v46 = vld [vmem:[#allocation8 + $0x2f0] ss:$8 sps:$4 sm:$0xff]  }
 0x2b4   :  { %4931 = vmatprep.subr.bf16.mxu1 %v6200_v61  ;;  %v6756_v33 = vpop.f32.mrf.mxu0  ;;  %4835 = vmatmul.mubr.bf16.vlgmr.msra.gmra.mxu0 %v6686_v28  ;;  %v3738_v28 = vadd.f32 %v3737_v3, %v3695_v9  ;;  %v6222_v61 = vld [vmem:[#allocation8 + $0x3f0] ss:$8 sps:$4 sm:$0xff]  }
 0x2b5   :  { %4889 = vmatpush1.bf16.msra.mxu0 %v6150_v0  ;;  %v6177_v0 = vld [vmem:[#allocation8 + $0x2e0] ss:$8 sps:$4 sm:$0xff]   ;;  %v6180_v3 = vld [vmem:[#allocation8 + $0x2d0] ss:$8 sps:$4 sm:$0xff]  }
 0x2b6   :  { %v6759_v6 = vpop.f32.mrf.mxu1  ;;  %4878 = vmatmul.mubr.bf16.vlgmr.msra.gmra.mxu1 %v6720_v7  ;;  %v3776_v10 = vpop.f32.mrf.mxu0  ;;  %4890 = vmatprep.subr.bf16.mxu0 %v6155_v32  ;;  %v6161_v7 = vld [vmem:[#allocation8 + $0x244] ss:$8 sps:$4 sm:$0xff]   ;;  %v6225_v32 = vld [vmem:[#allocation8 + $0x3e0] ss:$8 sps:$4 sm:$0xff]   ;;  %v6228_v9 = vld [vmem:[#allocation8 + $0x3d0] ss:$8 sps:$4 sm:$0xff]  }
 0x2b7   :  { %4932 = vmatpush1.bf16.msra.mxu1 %v6198_v2  ;;  %v3777_v16 = vadd.f32 %v3776_v10, %v3734_v53  ;;  %v6230_v2 = vld [vmem:[#allocation8 + $0x3d4] ss:$8 sps:$4 sm:$0xff]   ;;  %v6185_v53 = vld [vmem:[#allocation8 + $0x2c4] ss:$8 sps:$4 sm:$0xff]   ;;  %v6183_v10 = vld [vmem:[#allocation8 + $0x2c0] ss:$8 sps:$4 sm:$0xff]  }
 0x2b8   :  { %v3819_v17 = vpop.f32.mrf.mxu1  ;;  %4933 = vmatprep.subr.bf16.mxu1 %v6203_v5  ;;  %v6762_v19 = vpop.f32.mrf.mxu0  ;;  %v688_v5 = vsub.s32 4, %v6652_v4 }
 0x2b9   :  { %4891 = vmatpush1.bf16.msra.mxu0 %v6153_v8  ;;  %v3820_v29 = vadd.f32 %v3819_v17, %v3777_v16  ;;  %v6233_v8 = vld [vmem:[#allocation8 + $0x3c4] ss:$8 sps:$4 sm:$0xff]   ;;  %v6231_v16 = vld [vmem:[#allocation8 + $0x3c0] ss:$8 sps:$4 sm:$0xff]   ;;  %v6236_v17 = vld [vmem:[#allocation8 + $0x3b4] ss:$8 sps:$4 sm:$0xff]  }
 0x2ba   :  { %v6764_v60 = vpop.f32.mrf.mxu1  ;;  %v3780_v22 = vpop.f32.mrf.mxu0  ;;  %4892 = vmatprep.subr.bf16.mxu0 %v6158_v26  ;;  %v689_v26 = vrot.slane %v6724_v42, %v688_v5 }
 0x2bb   :  { %4934 = vmatpush1.bf16.msra.mxu1 %v6201_v11  ;;  %v3781_v55 = vadd.f32 %v3780_v22, %v3738_v28  ;;  %v4003_v35 = vmax.f32 %v3820_v29, 0.0  ;;  %v6188_v11 = vld [vmem:[#allocation8 + $0x2b4] ss:$8 sps:$4 sm:$0xff]   ;;  %v6186_v28 = vld [vmem:[#allocation8 + $0x2b0] ss:$8 sps:$4 sm:$0xff]  }
 0x2bc   :  { %4935 = vmatprep.subr.bf16.mxu1 %v6206_v39  ;;  %v3823_v15 = vpop.f32.mrf.mxu1  ;;  %v3693_v39 = vadd.f32 %v6752_v27, %v689_v26  ;;  %v6191_v22 = vld [vmem:[#allocation8 + $0x2a4] ss:$8 sps:$4 sm:$0xff]   ;;  %v6194_v27 = vld [vmem:[#allocation8 + $0x294] ss:$8 sps:$4 sm:$0xff]  }
 0x2bd   :  { %v3824_v31 = vadd.f32 %v3823_v15, %v3781_v55  ;;  %4893 = vmatpush1.bf16.msra.mxu0 %v6156_v20  ;;  %v3689_v20 = vadd.f32 %v6746_v45, %v689_v26  ;;  %v6189_v55 = vld [vmem:[#allocation8 + $0x2a0] ss:$8 sps:$4 sm:$0xff]   ;;  %v6242_v45 = vld [vmem:[#allocation8 + $0x394] ss:$8 sps:$4 sm:$0xff]  }
 0x2be   :  { %4894 = vmatprep.subr.bf16.mxu0 %v6161_v7  ;;  %v6234_v7 = vld [vmem:[#allocation8 + $0x3b0] ss:$8 sps:$4 sm:$0xff]   ;;  %v3736_v29 = vadd.f32 %v6754_v47, %v3693_v39  ;;  %v6197_v47 = vld [vmem:[#allocation8 + $0x284] ss:$8 sps:$4 sm:$0xff]  }
 0x2bf   :  { %4936 = vmatpush1.bf16.msra.mxu1 %v6204_v12  ;;  %v4011_v37 = vmax.f32 %v3824_v31, 0.0  ;;  %v6239_v12 = vld [vmem:[#allocation8 + $0x3a4] ss:$8 sps:$4 sm:$0xff]   ;;  %v6237_v31 = vld [vmem:[#allocation8 + $0x3a0] ss:$8 sps:$4 sm:$0xff]  }
 0x2c0   :  { %4937 = vmatprep.subr.bf16.mxu1 %v6209_v30  ;;  %v3732_v30 = vadd.f32 %v6748_v18, %v3689_v20  ;;  %v3779_v15 = vadd.f32 %v6762_v19, %v3736_v29  ;;  %v6245_v18 = vld [vmem:[#allocation8 + $0x384] ss:$8 sps:$4 sm:$0xff]  }
 0x2c1   :  { %v4019_v40 = vpack.c.bf16 %v4011_v37, %v4003_v35  ;;  %4895 = vmatpush1.bf16.msra.mxu0 %v6159_v34  ;;  %v6240_v35 = vld [vmem:[#allocation8 + $0x390] ss:$8 sps:$4 sm:$0xff]   ;;  %v6195_v37 = vld [vmem:[#allocation8 + $0x280] ss:$8 sps:$4 sm:$0xff]  }
 0x2c2   :  { %4896 = vmatprep.subr.bf16.mxu0 %v6164_v43  ;;  %v3775_v34 = vadd.f32 %v6756_v33, %v3732_v30  ;;  %v6192_v43 = vld [vmem:[#allocation8 + $0x290] ss:$8 sps:$4 sm:$0xff]  }
 0x2c3   :  { %4938 = vmatpush1.bf16.msra.mxu1 %v6207_v14  ;;  %4920 = vmatprep.mubr.bf16.mxu0 %v4019_v40  ;;  %v3822_v14 = vadd.f32 %v6764_v60, %v3779_v15  ;;  %v6243_v40 = vld [vmem:[#allocation8 + $0x380] ss:$8 sps:$4 sm:$0xff]  }
 0x2c4   :  { %4939 = vmatprep.subr.bf16.mxu1 %v6212_v36  ;;  %v3818_v19 = vadd.f32 %v6759_v6, %v3775_v34  ;;  %v6253_v34 = vld [vmem:[#allocation11 + $0x20] sm:$0xff]  }
 0x2c5   :  { %4897 = vmatpush1.bf16.msra.mxu0 %v6162_v54  ;;  %v4010_v36 = vmax.f32 %v3822_v14, 0.0  ;;  %v6255_v14 = vld [vmem:[#allocation11 + $0x18] sm:$0xff]  }
 0x2c6   :  { %4898 = vmatprep.subr.bf16.mxu0 %v6167_v41  ;;  %v4002_v33 = vmax.f32 %v3818_v19, 0.0  ;;  %v6259_v19 = vld [vmem:[#allocation11 + $0x8] sm:$0xff]  }
 0x2c7   :  { %4940 = vmatpush1.bf16.msra.mxu1 %v6210_v44  ;;  %v700_v44 = vsub.s32 7, %v6652_v4 }
 0x2c8   :  { %4941 = vmatprep.subr.bf16.mxu1 %v6215_v48  ;;  %v4018_v54 = vpack.c.bf16 %v4010_v36, %v4002_v33  ;;  %v696_v48 = vsub.s32 6, %v6652_v4  ;;  %v6261_v36 = vld [vmem:[#allocation11] sm:$0xff]   ;;  %v6498_v33 = vmov 0.0  }
 0x2c9   :  { %4899 = vmatpush1.bf16.msra.mxu0 %v6165_v49 }
 0x2ca   :  { %4900 = vmatprep.subr.bf16.mxu0 %v6170_v50  ;;  %v701_v50 = vrot.slane %v6724_v42, %v700_v44 }
 0x2cb   :  { %4942 = vmatpush1.bf16.msra.mxu1 %v6213_v21  ;;  %v697_v21 = vrot.slane %v6724_v42, %v696_v48 }
 0x2cc   :  { %4943 = vmatprep.subr.bf16.mxu1 %v6218_v52 }
 0x2cd   :  { %4901 = vmatpush1.bf16.msra.mxu0 %v6168_v59 }
 0x2ce   :  { %4902 = vmatprep.subr.bf16.mxu0 %v6173_v56 }
 0x2cf   :  { %4944 = vmatpush1.bf16.msra.mxu1 %v6216_v57 }
 0x2d0   :  { %4945 = vmatprep.subr.bf16.mxu1 %v6221_v51 }
 0x2d1   :  { %4903 = vmatpush1.bf16.msra.mxu0 %v6171_v25 }
 0x2d2   :  { %4904 = vmatprep.subr.bf16.mxu0 %v6176_v23 }
 0x2d3   :  { %4946 = vmatpush1.bf16.msra.mxu1 %v6219_v58 }
 0x2d4   :  { %4947 = vmatprep.subr.bf16.mxu1 %v6224_v24 }
 0x2d5   :  { %4905 = vmatpush2.bf16.msra.mxu0 %v6174_v46 }
 0x2d6   :  { %4906 = vmatprep.subr.bf16.mxu0 %v6179_v63 }
 0x2d7   :  { %4948 = vmatpush2.bf16.msra.mxu1 %v6222_v61 }
 0x2d8   :  { %4949 = vmatprep.subr.bf16.mxu1 %v6227_v62 }
 0x2d9   :  { %4907 = vmatpush2.bf16.msra.mxu0 %v6177_v0 }
 0x2da   :  { %4908 = vmatprep.subr.bf16.mxu0 %v6182_v1 }
 0x2db   :  { %4950 = vmatpush2.bf16.msra.mxu1 %v6225_v32 }
 0x2dc   :  { %4951 = vmatprep.subr.bf16.mxu1 %v6230_v2 }
 0x2dd   :  { %4909 = vmatpush2.bf16.msra.mxu0 %v6180_v3 }
 0x2de   :  { %4910 = vmatprep.subr.bf16.mxu0 %v6185_v53 }
 0x2df   :  { %4952 = vmatpush2.bf16.msra.mxu1 %v6228_v9 }
 0x2e0   :  { %4953 = vmatprep.subr.bf16.mxu1 %v6233_v8 }
 0x2e1   :  { %4911 = vmatpush2.bf16.msra.mxu0 %v6183_v10 }
 0x2e2   :  { %4912 = vmatprep.subr.bf16.mxu0 %v6188_v11  ;;  %v6246_v11 = vld [vmem:[#allocation11 + $0x78] sm:$0xff]  }
 0x2e3   :  { %4954 = vmatpush2.bf16.msra.mxu1 %v6231_v16  ;;  %v6247_v16 = vld [vmem:[#allocation11 + $0x38] sm:$0xff]  }
 0x2e4   :  { %4955 = vmatprep.subr.bf16.mxu1 %v6236_v17  ;;  %v6248_v17 = vld [vmem:[#allocation11 + $0x70] sm:$0xff]  }
 0x2e5   :  { %4913 = vmatpush2.bf16.msra.mxu0 %v6186_v28 }
 0x2e6   :  { %4914 = vmatprep.subr.bf16.mxu0 %v6191_v22 }
 0x2e7   :  { %4956 = vmatpush2.bf16.msra.mxu1 %v6234_v7  ;;  %v6249_v7 = vld [vmem:[#allocation11 + $0x30] sm:$0xff]  }
 0x2e8   :  { %4957 = vmatprep.subr.bf16.mxu1 %v6239_v12 }
 0x2e9   :  { %4915 = vmatpush2.bf16.msra.mxu0 %v6189_v55  ;;  %v6250_v55 = vld [vmem:[#allocation11 + $0x68] sm:$0xff]  }
 0x2ea   :  { %4916 = vmatprep.subr.bf16.mxu0 %v6194_v27 }
 0x2eb   :  { %4958 = vmatpush2.bf16.msra.mxu1 %v6237_v31  ;;  %v6251_v31 = vld [vmem:[#allocation11 + $0x28] sm:$0xff]  }
 0x2ec   :  { %4959 = vmatprep.subr.bf16.mxu1 %v6242_v45  ;;  %v6252_v45 = vld [vmem:[#allocation11 + $0x60] sm:$0xff]  }
 0x2ed   :  { %4917 = vmatpush2.bf16.msra.mxu0 %v6192_v43  ;;  %v6254_v43 = vld [vmem:[#allocation11 + $0x58] sm:$0xff]  }
 0x2ee   :  { %4918 = vmatprep.subr.bf16.mxu0 %v6197_v47  ;;  %v6256_v47 = vld [vmem:[#allocation11 + $0x50] sm:$0xff]  }
 0x2ef   :  { %4960 = vmatpush2.bf16.msra.mxu1 %v6240_v35  ;;  %v6257_v35 = vld [vmem:[#allocation11 + $0x10] sm:$0xff]  }
 0x2f0   :  { %4961 = vmatprep.subr.bf16.mxu1 %v6245_v18  ;;  %v6258_v18 = vld [vmem:[#allocation11 + $0x48] sm:$0xff]  }
 0x2f1   :  { %4919 = vmatpush2.bf16.msra.mxu0 %v6195_v37  ;;  %v6260_v37 = vld [vmem:[#allocation11 + $0x40] sm:$0xff]  }
 0x2f2   :  { %5985 = vmatprep.subr.bf16.mxu0 %v6246_v11 }
 0x2f3   :  { %4962 = vmatpush2.bf16.msra.mxu1 %v6243_v40  ;;  %v6262_v40 = vld [vmem:[#allocation14 + $0x38] sm:$0xff]  }
 0x2f4   :  { %4921 = vmatmul.mubr.bf16.vlgmr.msra.gmra.mxu0 %v4018_v54  ;;  %v3860_v60 = vpop.f32.mrf.mxu0  ;;  %6016 = vmatprep.subr.bf16.mxu1 %v6498_v33  ;;  %v6263_v54 = vld [vmem:[#allocation14 + $0x30] sm:$0xff]  }
 0x2f5   :  { %v3861_v57 = vadd.f32 %v3860_v60, %v697_v21  ;;  %5986 = vmatpush3.bf16.msra.mxu0 %v6247_v16  ;;  %v6264_v60 = vld [vmem:[#allocation14 + $0x28] sm:$0xff]  }
 0x2f6   :  { %v3903_v41 = vpop.f32.mrf.mxu1  ;;  %v3862_v49 = vpop.f32.mrf.mxu0  ;;  %5987 = vmatprep.subr.bf16.mxu0 %v6248_v17 }
 0x2f7   :  { %v3863_v56 = vadd.f32 %v3862_v49, %v701_v50  ;;  %v3904_v61 = vadd.f32 %v3903_v41, %v3861_v57  ;;  %v6265_v41 = vld [vmem:[#allocation14 + $0x20] sm:$0xff]  }
 0x2f8   :  { %v3905_v6 = vpop.f32.mrf.mxu1  ;;  %v3864_v52 = vpop.f32.mrf.mxu0 }
 0x2f9   :  { %v3865_v25 = vadd.f32 %v3864_v52, %v697_v21  ;;  %v3906_v24 = vadd.f32 %v3905_v6, %v3863_v56  ;;  %5988 = vmatpush3.bf16.msra.mxu0 %v6249_v7  ;;  %v6266_v7 = vld [vmem:[#allocation14 + $0x18] sm:$0xff]  }
 0x2fa   :  { %v3907_v59 = vpop.f32.mrf.mxu1  ;;  %v3866_v51 = vpop.f32.mrf.mxu0  ;;  %5989 = vmatprep.subr.bf16.mxu0 %v6250_v55  ;;  %v6269_v55 = vld [vmem:[#allocation14] sm:$0xff]  }
 0x2fb   :  { %v3867_v46 = vadd.f32 %v3866_v51, %v701_v50  ;;  %v3908_v0 = vadd.f32 %v3907_v59, %v3865_v25  ;;  %v4150_v59 = vld [vmem:[#allocation10] sm:$0x3] }
 0x2fc   :  { %v3909_v23 = vpop.f32.mrf.mxu1  ;;  %v4159_v56 = vrot.slane %v4150_v59, %v676_v38  ;;  %v4155_v57 = vrot.slane %v4150_v59, %v672_v13 }
 0x2fd   :  { %v3910_v5 = vadd.f32 %v3909_v23, %v3867_v46  ;;  %5990 = vmatpush3.bf16.msra.mxu0 %v6251_v31  ;;  %v5950_v31 = vld [vmem:[#allocation13] ss:$0 sm:$0xff] }
 0x2fe   :  { %5991 = vmatprep.subr.bf16.mxu0 %v6252_v45 }
 0x301   :  { %5992 = vmatpush3.bf16.msra.mxu0 %v6253_v34 }
 0x302   :  { %5993 = vmatprep.subr.bf16.mxu0 %v6254_v43 }
 0x305   :  { %5994 = vmatpush3.bf16.msra.mxu0 %v6255_v14 }
 0x306   :  { %5995 = vmatprep.subr.bf16.mxu0 %v6256_v47 }
 0x309   :  { %5996 = vmatpush3.bf16.msra.mxu0 %v6257_v35 }
 0x30a   :  { %5997 = vmatprep.subr.bf16.mxu0 %v6258_v18 }
 0x30d   :  { %5998 = vmatpush3.bf16.msra.mxu0 %v6259_v19 }
 0x30e   :  { %5999 = vmatprep.subr.bf16.mxu0 %v6260_v37 }
 0x311   :  { %6000 = vmatpush3.bf16.msra.mxu0 %v6261_v36  ;;  %v5967_v36 = vld [vmem:[#allocation16] ss:$0 sm:$0xff] }
 0x334   :  { %v3946_v58 = vpop.f32.mrf.mxu0 }
 0x335   :  { %v3947_v2 = vadd.f32 %v3946_v58, %v3904_v61 }
 0x336   :  { %v3989_v63 = vpop.f32.mrf.mxu1  ;;  %v3948_v62 = vpop.f32.mrf.mxu0 }
 0x337   :  { %v3949_v1 = vadd.f32 %v3948_v62, %v3906_v24  ;;  %v3990_v39 = vadd.f32 %v3989_v63, %v3947_v2 }
 0x338   :  { %v3991_v32 = vpop.f32.mrf.mxu1  ;;  %v3950_v3 = vpop.f32.mrf.mxu0 }
 0x339   :  { %v3951_v42 = vadd.f32 %v3950_v3, %v3908_v0  ;;  %v3992_v8 = vadd.f32 %v3991_v32, %v3949_v1  ;;  %v4004_v30 = vmax.f32 %v3990_v39, 0.0 }
 0x33a   :  { %v3993_v53 = vpop.f32.mrf.mxu1  ;;  %v3952_v9 = vpop.f32.mrf.mxu0 }
 0x33b   :  { %v3994_v10 = vadd.f32 %v3993_v53, %v3951_v42  ;;  %v3953_v26 = vadd.f32 %v3952_v9, %v3910_v5  ;;  %v4005_v12 = vmax.f32 %v3992_v8, 0.0 }
 0x33c   :  { %v3995_v28 = vpop.f32.mrf.mxu1 }
 0x33d   :  { %v3996_v20 = vadd.f32 %v3995_v28, %v3953_v26  ;;  %v4012_v22 = vmax.f32 %v3994_v10, 0.0 }
 0x33f   :  { %v4013_v29 = vmax.f32 %v3996_v20, 0.0  ;;  %v4020_v27 = vpack.c.bf16 %v4012_v22, %v4004_v30 }
 0x341   :  { %v4021_v15 = vpack.c.bf16 %v4013_v29, %v4005_v12  ;;  %v6267_v12 = vld [vmem:[#allocation14 + $0x10] sm:$0xff]   ;;  %v6268_v29 = vld [vmem:[#allocation14 + $0x8] sm:$0xff]  }
 0x343   :  { %4963 = vmatprep.mubr.bf16.mxu1 %v4021_v15 }
 0x344   :  { %4964 = vmatmul.mubr.bf16.vlgmr.msra.gmra.mxu1 %v4020_v27 }
 0x345   :  { %6017 = vmatpush3.bf16.msra.mxu1 %v6262_v40  ;;  %6032 = vmatprep.mubr.msk.bf16.mxu1 %vm6499_vm0, %v6498_v33 }
 0x346   :  { %6018 = vmatprep.subr.bf16.mxu1 %v6498_v33 }
 0x349   :  { %6019 = vmatpush3.bf16.msra.mxu1 %v6263_v54 }
 0x34a   :  { %6020 = vmatprep.subr.bf16.mxu1 %v6498_v33 }
 0x34d   :  { %6021 = vmatpush3.bf16.msra.mxu1 %v6264_v60 }
 0x34e   :  { %6022 = vmatprep.subr.bf16.mxu1 %v6498_v33 }
 0x351   :  { %6023 = vmatpush3.bf16.msra.mxu1 %v6265_v41 }
 0x352   :  { %6024 = vmatprep.subr.bf16.mxu1 %v6498_v33 }
 0x355   :  { %6025 = vmatpush3.bf16.msra.mxu1 %v6266_v7 }
 0x356   :  { %6026 = vmatprep.subr.bf16.mxu1 %v6498_v33 }
 0x359   :  { %6027 = vmatpush3.bf16.msra.mxu1 %v6267_v12 }
 0x35a   :  { %6028 = vmatprep.subr.bf16.mxu1 %v6498_v33 }
 0x35d   :  { %6029 = vmatpush3.bf16.msra.mxu1 %v6268_v29 }
 0x35e   :  { %6030 = vmatprep.subr.bf16.mxu1 %v6498_v33 }
 0x361   :  { %6031 = vmatpush3.bf16.msra.mxu1 %v6269_v55 }
 0x374   :  { %v4836_v44 = vpop.f32.mrf.mxu0 }
 0x375   :  { %v4837_v24 = vadd.f32 %v4836_v44, %v4155_v57 }
 0x376   :  { %v4838_v48 = vpop.f32.mrf.mxu0  ;;  %v4879_v6 = vpop.f32.mrf.mxu1 }
 0x377   :  { %v4839_v23 = vadd.f32 %v4838_v48, %v4159_v56  ;;  %v4880_v32 = vadd.f32 %v4879_v6, %v4837_v24 }
 0x378   :  { %v4840_v49 = vpop.f32.mrf.mxu0  ;;  %v4881_v21 = vpop.f32.mrf.mxu1 }
 0x379   :  { %v4841_v58 = vadd.f32 %v4840_v49, %v4155_v57  ;;  %v4882_v0 = vadd.f32 %v4881_v21, %v4839_v23 }
 0x37a   :  { %v4842_v50 = vpop.f32.mrf.mxu0  ;;  %v4883_v51 = vpop.f32.mrf.mxu1 }
 0x37b   :  { %v4843_v61 = vadd.f32 %v4842_v50, %v4159_v56  ;;  %v4884_v1 = vadd.f32 %v4883_v51, %v4841_v58 }
 0x37c   :  { %v4885_v46 = vpop.f32.mrf.mxu1 }
 0x37d   :  { %v4886_v5 = vadd.f32 %v4885_v46, %v4843_v61 }
 0x3b4   :  { %v4922_v52 = vpop.f32.mrf.mxu0 }
 0x3b5   :  { %v4923_v53 = vadd.f32 %v4922_v52, %v4880_v32 }
 0x3b6   :  { %v4924_v25 = vpop.f32.mrf.mxu0 }
 0x3b7   :  { %v4925_v42 = vadd.f32 %v4924_v25, %v4882_v0 }
 0x3b8   :  { %v4926_v63 = vpop.f32.mrf.mxu0 }
 0x3b9   :  { %v4927_v38 = vadd.f32 %v4926_v63, %v4884_v1 }
 0x3ba   :  { %v4928_v2 = vpop.f32.mrf.mxu0 }
 0x3bb   :  { %v4929_v13 = vadd.f32 %v4928_v2, %v4886_v5 }
 0x404   :  { %v4965_v62 = vpop.f32.mrf.mxu1 }
 0x405   :  { %v4966_v10 = vadd.f32 %v4965_v62, %v4923_v53 }
 0x406   :  { %v4967_v3 = vpop.f32.mrf.mxu1 }
 0x407   :  { %v4968_v9 = vadd.f32 %v4967_v3, %v4925_v42  ;;  %v4974_v28 = vmax.f32 %v4966_v10, 0.0 }
 0x408   :  { %v4969_v4 = vpop.f32.mrf.mxu1 }
 0x409   :  { %v4970_v8 = vadd.f32 %v4969_v4, %v4927_v38  ;;  %v4975_v17 = vmax.f32 %v4968_v9, 0.0 }
 0x40a   :  { %v4971_v26 = vpop.f32.mrf.mxu1 }
 0x40b   :  { %v4972_v11 = vadd.f32 %v4971_v26, %v4929_v13  ;;  %v4976_v16 = vmax.f32 %v4970_v8, 0.0 }
 0x40d   :  { %v4977_v39 = vmax.f32 %v4972_v11, 0.0  ;;  %v4978_v22 = vpack.c.bf16 %v4976_v16, %v4974_v28 }
 0x40f   :  { %v4979_v20 = vpack.c.bf16 %v4977_v39, %v4975_v17 }
 0x411   :  { %5147 = vmatprep.mubr.bf16.mxu0 %v4979_v20 }
 0x412   :  { %5148 = vmatmul.mubr.bf16.vlgmr.msra.gmra.mxu0 %v4978_v22 }
 0x4d2   :  { %v6001_v30 = vpop.f32.mrf.mxu0 }
 0x4d4   :  { %v6002_v15 = vpop.f32.mrf.mxu0 }
 0x4d5   :  { %v6003_v27 = vadd.f32 %v6002_v15, %v6001_v30 }
 0x4d6   :  { %v6004_v45 = vpop.f32.mrf.mxu0 }
 0x4d7   :  { %v5150_v43 = vadd.f32 %v6003_v27, %v5950_v31 }
 0x4d8   :  { %v6005_v34 = vpop.f32.mrf.mxu0 }
 0x4d9   :  { %v6006_v14 = vadd.f32 %v6005_v34, %v6004_v45  ;;  %v5156_v35 = vmax.f32 %v5150_v43, 0.0 }
 0x4db   :  { %v5153_v47 = vadd.f32 %v6006_v14, %v5950_v31 }
 0x4dd   :  { %v5157_v18 = vmax.f32 %v5153_v47, 0.0 }
 0x4df   :  { %v5158_v19 = vpack.c.bf16 %v5157_v18, %v5156_v35 }
 0x4e1   :  { %6033 = vmatmul.mubr.bf16.vlgmr.msra.gmra.mxu1 %v5158_v19 }
 0x5a1   :  { %v5264_v37 = vpop.f32.mrf.mxu1 }
 0x5a2   :  { %v5265_v33 = vadd.f32 %v5967_v36, %v5264_v37 }
 0x5a3   :  { %v6034_v40 = vpop.f32.mrf.mxu1 }
 0x5a5   :  { %v5267_v54 = vpop.f32.mrf.mxu1 }
 0x5a6   :  { %v5268_v60 = vadd.f32 %v5967_v36, %v5267_v54 }
 0x5a7   :  { %v6035_v41 = vpop.f32.mrf.mxu1 }
 0x5a8   :  { %v5983_v44 = vpack.c.bf16 %v5268_v60, %v5265_v33 }
 0x5aa   :  { %5984 = vst [vmem:[#allocation17] sm:$0xff] %v5983_v44  }
 0x5ab   :  { %6462 = shalt.err (!%p6459_p7)
}
 0x5ac   :  { %5292 = dma.vmem_to_hbm [thread:$0]  %s5287_s8, 128, %s6808_s9, [#allocation4], %s6490_s1, %s6490_s1, %s6491_s26  }
 0x5ad   :  { %6481 = dma.done.wait [#allocation4], 128  }
 0x5ae   :  { %6482 = vsyncadd [#allocation4], 4294967168 }
 0x5af   :  { %5296 = vsyncpa [#allocation3], 1 }
 0x5b0   :  { %5297 = vsyncpa [#allocation6], 1 }
 0x5b1   :  { %5298 = vsyncpa [#allocation9], 1 }
 0x5b2   :  { %5299 = vsyncpa [#allocation12], 1 }
 0x5b3   :  { %5300 = vsyncpa [#allocation15], 1 }
 0x5b4   :  { %5301 = vsyncpa [#allocation4], 1 }

</bundles_post_ra>
